<compile_context>
chip_gen: v5e
topology: v5e:2x2
jax: 0.10.0
libtpu: 0.0.40
codegen_flags: <defaults>
</compile_context>

<pallas_src>
import jax
import jax.numpy as jnp
import numpy as np
from jax.experimental import pallas as pl
from jax.experimental.pallas import tpu as pltpu


# --------------------------------------------------------------------------
# kernel
# --------------------------------------------------------------------------
def _double_conv_kernel(xm_ref, xt_ref, xb_ref,
                        w1_ref, s1_ref, b1_ref,
                        w2_ref, s2_ref, b2_ref,
                        o_ref,
                        xs_ref, mid_ref, p1_ref, p2_ref):
    """Fused (conv3x3 -> BN(eval) -> ReLU) x 2 for one (batch, row-tile) step.

    xm_ref : (1, TH, W, Cin)   row tile            rows [R0, R0+TH)
    xt_ref : (1, 2,  W, Cin)   top halo            rows [R0-2, R0)   (clamped)
    xb_ref : (1, 2,  W, Cin)   bottom halo         rows [R0+TH, R0+TH+2)
    w*_ref : (9*Cin_stage, Cout_stage) im2col-flattened conv weights
    s*/b*  : (1, Cout_stage) folded BN scale / bias (f32)
    o_ref  : (1, TH*W, Cout)
    scratch: xs  (TH+4, W+2, Cin)   zero-padded input tile
             mid (TH+2, W+2, Cmid)  zero-padded mid activation
             p1  ((TH+2)*W, 9*Cin)  im2col patches, stage 1
             p2  (TH*W,     9*Cmid) im2col patches, stage 2
    """
    r = pl.program_id(1)
    nR = pl.num_programs(1)
    _, TH, W, Cin = xm_ref.shape
    Cmid = w1_ref.shape[1]
    Cout = w2_ref.shape[1]
    H = nR * TH
    cdt = xm_ref.dtype

    # ---- assemble zero-padded input tile in VMEM (no wrapper jnp.pad) ----
    # xs[i, j, :] == x[R0 - 2 + i, j - 1, :], zeros outside the image.
    zcol = jnp.zeros((TH + 4, 1, Cin), cdt)
    xs_ref[:, 0:1, :] = zcol
    xs_ref[:, W + 1:W + 2, :] = zcol
    top_valid = (r > 0).astype(cdt)           # top halo is real data only if r > 0
    bot_valid = (r < nR - 1).astype(cdt)      # bottom halo only if not last tile
    xs_ref[0:2, 1:W + 1, :] = xt_ref[0] * top_valid
    xs_ref[2:TH + 2, 1:W + 1, :] = xm_ref[0]
    xs_ref[TH + 2:TH + 4, 1:W + 1, :] = xb_ref[0] * bot_valid

    def conv_bn_relu(src_ref, rows, p_ref, w_ref, s_ref, b_ref):
        """3x3 conv via im2col scratch + ONE MXU matmul (K = 9*Cin_stage)."""
        cin = src_ref.shape[-1]
        for dy in range(3):
            for dx in range(3):
                t = dy * 3 + dx
                p_ref[:, t * cin:(t + 1) * cin] = (
                    src_ref[dy:dy + rows, dx:dx + W, :].reshape(rows * W, cin))
        acc = jnp.dot(p_ref[...], w_ref[...],
                      preferred_element_type=jnp.float32)      # f32 accumulation
        y = acc * s_ref[...] + b_ref[...]                      # folded BN (eval)
        return jnp.maximum(y, 0.0)                             # ReLU, f32

    # ---- stage 1: mid activation for rows [R0-1, R0+TH+1) ----
    rows1 = TH + 2
    mid = conv_bn_relu(xs_ref, rows1, p1_ref, w1_ref, s1_ref, b1_ref)
    mid = mid.reshape(rows1, W, Cmid)
    # mid rows that fall outside the image are conv2's zero padding,
    # not conv1 outputs -> mask them to zero.
    g = r * TH - 1 + jax.lax.broadcasted_iota(jnp.int32, (rows1, W, Cmid), 0)
    mid = jnp.where((g >= 0) & (g < H), mid, 0.0).astype(cdt)

    zcol2 = jnp.zeros((rows1, 1, Cmid), cdt)
    mid_ref[:, 0:1, :] = zcol2
    mid_ref[:, W + 1:W + 2, :] = zcol2
    mid_ref[:, 1:W + 1, :] = mid

    # ---- stage 2: output rows [R0, R0+TH) ----
    y = conv_bn_relu(mid_ref, TH, p2_ref, w2_ref, s2_ref, b2_ref)   # (TH*W, Cout)
    o_ref[...] = y.reshape(1, TH * W, Cout).astype(o_ref.dtype)


# --------------------------------------------------------------------------
# tile sizing
# --------------------------------------------------------------------------
def _tile_vmem_estimate(TH, W, Cin, Cmid, Cout, isz):
    """Rough per-row-tile VMEM working set in bytes."""
    blk_in = 2 * (TH + 4) * W * Cin * isz                  # pipelined input blocks
    blk_out = 2 * TH * W * Cout * 4                        # pipelined output block
    weights = 9 * (Cin * Cmid + Cmid * Cout) * isz
    scratch = ((TH + 4) * (W + 2) * Cin + (TH + 2) * (W + 2) * Cmid) * isz
    patches = ((TH + 2) * W * 9 * Cin + TH * W * 9 * Cmid) * isz
    accums = ((TH + 2) * W * Cmid + TH * W * Cout) * 4     # f32 matmul results
    return blk_in + blk_out + weights + scratch + patches + accums


def _pick_row_tile(H, W, Cin, Cmid, Cout, isz, budget_bytes):
    """Largest legal row tile (TH | H, TH % 8 == 0 or TH == H) fitting budget."""
    cands = sorted({t for t in range(8, H + 1, 8) if H % t == 0} | {H})
    best = cands[0]
    for t in cands:
        if _tile_vmem_estimate(t, W, Cin, Cmid, Cout, isz) <= budget_bytes:
            best = t
    return best, _tile_vmem_estimate(best, W, Cin, Cmid, Cout, isz)


# --------------------------------------------------------------------------
# wrapper
# --------------------------------------------------------------------------
def double_conv(x_nchw, params, *, compute_dtype=jnp.float32, row_tile=None,
                vmem_budget_bytes=12 * 2**20, eps=1e-5):
    """DoubleConv forward (PyTorch NCHW in/out), single fused pallas_call.

    compute_dtype=jnp.bfloat16 keeps activations/weights in bf16 through DMA
    and on the MXU (f32 accumulation).  vmem_budget_bytes: per-tile target for
    the auto row-tile chooser (default sized for v7x's 64 MiB VMEM; can be
    raised ~2-4x on v6e/v5e).
    """
    p = params
    N, Cin, H, W = x_nchw.shape
    Cmid = p["w1"].shape[0]
    Cout = p["w2"].shape[0]
    assert H % 2 == 0 and H >= 2, "row-halo blocking assumes an even image height"
    # TODO(synk): odd H would need a cdiv grid + partial-tile masking.

    cdt = jnp.dtype(compute_dtype)
    out_dtype = x_nchw.dtype

    # NCHW -> NHWC (+cast) is the only wrapper-side data movement.
    x = jnp.transpose(x_nchw, (0, 2, 3, 1)).astype(cdt)

    def fold(w_oihw, cb, g, beta, m, v):
        cO, cI = w_oihw.shape[0], w_oihw.shape[1]
        # (Cout, Cin, 3, 3) -> (3, 3, Cin, Cout) -> (9*Cin, Cout); row = (dy*3+dx)*Cin+ci
        wm = jnp.transpose(w_oihw, (2, 3, 1, 0)).reshape(9 * cI, cO).astype(cdt)
        s = (g / jnp.sqrt(v + eps)).astype(jnp.float32)
        b = ((cb - m) * s + beta).astype(jnp.float32)
        return wm, s.reshape(1, cO), b.reshape(1, cO)

    w1m, s1, b1 = fold(p["w1"], p["b1"], p["g1"], p["beta1"], p["m1"], p["v1"])
    w2m, s2, b2 = fold(p["w2"], p["b2"], p["g2"], p["beta2"], p["m2"], p["v2"])

    if row_tile is None:
        TH, est = _pick_row_tile(H, W, Cin, Cmid, Cout, cdt.itemsize,
                                 vmem_budget_bytes)
    else:
        TH = int(row_tile)
        assert H % TH == 0 and TH % 2 == 0 and (TH % 8 == 0 or TH == H)
        est = _tile_vmem_estimate(TH, W, Cin, Cmid, Cout, cdt.itemsize)
    nR = H // TH
    th2 = TH // 2
    nrb = H // 2            # number of 2-row halo blocks along H

    flops = 2 * N * H * W * 9 * (Cin * Cmid + Cmid * Cout)
    bytes_accessed = (x.size * cdt.itemsize
                      + (w1m.size + w2m.size) * cdt.itemsize
                      + N * H * W * Cout * jnp.dtype(out_dtype).itemsize)
    cost = pl.CostEstimate(flops=flops, transcendentals=0,
                           bytes_accessed=bytes_accessed)
    vmem_limit = int(min(48 * 2**20, max(32 * 2**20, 4 * est)))

    out_flat = pl.pallas_call(
        _double_conv_kernel,
        out_shape=jax.ShapeDtypeStruct((N, H * W, Cout), out_dtype),
        grid=(N, nR),
        in_specs=[
            # row tile + clamped-index halo blocks (same array passed 3x)
            pl.BlockSpec((1, TH, W, Cin), lambda b, r: (b, r, 0, 0)),
            pl.BlockSpec((1, 2, W, Cin),
                         lambda b, r: (b, jnp.maximum(r * th2 - 1, 0), 0, 0)),
            pl.BlockSpec((1, 2, W, Cin),
                         lambda b, r: (b, jnp.minimum((r + 1) * th2, nrb - 1), 0, 0)),
            # stage-1 / stage-2 weights + folded BN params (resident across grid)
            pl.BlockSpec((9 * Cin, Cmid), lambda b, r: (0, 0)),
            pl.BlockSpec((1, Cmid), lambda b, r: (0, 0)),
            pl.BlockSpec((1, Cmid), lambda b, r: (0, 0)),
            pl.BlockSpec((9 * Cmid, Cout), lambda b, r: (0, 0)),
            pl.BlockSpec((1, Cout), lambda b, r: (0, 0)),
            pl.BlockSpec((1, Cout), lambda b, r: (0, 0)),
        ],
        out_specs=pl.BlockSpec((1, TH * W, Cout), lambda b, r: (b, r, 0)),
        scratch_shapes=[
            pltpu.VMEM((TH + 4, W + 2, Cin), cdt),       # padded input tile
            pltpu.VMEM((TH + 2, W + 2, Cmid), cdt),      # padded mid activation
            pltpu.VMEM(((TH + 2) * W, 9 * Cin), cdt),    # im2col patches, stage 1
            pltpu.VMEM((TH * W, 9 * Cmid), cdt),         # im2col patches, stage 2
        ],
        compiler_params=pltpu.CompilerParams(
            dimension_semantics=("parallel", "parallel"),
            vmem_limit_bytes=vmem_limit),
        cost_estimate=cost,
    )(x, x, x, w1m, s1, b1, w2m, s2, b2)

    out = out_flat.reshape(N, H, W, Cout)
    return jnp.transpose(out, (0, 3, 1, 2))    # NHWC -> NCHW


# --------------------------------------------------------------------------
# pure-JAX reference (correctness check)
# --------------------------------------------------------------------------
def ref_conv_bn_relu(x_nhwc, w_oihw, b, gamma, beta, rmean, rvar, eps=1e-5):
    y = jax.lax.conv_general_dilated(
        x_nhwc.astype(jnp.float32),
        jnp.transpose(w_oihw, (2, 3, 1, 0)).astype(jnp.float32),
        window_strides=(1, 1), padding=((1, 1), (1, 1)),
        dimension_numbers=("NHWC", "HWIO", "NHWC"))
    y = y + b
    y = (y - rmean) / jnp.sqrt(rvar + eps) * gamma + beta
    return jnp.maximum(y, 0.0)


def ref_double_conv(x_nchw, p):
    x = jnp.transpose(x_nchw, (0, 2, 3, 1))
    y = ref_conv_bn_relu(x, p["w1"], p["b1"], p["g1"], p["beta1"], p["m1"], p["v1"])
    y = ref_conv_bn_relu(y, p["w2"], p["b2"], p["g2"], p["beta2"], p["m2"], p["v2"])
    return jnp.transpose(y, (0, 3, 1, 2))


def init_params(key, in_channels, out_channels, mid_channels=None):
    if not mid_channels:
        mid_channels = out_channels
    ks = jax.random.split(key, 12)
    f32 = jnp.float32

    def conv_w(k, cout, cin):
        fan_in = cin * 9
        return jax.random.normal(k, (cout, cin, 3, 3), f32) / np.sqrt(fan_in)

    return {
        "w1": conv_w(ks[0], mid_channels, in_channels),
        "b1": 0.1 * jax.random.normal(ks[1], (mid_channels,), f32),
        "g1": 1.0 + 0.1 * jax.random.normal(ks[2], (mid_channels,), f32),
        "beta1": 0.1 * jax.random.normal(ks[3], (mid_channels,), f32),
        "m1": 0.1 * jax.random.normal(ks[4], (mid_channels,), f32),
        "v1": 0.5 + jnp.abs(jax.random.normal(ks[5], (mid_channels,), f32)),
        "w2": conv_w(ks[6], out_channels, mid_channels),
        "b2": 0.1 * jax.random.normal(ks[7], (out_channels,), f32),
        "g2": 1.0 + 0.1 * jax.random.normal(ks[8], (out_channels,), f32),
        "beta2": 0.1 * jax.random.normal(ks[9], (out_channels,), f32),
        "m2": 0.1 * jax.random.normal(ks[10], (out_channels,), f32),
        "v2": 0.5 + jnp.abs(jax.random.normal(ks[11], (out_channels,), f32)),
    }


if __name__ == "__main__":
    key = jax.random.PRNGKey(0)
    k_x, k_p = jax.random.split(key)

    N, Cin, H, W = 2, 4, 16, 16
    Cout = 8
    x = jax.random.normal(k_x, (N, Cin, H, W), jnp.float32)   # NCHW like PyTorch
    params = init_params(k_p, Cin, Cout)

    ref = jax.block_until_ready(ref_double_conv(x, params))

    # f32, explicit 2-way row tiling: exercises the halo / boundary-masking path.
    out = jax.block_until_ready(
        double_conv(x, params, compute_dtype=jnp.float32, row_tile=8))
    np.testing.assert_allclose(np.asarray(out), np.asarray(ref),
                               rtol=1e-4, atol=1e-4)
    assert out.shape == (N, Cout, H, W)

    # f32, auto-chosen tile (single row tile at this toy size).
    out_auto = jax.block_until_ready(
        double_conv(x, params, compute_dtype=jnp.float32))
    np.testing.assert_allclose(np.asarray(out_auto), np.asarray(ref),
                               rtol=1e-4, atol=1e-4)

    # bf16 activations/weights on the MXU, f32 accumulation (looser tolerance).
    out_bf16 = jax.block_until_ready(
        double_conv(x, params, compute_dtype=jnp.bfloat16, row_tile=8))
    np.testing.assert_allclose(np.asarray(out_bf16, dtype=np.float32),
                               np.asarray(ref), rtol=1e-1, atol=1e-1)

    print("KERNEL_OK")
</pallas_src>

<mosaic_0001>
module attributes {stable_mosaic.version = 11 : i64} {
  func.func @_double_conv_kernel(%arg0: i32, %arg1: i32, %arg2: memref<1x8x16x4xf32, #tpu.memory_space<vmem>>, %arg3: memref<1x2x16x4xf32, #tpu.memory_space<vmem>>, %arg4: memref<1x2x16x4xf32, #tpu.memory_space<vmem>>, %arg5: memref<36x8xf32, #tpu.memory_space<vmem>>, %arg6: memref<1x8xf32, #tpu.memory_space<vmem>>, %arg7: memref<1x8xf32, #tpu.memory_space<vmem>>, %arg8: memref<72x8xf32, #tpu.memory_space<vmem>>, %arg9: memref<1x8xf32, #tpu.memory_space<vmem>>, %arg10: memref<1x8xf32, #tpu.memory_space<vmem>>, %arg11: memref<1x128x8xf32, #tpu.memory_space<vmem>>, %arg12: memref<12x18x4xf32, #tpu.memory_space<vmem>>, %arg13: memref<10x18x8xf32, #tpu.memory_space<vmem>>, %arg14: memref<160x36xf32, #tpu.memory_space<vmem>>, %arg15: memref<128x72xf32, #tpu.memory_space<vmem>>) attributes {dimension_semantics = [#tpu.dimension_semantics<parallel>, #tpu.dimension_semantics<parallel>], iteration_bounds = array<i64: 2, 2>, scalar_prefetch = 0 : i64, scratch_operands = 4 : i64, tpu.core_type = #tpu.core_type<tc>, window_params = [{transform_indices = @transform_0, window_bounds = array<i64: 1, 8, 16, 4>}, {transform_indices = @transform_1, window_bounds = array<i64: 1, 2, 16, 4>}, {transform_indices = @transform_2, window_bounds = array<i64: 1, 2, 16, 4>}, {pipeline_mode = #tpu.pipeline_mode<synchronous>, transform_indices = @transform_3, window_bounds = array<i64: 36, 8>}, {pipeline_mode = #tpu.pipeline_mode<synchronous>, transform_indices = @transform_4, window_bounds = array<i64: 1, 8>}, {pipeline_mode = #tpu.pipeline_mode<synchronous>, transform_indices = @transform_5, window_bounds = array<i64: 1, 8>}, {pipeline_mode = #tpu.pipeline_mode<synchronous>, transform_indices = @transform_6, window_bounds = array<i64: 72, 8>}, {pipeline_mode = #tpu.pipeline_mode<synchronous>, transform_indices = @transform_7, window_bounds = array<i64: 1, 8>}, {pipeline_mode = #tpu.pipeline_mode<synchronous>, transform_indices = @transform_8, window_bounds = array<i64: 1, 8>}, {transform_indices = @transform_9, window_bounds = array<i64: 1, 128, 8>}]} {
    %cst = arith.constant 0.000000e+00 : f32
    %0 = vector.broadcast %cst : f32 to vector<12x1x4xf32>
    %c0 = arith.constant 0 : index
    %c0_0 = arith.constant 0 : index
    %c0_1 = arith.constant 0 : index
    %1 = vector.load %arg12[%c0, %c0_0, %c0_1] : memref<12x18x4xf32, #tpu.memory_space<vmem>>, vector<12x1x4xf32>
    tpu.vector_store %arg12[%c0, %c0_0, %c0_1], %0 {strides = array<i32>} : memref<12x18x4xf32, #tpu.memory_space<vmem>>, vector<12x1x4xf32>,
    %c0_2 = arith.constant 0 : index
    %c17 = arith.constant 17 : index
    %c0_3 = arith.constant 0 : index
    %2 = vector.load %arg12[%c0_2, %c17, %c0_3] : memref<12x18x4xf32, #tpu.memory_space<vmem>>, vector<12x1x4xf32>
    tpu.vector_store %arg12[%c0_2, %c17, %c0_3], %0 {strides = array<i32>} : memref<12x18x4xf32, #tpu.memory_space<vmem>>, vector<12x1x4xf32>,
    %c0_i32 = arith.constant 0 : i32
    %3 = arith.cmpi sgt, %arg1, %c0_i32 : i32
    %4 = arith.extui %3 : i1 to i32
    %5 = arith.sitofp %4 : i32 to f32
    %c1_i32 = arith.constant 1 : i32
    %6 = arith.cmpi slt, %arg1, %c1_i32 : i32
    %7 = arith.extui %6 : i1 to i32
    %8 = arith.sitofp %7 : i32 to f32
    %c0_4 = arith.constant 0 : index
    %c0_5 = arith.constant 0 : index
    %c0_6 = arith.constant 0 : index
    %c0_7 = arith.constant 0 : index
    %9 = vector.load %arg3[%c0_4, %c0_5, %c0_6, %c0_7] : memref<1x2x16x4xf32, #tpu.memory_space<vmem>>, vector<1x2x16x4xf32>
    %10 = vector.shape_cast %9 : vector<1x2x16x4xf32> to vector<2x16x4xf32>
    %11 = vector.broadcast %5 : f32 to vector<2x16x4xf32>
    %12 = arith.mulf %10, %11 : vector<2x16x4xf32>
    %c0_8 = arith.constant 0 : index
    %c1 = arith.constant 1 : index
    %c0_9 = arith.constant 0 : index
    %13 = vector.load %arg12[%c0_8, %c1, %c0_9] : memref<12x18x4xf32, #tpu.memory_space<vmem>>, vector<2x16x4xf32>
    tpu.vector_store %arg12[%c0_8, %c1, %c0_9], %12 {strides = array<i32>} : memref<12x18x4xf32, #tpu.memory_space<vmem>>, vector<2x16x4xf32>,
    %c0_10 = arith.constant 0 : index
    %c0_11 = arith.constant 0 : index
    %c0_12 = arith.constant 0 : index
    %c0_13 = arith.constant 0 : index
    %14 = vector.load %arg2[%c0_10, %c0_11, %c0_12, %c0_13] : memref<1x8x16x4xf32, #tpu.memory_space<vmem>>, vector<1x8x16x4xf32>
    %15 = vector.shape_cast %14 : vector<1x8x16x4xf32> to vector<8x16x4xf32>
    %c2 = arith.constant 2 : index
    %c1_14 = arith.constant 1 : index
    %c0_15 = arith.constant 0 : index
    %16 = vector.load %arg12[%c2, %c1_14, %c0_15] : memref<12x18x4xf32, #tpu.memory_space<vmem>>, vector<8x16x4xf32>
    tpu.vector_store %arg12[%c2, %c1_14, %c0_15], %15 {strides = array<i32>} : memref<12x18x4xf32, #tpu.memory_space<vmem>>, vector<8x16x4xf32>,
    %c0_16 = arith.constant 0 : index
    %c0_17 = arith.constant 0 : index
    %c0_18 = arith.constant 0 : index
    %c0_19 = arith.constant 0 : index
    %17 = vector.load %arg4[%c0_16, %c0_17, %c0_18, %c0_19] : memref<1x2x16x4xf32, #tpu.memory_space<vmem>>, vector<1x2x16x4xf32>
    %18 = vector.shape_cast %17 : vector<1x2x16x4xf32> to vector<2x16x4xf32>
    %19 = vector.broadcast %8 : f32 to vector<2x16x4xf32>
    %20 = arith.mulf %18, %19 : vector<2x16x4xf32>
    %c10 = arith.constant 10 : index
    %c1_20 = arith.constant 1 : index
    %c0_21 = arith.constant 0 : index
    %21 = vector.load %arg12[%c10, %c1_20, %c0_21] : memref<12x18x4xf32, #tpu.memory_space<vmem>>, vector<2x16x4xf32>
    tpu.vector_store %arg12[%c10, %c1_20, %c0_21], %20 {strides = array<i32>} : memref<12x18x4xf32, #tpu.memory_space<vmem>>, vector<2x16x4xf32>,
    %c0_22 = arith.constant 0 : index
    %c0_23 = arith.constant 0 : index
    %c0_24 = arith.constant 0 : index
    %22 = vector.load %arg12[%c0_22, %c0_23, %c0_24] : memref<12x18x4xf32, #tpu.memory_space<vmem>>, vector<10x16x4xf32>
    %23 = vector.shape_cast %22 : vector<10x16x4xf32> to vector<160x4xf32>
    %c0_25 = arith.constant 0 : index
    %c0_26 = arith.constant 0 : index
    %24 = vector.load %arg14[%c0_25, %c0_26] : memref<160x36xf32, #tpu.memory_space<vmem>>, vector<160x4xf32>
    tpu.vector_store %arg14[%c0_25, %c0_26], %23 {strides = array<i32>} : memref<160x36xf32, #tpu.memory_space<vmem>>, vector<160x4xf32>,
    %c0_27 = arith.constant 0 : index
    %c1_28 = arith.constant 1 : index
    %c0_29 = arith.constant 0 : index
    %25 = vector.load %arg12[%c0_27, %c1_28, %c0_29] : memref<12x18x4xf32, #tpu.memory_space<vmem>>, vector<10x16x4xf32>
    %26 = vector.shape_cast %25 : vector<10x16x4xf32> to vector<160x4xf32>
    %c0_30 = arith.constant 0 : index
    %c4 = arith.constant 4 : index
    %27 = vector.load %arg14[%c0_30, %c4] : memref<160x36xf32, #tpu.memory_space<vmem>>, vector<160x4xf32>
    tpu.vector_store %arg14[%c0_30, %c4], %26 {strides = array<i32>} : memref<160x36xf32, #tpu.memory_space<vmem>>, vector<160x4xf32>,
    %c0_31 = arith.constant 0 : index
    %c2_32 = arith.constant 2 : index
    %c0_33 = arith.constant 0 : index
    %28 = vector.load %arg12[%c0_31, %c2_32, %c0_33] : memref<12x18x4xf32, #tpu.memory_space<vmem>>, vector<10x16x4xf32>
    %29 = vector.shape_cast %28 : vector<10x16x4xf32> to vector<160x4xf32>
    %c0_34 = arith.constant 0 : index
    %c8 = arith.constant 8 : index
    %30 = vector.load %arg14[%c0_34, %c8] : memref<160x36xf32, #tpu.memory_space<vmem>>, vector<160x4xf32>
    tpu.vector_store %arg14[%c0_34, %c8], %29 {strides = array<i32>} : memref<160x36xf32, #tpu.memory_space<vmem>>, vector<160x4xf32>,
    %c1_35 = arith.constant 1 : index
    %c0_36 = arith.constant 0 : index
    %c0_37 = arith.constant 0 : index
    %31 = vector.load %arg12[%c1_35, %c0_36, %c0_37] : memref<12x18x4xf32, #tpu.memory_space<vmem>>, vector<10x16x4xf32>
    %32 = vector.shape_cast %31 : vector<10x16x4xf32> to vector<160x4xf32>
    %c0_38 = arith.constant 0 : index
    %c12 = arith.constant 12 : index
    %33 = vector.load %arg14[%c0_38, %c12] : memref<160x36xf32, #tpu.memory_space<vmem>>, vector<160x4xf32>
    tpu.vector_store %arg14[%c0_38, %c12], %32 {strides = array<i32>} : memref<160x36xf32, #tpu.memory_space<vmem>>, vector<160x4xf32>,
    %c1_39 = arith.constant 1 : index
    %c1_40 = arith.constant 1 : index
    %c0_41 = arith.constant 0 : index
    %34 = vector.load %arg12[%c1_39, %c1_40, %c0_41] : memref<12x18x4xf32, #tpu.memory_space<vmem>>, vector<10x16x4xf32>
    %35 = vector.shape_cast %34 : vector<10x16x4xf32> to vector<160x4xf32>
    %c0_42 = arith.constant 0 : index
    %c16 = arith.constant 16 : index
    %36 = vector.load %arg14[%c0_42, %c16] : memref<160x36xf32, #tpu.memory_space<vmem>>, vector<160x4xf32>
    tpu.vector_store %arg14[%c0_42, %c16], %35 {strides = array<i32>} : memref<160x36xf32, #tpu.memory_space<vmem>>, vector<160x4xf32>,
    %c1_43 = arith.constant 1 : index
    %c2_44 = arith.constant 2 : index
    %c0_45 = arith.constant 0 : index
    %37 = vector.load %arg12[%c1_43, %c2_44, %c0_45] : memref<12x18x4xf32, #tpu.memory_space<vmem>>, vector<10x16x4xf32>
    %38 = vector.shape_cast %37 : vector<10x16x4xf32> to vector<160x4xf32>
    %c0_46 = arith.constant 0 : index
    %c20 = arith.constant 20 : index
    %39 = vector.load %arg14[%c0_46, %c20] : memref<160x36xf32, #tpu.memory_space<vmem>>, vector<160x4xf32>
    tpu.vector_store %arg14[%c0_46, %c20], %38 {strides = array<i32>} : memref<160x36xf32, #tpu.memory_space<vmem>>, vector<160x4xf32>,
    %c2_47 = arith.constant 2 : index
    %c0_48 = arith.constant 0 : index
    %c0_49 = arith.constant 0 : index
    %40 = vector.load %arg12[%c2_47, %c0_48, %c0_49] : memref<12x18x4xf32, #tpu.memory_space<vmem>>, vector<10x16x4xf32>
    %41 = vector.shape_cast %40 : vector<10x16x4xf32> to vector<160x4xf32>
    %c0_50 = arith.constant 0 : index
    %c24 = arith.constant 24 : index
    %42 = vector.load %arg14[%c0_50, %c24] : memref<160x36xf32, #tpu.memory_space<vmem>>, vector<160x4xf32>
    tpu.vector_store %arg14[%c0_50, %c24], %41 {strides = array<i32>} : memref<160x36xf32, #tpu.memory_space<vmem>>, vector<160x4xf32>,
    %c2_51 = arith.constant 2 : index
    %c1_52 = arith.constant 1 : index
    %c0_53 = arith.constant 0 : index
    %43 = vector.load %arg12[%c2_51, %c1_52, %c0_53] : memref<12x18x4xf32, #tpu.memory_space<vmem>>, vector<10x16x4xf32>
    %44 = vector.shape_cast %43 : vector<10x16x4xf32> to vector<160x4xf32>
    %c0_54 = arith.constant 0 : index
    %c28 = arith.constant 28 : index
    %45 = vector.load %arg14[%c0_54, %c28] : memref<160x36xf32, #tpu.memory_space<vmem>>, vector<160x4xf32>
    tpu.vector_store %arg14[%c0_54, %c28], %44 {strides = array<i32>} : memref<160x36xf32, #tpu.memory_space<vmem>>, vector<160x4xf32>,
    %c2_55 = arith.constant 2 : index
    %c2_56 = arith.constant 2 : index
    %c0_57 = arith.constant 0 : index
    %46 = vector.load %arg12[%c2_55, %c2_56, %c0_57] : memref<12x18x4xf32, #tpu.memory_space<vmem>>, vector<10x16x4xf32>
    %47 = vector.shape_cast %46 : vector<10x16x4xf32> to vector<160x4xf32>
    %c0_58 = arith.constant 0 : index
    %c32 = arith.constant 32 : index
    %48 = vector.load %arg14[%c0_58, %c32] : memref<160x36xf32, #tpu.memory_space<vmem>>, vector<160x4xf32>
    tpu.vector_store %arg14[%c0_58, %c32], %47 {strides = array<i32>} : memref<160x36xf32, #tpu.memory_space<vmem>>, vector<160x4xf32>,
    %c0_59 = arith.constant 0 : index
    %c0_60 = arith.constant 0 : index
    %49 = vector.load %arg14[%c0_59, %c0_60] : memref<160x36xf32, #tpu.memory_space<vmem>>, vector<160x36xf32>
    %c0_61 = arith.constant 0 : index
    %c0_62 = arith.constant 0 : index
    %50 = vector.load %arg5[%c0_61, %c0_62] : memref<36x8xf32, #tpu.memory_space<vmem>>, vector<36x8xf32>
    %cst_63 = arith.constant dense<0.000000e+00> : vector<160x8xf32>
    %51 = tpu.matmul %49, %50, %cst_63 {dimension_numbers = #tpu.dot_dimension_numbers<[1], [0], [0], [1], [0, 0, 1, 1], [], []>} : vector<160x36xf32>, vector<36x8xf32>, vector<160x8xf32> -> vector<160x8xf32>
    %c0_64 = arith.constant 0 : index
    %c0_65 = arith.constant 0 : index
    %52 = vector.load %arg6[%c0_64, %c0_65] : memref<1x8xf32, #tpu.memory_space<vmem>>, vector<1x8xf32>
    %53 = vector.broadcast %52 : vector<1x8xf32> to vector<160x8xf32>
    %54 = arith.mulf %51, %53 : vector<160x8xf32>
    %c0_66 = arith.constant 0 : index
    %c0_67 = arith.constant 0 : index
    %55 = vector.load %arg7[%c0_66, %c0_67] : memref<1x8xf32, #tpu.memory_space<vmem>>, vector<1x8xf32>
    %56 = vector.broadcast %55 : vector<1x8xf32> to vector<160x8xf32>
    %57 = arith.addf %54, %56 : vector<160x8xf32>
    %cst_68 = arith.constant 0.000000e+00 : f32
    %58 = vector.broadcast %cst_68 : f32 to vector<160x8xf32>
    %59 = arith.maximumf %57, %58 : vector<160x8xf32>
    %60 = vector.shape_cast %59 : vector<160x8xf32> to vector<10x16x8xf32>
    %c8_i32 = arith.constant 8 : i32
    %61 = arith.muli %arg1, %c8_i32 : i32
    %c1_i32_69 = arith.constant 1 : i32
    %62 = arith.subi %61, %c1_i32_69 : i32
    %63 = tpu.iota {dimensions = array<i32: 0>} : vector<10x16x8xi32>
    %64 = vector.broadcast %62 : i32 to vector<10x16x8xi32>
    %65 = arith.addi %64, %63 : vector<10x16x8xi32>
    %c0_i32_70 = arith.constant 0 : i32
    %66 = vector.broadcast %c0_i32_70 : i32 to vector<10x16x8xi32>
    %67 = arith.cmpi sge, %65, %66 : vector<10x16x8xi32>
    %c16_i32 = arith.constant 16 : i32
    %68 = vector.broadcast %c16_i32 : i32 to vector<10x16x8xi32>
    %69 = arith.cmpi slt, %65, %68 : vector<10x16x8xi32>
    %70 = arith.andi %67, %69 : vector<10x16x8xi1>
    %cst_71 = arith.constant 0.000000e+00 : f32
    %71 = vector.broadcast %cst_71 : f32 to vector<10x16x8xf32>
    %72 = arith.select %70, %60, %71 : vector<10x16x8xi1>, vector<10x16x8xf32>
    %cst_72 = arith.constant 0.000000e+00 : f32
    %73 = vector.broadcast %cst_72 : f32 to vector<10x1x8xf32>
    %c0_73 = arith.constant 0 : index
    %c0_74 = arith.constant 0 : index
    %c0_75 = arith.constant 0 : index
    %74 = vector.load %arg13[%c0_73, %c0_74, %c0_75] : memref<10x18x8xf32, #tpu.memory_space<vmem>>, vector<10x1x8xf32>
    tpu.vector_store %arg13[%c0_73, %c0_74, %c0_75], %73 {strides = array<i32>} : memref<10x18x8xf32, #tpu.memory_space<vmem>>, vector<10x1x8xf32>,
    %c0_76 = arith.constant 0 : index
    %c17_77 = arith.constant 17 : index
    %c0_78 = arith.constant 0 : index
    %75 = vector.load %arg13[%c0_76, %c17_77, %c0_78] : memref<10x18x8xf32, #tpu.memory_space<vmem>>, vector<10x1x8xf32>
    tpu.vector_store %arg13[%c0_76, %c17_77, %c0_78], %73 {strides = array<i32>} : memref<10x18x8xf32, #tpu.memory_space<vmem>>, vector<10x1x8xf32>,
    %c0_79 = arith.constant 0 : index
    %c1_80 = arith.constant 1 : index
    %c0_81 = arith.constant 0 : index
    %76 = vector.load %arg13[%c0_79, %c1_80, %c0_81] : memref<10x18x8xf32, #tpu.memory_space<vmem>>, vector<10x16x8xf32>
    tpu.vector_store %arg13[%c0_79, %c1_80, %c0_81], %72 {strides = array<i32>} : memref<10x18x8xf32, #tpu.memory_space<vmem>>, vector<10x16x8xf32>,
    %c0_82 = arith.constant 0 : index
    %c0_83 = arith.constant 0 : index
    %c0_84 = arith.constant 0 : index
    %77 = vector.load %arg13[%c0_82, %c0_83, %c0_84] : memref<10x18x8xf32, #tpu.memory_space<vmem>>, vector<8x16x8xf32>
    %78 = vector.shape_cast %77 : vector<8x16x8xf32> to vector<128x8xf32>
    %c0_85 = arith.constant 0 : index
    %c0_86 = arith.constant 0 : index
    %79 = vector.load %arg15[%c0_85, %c0_86] : memref<128x72xf32, #tpu.memory_space<vmem>>, vector<128x8xf32>
    tpu.vector_store %arg15[%c0_85, %c0_86], %78 {strides = array<i32>} : memref<128x72xf32, #tpu.memory_space<vmem>>, vector<128x8xf32>,
    %c0_87 = arith.constant 0 : index
    %c1_88 = arith.constant 1 : index
    %c0_89 = arith.constant 0 : index
    %80 = vector.load %arg13[%c0_87, %c1_88, %c0_89] : memref<10x18x8xf32, #tpu.memory_space<vmem>>, vector<8x16x8xf32>
    %81 = vector.shape_cast %80 : vector<8x16x8xf32> to vector<128x8xf32>
    %c0_90 = arith.constant 0 : index
    %c8_91 = arith.constant 8 : index
    %82 = vector.load %arg15[%c0_90, %c8_91] : memref<128x72xf32, #tpu.memory_space<vmem>>, vector<128x8xf32>
    tpu.vector_store %arg15[%c0_90, %c8_91], %81 {strides = array<i32>} : memref<128x72xf32, #tpu.memory_space<vmem>>, vector<128x8xf32>,
    %c0_92 = arith.constant 0 : index
    %c2_93 = arith.constant 2 : index
    %c0_94 = arith.constant 0 : index
    %83 = vector.load %arg13[%c0_92, %c2_93, %c0_94] : memref<10x18x8xf32, #tpu.memory_space<vmem>>, vector<8x16x8xf32>
    %84 = vector.shape_cast %83 : vector<8x16x8xf32> to vector<128x8xf32>
    %c0_95 = arith.constant 0 : index
    %c16_96 = arith.constant 16 : index
    %85 = vector.load %arg15[%c0_95, %c16_96] : memref<128x72xf32, #tpu.memory_space<vmem>>, vector<128x8xf32>
    tpu.vector_store %arg15[%c0_95, %c16_96], %84 {strides = array<i32>} : memref<128x72xf32, #tpu.memory_space<vmem>>, vector<128x8xf32>,
    %c1_97 = arith.constant 1 : index
    %c0_98 = arith.constant 0 : index
    %c0_99 = arith.constant 0 : index
    %86 = vector.load %arg13[%c1_97, %c0_98, %c0_99] : memref<10x18x8xf32, #tpu.memory_space<vmem>>, vector<8x16x8xf32>
    %87 = vector.shape_cast %86 : vector<8x16x8xf32> to vector<128x8xf32>
    %c0_100 = arith.constant 0 : index
    %c24_101 = arith.constant 24 : index
    %88 = vector.load %arg15[%c0_100, %c24_101] : memref<128x72xf32, #tpu.memory_space<vmem>>, vector<128x8xf32>
    tpu.vector_store %arg15[%c0_100, %c24_101], %87 {strides = array<i32>} : memref<128x72xf32, #tpu.memory_space<vmem>>, vector<128x8xf32>,
    %c1_102 = arith.constant 1 : index
    %c1_103 = arith.constant 1 : index
    %c0_104 = arith.constant 0 : index
    %89 = vector.load %arg13[%c1_102, %c1_103, %c0_104] : memref<10x18x8xf32, #tpu.memory_space<vmem>>, vector<8x16x8xf32>
    %90 = vector.shape_cast %89 : vector<8x16x8xf32> to vector<128x8xf32>
    %c0_105 = arith.constant 0 : index
    %c32_106 = arith.constant 32 : index
    %91 = vector.load %arg15[%c0_105, %c32_106] : memref<128x72xf32, #tpu.memory_space<vmem>>, vector<128x8xf32>
    tpu.vector_store %arg15[%c0_105, %c32_106], %90 {strides = array<i32>} : memref<128x72xf32, #tpu.memory_space<vmem>>, vector<128x8xf32>,
    %c1_107 = arith.constant 1 : index
    %c2_108 = arith.constant 2 : index
    %c0_109 = arith.constant 0 : index
    %92 = vector.load %arg13[%c1_107, %c2_108, %c0_109] : memref<10x18x8xf32, #tpu.memory_space<vmem>>, vector<8x16x8xf32>
    %93 = vector.shape_cast %92 : vector<8x16x8xf32> to vector<128x8xf32>
    %c0_110 = arith.constant 0 : index
    %c40 = arith.constant 40 : index
    %94 = vector.load %arg15[%c0_110, %c40] : memref<128x72xf32, #tpu.memory_space<vmem>>, vector<128x8xf32>
    tpu.vector_store %arg15[%c0_110, %c40], %93 {strides = array<i32>} : memref<128x72xf32, #tpu.memory_space<vmem>>, vector<128x8xf32>,
    %c2_111 = arith.constant 2 : index
    %c0_112 = arith.constant 0 : index
    %c0_113 = arith.constant 0 : index
    %95 = vector.load %arg13[%c2_111, %c0_112, %c0_113] : memref<10x18x8xf32, #tpu.memory_space<vmem>>, vector<8x16x8xf32>
    %96 = vector.shape_cast %95 : vector<8x16x8xf32> to vector<128x8xf32>
    %c0_114 = arith.constant 0 : index
    %c48 = arith.constant 48 : index
    %97 = vector.load %arg15[%c0_114, %c48] : memref<128x72xf32, #tpu.memory_space<vmem>>, vector<128x8xf32>
    tpu.vector_store %arg15[%c0_114, %c48], %96 {strides = array<i32>} : memref<128x72xf32, #tpu.memory_space<vmem>>, vector<128x8xf32>,
    %c2_115 = arith.constant 2 : index
    %c1_116 = arith.constant 1 : index
    %c0_117 = arith.constant 0 : index
    %98 = vector.load %arg13[%c2_115, %c1_116, %c0_117] : memref<10x18x8xf32, #tpu.memory_space<vmem>>, vector<8x16x8xf32>
    %99 = vector.shape_cast %98 : vector<8x16x8xf32> to vector<128x8xf32>
    %c0_118 = arith.constant 0 : index
    %c56 = arith.constant 56 : index
    %100 = vector.load %arg15[%c0_118, %c56] : memref<128x72xf32, #tpu.memory_space<vmem>>, vector<128x8xf32>
    tpu.vector_store %arg15[%c0_118, %c56], %99 {strides = array<i32>} : memref<128x72xf32, #tpu.memory_space<vmem>>, vector<128x8xf32>,
    %c2_119 = arith.constant 2 : index
    %c2_120 = arith.constant 2 : index
    %c0_121 = arith.constant 0 : index
    %101 = vector.load %arg13[%c2_119, %c2_120, %c0_121] : memref<10x18x8xf32, #tpu.memory_space<vmem>>, vector<8x16x8xf32>
    %102 = vector.shape_cast %101 : vector<8x16x8xf32> to vector<128x8xf32>
    %c0_122 = arith.constant 0 : index
    %c64 = arith.constant 64 : index
    %103 = vector.load %arg15[%c0_122, %c64] : memref<128x72xf32, #tpu.memory_space<vmem>>, vector<128x8xf32>
    tpu.vector_store %arg15[%c0_122, %c64], %102 {strides = array<i32>} : memref<128x72xf32, #tpu.memory_space<vmem>>, vector<128x8xf32>,
    %c0_123 = arith.constant 0 : index
    %c0_124 = arith.constant 0 : index
    %104 = vector.load %arg15[%c0_123, %c0_124] : memref<128x72xf32, #tpu.memory_space<vmem>>, vector<128x72xf32>
    %c0_125 = arith.constant 0 : index
    %c0_126 = arith.constant 0 : index
    %105 = vector.load %arg8[%c0_125, %c0_126] : memref<72x8xf32, #tpu.memory_space<vmem>>, vector<72x8xf32>
    %cst_127 = arith.constant dense<0.000000e+00> : vector<128x8xf32>
    %106 = tpu.matmul %104, %105, %cst_127 {dimension_numbers = #tpu.dot_dimension_numbers<[1], [0], [0], [1], [0, 0, 1, 1], [], []>} : vector<128x72xf32>, vector<72x8xf32>, vector<128x8xf32> -> vector<128x8xf32>
    %c0_128 = arith.constant 0 : index
    %c0_129 = arith.constant 0 : index
    %107 = vector.load %arg9[%c0_128, %c0_129] : memref<1x8xf32, #tpu.memory_space<vmem>>, vector<1x8xf32>
    %108 = vector.broadcast %107 : vector<1x8xf32> to vector<128x8xf32>
    %109 = arith.mulf %106, %108 : vector<128x8xf32>
    %c0_130 = arith.constant 0 : index
    %c0_131 = arith.constant 0 : index
    %110 = vector.load %arg10[%c0_130, %c0_131] : memref<1x8xf32, #tpu.memory_space<vmem>>, vector<1x8xf32>
    %111 = vector.broadcast %110 : vector<1x8xf32> to vector<128x8xf32>
    %112 = arith.addf %109, %111 : vector<128x8xf32>
    %cst_132 = arith.constant 0.000000e+00 : f32
    %113 = vector.broadcast %cst_132 : f32 to vector<128x8xf32>
    %114 = arith.maximumf %112, %113 : vector<128x8xf32>
    %115 = vector.shape_cast %114 : vector<128x8xf32> to vector<1x128x8xf32>
    %c0_133 = arith.constant 0 : index
    %c0_134 = arith.constant 0 : index
    %c0_135 = arith.constant 0 : index
    %116 = vector.load %arg11[%c0_133, %c0_134, %c0_135] : memref<1x128x8xf32, #tpu.memory_space<vmem>>, vector<1x128x8xf32>
    tpu.vector_store %arg11[%c0_133, %c0_134, %c0_135], %115 {strides = array<i32>} : memref<1x128x8xf32, #tpu.memory_space<vmem>>, vector<1x128x8xf32>,
    return
  }
  func.func @transform_0(%arg0: i32, %arg1: i32) -> (i32, i32, i32, i32) {
    %c0_i32 = arith.constant 0 : i32
    %c0_i32_0 = arith.constant 0 : i32
    %c0_i32_1 = arith.constant 0 : i32
    return %arg0, %arg1, %c0_i32, %c0_i32_0 : i32, i32, i32, i32
  }
  func.func @transform_1(%arg0: i32, %arg1: i32) -> (i32, i32, i32, i32) {
    %c4_i32 = arith.constant 4 : i32
    %0 = arith.muli %arg1, %c4_i32 : i32
    %c1_i32 = arith.constant 1 : i32
    %1 = arith.subi %0, %c1_i32 : i32
    %c0_i32 = arith.constant 0 : i32
    %2 = arith.maxsi %1, %c0_i32 : i32
    %c0_i32_0 = arith.constant 0 : i32
    %c0_i32_1 = arith.constant 0 : i32
    %c0_i32_2 = arith.constant 0 : i32
    return %arg0, %2, %c0_i32_0, %c0_i32_1 : i32, i32, i32, i32
  }
  func.func @transform_2(%arg0: i32, %arg1: i32) -> (i32, i32, i32, i32) {
    %c1_i32 = arith.constant 1 : i32
    %0 = arith.addi %arg1, %c1_i32 : i32
    %c4_i32 = arith.constant 4 : i32
    %1 = arith.muli %0, %c4_i32 : i32
    %c7_i32 = arith.constant 7 : i32
    %2 = arith.minsi %1, %c7_i32 : i32
    %c0_i32 = arith.constant 0 : i32
    %c0_i32_0 = arith.constant 0 : i32
    %c0_i32_1 = arith.constant 0 : i32
    return %arg0, %2, %c0_i32, %c0_i32_0 : i32, i32, i32, i32
  }
  func.func @transform_3(%arg0: i32, %arg1: i32) -> (i32, i32) {
    %c0_i32 = arith.constant 0 : i32
    %c0_i32_0 = arith.constant 0 : i32
    %c0_i32_1 = arith.constant 0 : i32
    return %c0_i32, %c0_i32_0 : i32, i32
  }
  func.func @transform_4(%arg0: i32, %arg1: i32) -> (i32, i32) {
    %c0_i32 = arith.constant 0 : i32
    %c0_i32_0 = arith.constant 0 : i32
    %c0_i32_1 = arith.constant 0 : i32
    return %c0_i32, %c0_i32_0 : i32, i32
  }
  func.func @transform_5(%arg0: i32, %arg1: i32) -> (i32, i32) {
    %c0_i32 = arith.constant 0 : i32
    %c0_i32_0 = arith.constant 0 : i32
    %c0_i32_1 = arith.constant 0 : i32
    return %c0_i32, %c0_i32_0 : i32, i32
  }
  func.func @transform_6(%arg0: i32, %arg1: i32) -> (i32, i32) {
    %c0_i32 = arith.constant 0 : i32
    %c0_i32_0 = arith.constant 0 : i32
    %c0_i32_1 = arith.constant 0 : i32
    return %c0_i32, %c0_i32_0 : i32, i32
  }
  func.func @transform_7(%arg0: i32, %arg1: i32) -> (i32, i32) {
    %c0_i32 = arith.constant 0 : i32
    %c0_i32_0 = arith.constant 0 : i32
    %c0_i32_1 = arith.constant 0 : i32
    return %c0_i32, %c0_i32_0 : i32, i32
  }
  func.func @transform_8(%arg0: i32, %arg1: i32) -> (i32, i32) {
    %c0_i32 = arith.constant 0 : i32
    %c0_i32_0 = arith.constant 0 : i32
    %c0_i32_1 = arith.constant 0 : i32
    return %c0_i32, %c0_i32_0 : i32, i32
  }
  func.func @transform_9(%arg0: i32, %arg1: i32) -> (i32, i32, i32) {
    %c0_i32 = arith.constant 0 : i32
    %c0_i32_0 = arith.constant 0 : i32
    return %arg0, %arg1, %c0_i32 : i32, i32, i32
  }
}

</mosaic_0001>

<bundles_post_ra>
// kernel: tpu_custom_call.1
= control target key start
LH: loop header
LB: loop body
LE: loop exit
PB: predicated region body
PF: predicated region fallthrough
CT: control target
= control target key end

     0   :  { %s3355_s30 = smov 0   ;;  %s3357_s10 = smov 0   ;;  %s4992_s0 = inlined_call_operand.vmem [shape: f32[2,16,16,4], index: 0, kind: input, shape index: {}]   ;;  %s4993_s1 = inlined_call_operand.vmem [shape: f32[2,16,16,4], index: 1, kind: input, shape index: {}]   ;;  %s4994_s2 = inlined_call_operand.vmem [shape: f32[2,16,16,4], index: 2, kind: input, shape index: {}]   ;;  %s4995_s3 = inlined_call_operand.vmem [shape: f32[36,8], index: 3, kind: input, shape index: {}]   ;;  %s4996_s4 = inlined_call_operand.vmem [shape: f32[1,8], index: 4, kind: input, shape index: {}]   ;;  %s4997_s5 = inlined_call_operand.vmem [shape: f32[1,8], index: 5, kind: input, shape index: {}]   ;;  %s4998_s6 = inlined_call_operand.vmem [shape: f32[72,8], index: 6, kind: input, shape index: {}]   ;;  %s4999_s7 = inlined_call_operand.vmem [shape: f32[1,8], index: 7, kind: input, shape index: {}]   ;;  %s5000_s8 = inlined_call_operand.vmem [shape: f32[1,8], index: 8, kind: input, shape index: {}]   ;;  %s5001_s9 = inlined_call_operand.vmem [shape: f32[2,256,8], index: 9, kind: output, shape index: {}]  }
   0x1   :  { %s3359_s11 = smov 0   ;;  %s3361_s12 = smov 0  }
   0x2   :  { %s3363_s13 = smov 0  }
   0x3 LB: > { %s28_s14 = sadd.s32 1, %s3282_s11  ;;  %s31_s15 = sadd.s32 1, %s3286_s12  ;;  %s3290_s13 = sphi %s3363_s13, %s19_s13   ;;  %s3286_s12 = sphi %s3361_s12, %s5025_s12   ;;  %s3282_s11 = sphi %s3359_s11, %s5024_s11   ;;  %s3278_s10 = sphi %s3357_s10, %s5023_s10   ;;  %s3274_s30 = sphi %s3355_s30, %s5022_s30  }
   0x4   : > { %p29_p0 = scmp.ge.s32.totalorder %s28_s14, 2  ;;  %p3115_p1 = scmp.ge.s32.totalorder %s3290_s13, 1 }
   0x5   : > { %p377_p2 = scmp.lt.s32.totalorder %s3290_s13, 5 }
   0x6   : > { %s5027_s14 = smov (%p29_p0, %s28_s14), 0  ;;  %s5029_s15 = smov (!%p29_p0, %s31_s15), %s3286_s12 }
   0x7   : > { %p378_p3 = pnand %p3115_p1, %p377_p2  ;;  %p33_p4 = scmp.ge.s32.totalorder %s5029_s15, 2 }
   0x8   : > { %s3388_s16 = sshll.u32 (!%p378_p3), %s3274_s30, 3  ;;  %p451_p5 = scmp.lt.s32.totalorder (!%p378_p3), %s3278_s10, 1 }
   0x9   : > { %s5031_s15 = smov (%p33_p4, %s5029_s15), 0  ;;  %381 = sbr.rel (%p378_p3) target bundleno = 1274 (0x4fa), region = 56 }
   0xa   : > { %p453_p6 = scmp.lt.s32.totalorder (!%p378_p3), %s3388_s16, 15  ;;  %s3120_s19 = sshll.u32 (!%p378_p3), %s3274_s30, 2 }
   0xb   : > { %s3121_s21 = sadd.s32 (!%p378_p3), 4294967295, %s3120_s19  ;;  %p534_p8 = scmp.gt.s32.totalorder (!%p378_p3), %s3274_s30, 0 }
   0xc   : > { %p463_p7 = scmp.gt.s32.totalorder (!%p378_p3), %s3121_s21, 0  ;;  %s3294_s25 = smov (!%p378_p3), 8  }
   0xd   : > { %p537_p12 = scmp.lt.s32.totalorder (!%p378_p3), %s3274_s30, 1 }
   0xe   : > { %s5033_s10 = smov (!%p451_p5, %s3278_s10), 1  ;;  %vm549_vm0 = vcmask 31744   ;;  %s5035_s21 = smov (!%p463_p7, %s3121_s21), 0  ;;  %vm509_vm1 = vcmask 24576   ;;  %v3293_v33 = vmov 0.0   ;;  %vm741_vm2 = vcmask 64544  }
   0xf   : > { %s454_s17 = scalar_select %p453_p6, %s3388_s16, 15  ;;  %522 = vst.msk [vmem:[#allocation2 + $0x11] sm:$0x1] %vm509_vm1, %v3293_v33  ;;  %vm862_vm3 = vcmask 97344   ;;  %vm984_vm4 = vcmask 130144   ;;  %vm1105_vm5 = vcmask 162944  }
  0x10   : > { %s3392_s18 = sshll.u32 %s5033_s10, 5  ;;  %s3122_s28 = sshll.u32 %s5035_s21, 1  ;;  %510 = vst.msk [vmem:[#allocation2] sm:$0x1] %vm509_vm1, %v3293_v33  ;;  %vm1226_vm6 = vcmask 195744   ;;  %vm1347_vm7 = vcmask 228544  }
  0x11   : > { %s3117_s20 = sshll.u32 %s454_s17, 1  ;;  %p468_p9 = scmp.lt.s32.totalorder %s3122_s28, 15  ;;  %511 = vst.msk [vmem:[#allocation2 + $0x18] sm:$0x1] %vm509_vm1, %v3293_v33  ;;  %vm1696_vm8 = vcmask 1043456   ;;  %vm1468_vm9 = vcmask 261344  }
  0x12   : > { %s457_s22 = sadd.s32 %s3392_s18, %s3117_s20  ;;  %s3292_s20 = smov 4   ;;  %512 = vst.msk [vmem:[#allocation2 + $0x30] sm:$0x1] %vm509_vm1, %v3293_v33  ;;  %vm1589_vm10 = vcmask 294144   ;;  %vm1635_vm11 = vcmask 293888   ;;  %vm1907_vm12 = vcmask 57344  }
  0x13   : > { %s3119_s23 = sshll.u32 %s457_s22, 3  ;;  %s5037_s28 = smov (!%p468_p9, %s3122_s28), 15  ;;  %513 = vst.msk [vmem:[#allocation2 + $0x48] sm:$0x1] %vm509_vm1, %v3293_v33 }
  0x14   : > { %s3402_s26 = scalar_lea.vmem %s4992_s0, %s3119_s23  ;;  %s3123_s10 = sshll.u32 %s5037_s28, 1  ;;  %514 = vst.msk [vmem:[#allocation2 + $0x60] sm:$0x1] %vm509_vm1, %v3293_v33 }
  0x15   : > { %v557_v0 = vld [vmem:[%s3402_s26 + $0x18] sm:$0xff]  ;;  %v556_v1 = vld [vmem:[%s3402_s26 + $0x10] sm:$0xff]  ;;  %v559_v3 = vld [vmem:[%s3402_s26 + $0x28] sm:$0xff]  ;;  %s535_s27 = scalar_select %p534_p8, 1, 0 }
  0x16   : > { %v560_v2 = vld [vmem:[%s3402_s26 + $0x30] sm:$0xff]  ;;  %574 = vst.msk [vmem:[#allocation2 + $0x51] sm:$0xff] %vm549_vm0, %v557_v0  ;;  %v554_v4 = vld [vmem:[%s3402_s26] sm:$0xff]  ;;  %v555_v5 = vld [vmem:[%s3402_s26 + $0x8] sm:$0xff]  ;;  %s472_s17 = sadd.s32 %s3123_s10, %s3392_s18  ;;  %s3295_s10 = smov 12  }
  0x17   : > { %573 = vst.msk [vmem:[#allocation2 + $0x49] sm:$0xff] %vm549_vm0, %v556_v1  ;;  %s536_s29 = scvt.s32.f32 %s535_s27  ;;  %v563_v6 = vld [vmem:[%s3402_s26 + $0x48] sm:$0xff]  ;;  %v562_v7 = vld [vmem:[%s3402_s26 + $0x40] sm:$0xff]  ;;  %s3125_s21 = sshll.u32 %s472_s17, 3  ;;  %v565_v13 = vld [vmem:[%s3402_s26 + $0x58] sm:$0xff] }
  0x18   : > { %577 = vst.msk [vmem:[#allocation2 + $0x79] sm:$0xff] %vm549_vm0, %v560_v2  ;;  %v558_v8 = vld [vmem:[%s3402_s26 + $0x20] sm:$0xff]  ;;  %s474_s24 = scalar_lea.vmem %s4993_s1, %s3125_s21  ;;  %v561_v14 = vld [vmem:[%s3402_s26 + $0x38] sm:$0xff]  ;;  %v568_v27 = vld [vmem:[%s3402_s26 + $0x70] sm:$0xff] }
  0x19   : > { %576 = vst.msk [vmem:[#allocation2 + $0x69] sm:$0xff] %vm549_vm0, %v559_v3  ;;  %v544_v11 = vstv %s536_s29  ;;  %v566_v12 = vld [vmem:[%s3402_s26 + $0x60] sm:$0xff]  ;;  %v542_v15 = vld [vmem:[%s474_s24 + $0x10] sm:$0xff]  ;;  %v543_v20 = vld [vmem:[%s474_s24 + $0x18] sm:$0xff]  ;;  %s538_s29 = scalar_select %p537_p12, 1, 0 }
  0x1a   : > { %571 = vst.msk [vmem:[#allocation2 + $0x31] sm:$0xff] %vm549_vm0, %v554_v4  ;;  %v540_v16 = vld [vmem:[%s474_s24] sm:$0xff]  ;;  %v547_v17 = vmul.f32 %v544_v11, %v542_v15  ;;  %v541_v21 = vld [vmem:[%s474_s24 + $0x8] sm:$0xff]  ;;  %v548_v22 = vmul.f32 %v544_v11, %v543_v20  ;;  %v569_v26 = vld [vmem:[%s3402_s26 + $0x78] sm:$0xff]  ;;  %s3296_s24 = smov 16  }
  0x1b   : > { %572 = vst.msk [vmem:[#allocation2 + $0x39] sm:$0xff] %vm549_vm0, %v555_v5  ;;  %v545_v18 = vmul.f32 %v544_v11, %v540_v16  ;;  %v546_v23 = vmul.f32 %v544_v11, %v541_v21  ;;  %v564_v29 = vld [vmem:[%s3402_s26 + $0x50] sm:$0xff]  ;;  %v567_v42 = vld [vmem:[%s3402_s26 + $0x68] sm:$0xff]  ;;  %s3180_s26 = sadd.s32 4, %s3120_s19 }
  0x1c   : > { %580 = vst.msk [vmem:[#allocation2 + $0x99] sm:$0xff] %vm549_vm0, %v563_v6  ;;  %p482_p10 = scmp.lt.s32.totalorder %s3180_s26, 7 }
  0x1d   : > { %v3420_v9 = vld [vmem:[#allocation2 + $0x51] sm:$0xff]  ;;  %579 = vst.msk [vmem:[#allocation2 + $0x91] sm:$0xff] %vm549_vm0, %v562_v7 }
  0x1e   : > { %695 = vrot.lane.b32.xlu1 %v3420_v9, %s3292_s20  ;;  %v3426_v10 = vld [vmem:[#allocation2 + $0x49] sm:$0xff]  ;;  %575 = vst.msk [vmem:[#allocation2 + $0x61] sm:$0xff] %vm549_vm0, %v558_v8  ;;  %s5039_s26 = smov (!%p482_p10, %s3180_s26), 7 }
  0x1f   : > { %693 = vrot.lane.b32.xlu0 %v3426_v10, %s3292_s20  ;;  %583 = vst.msk [vmem:[#allocation2 + $0xc1] sm:$0xff] %vm549_vm0, %v566_v12  ;;  %v3444_v24 = vld [vmem:[#allocation2 + $0x79] sm:$0xff]  ;;  %v3592_v55 = vld [vmem:[#allocation2 + $0x4a] sm:$0xff]  ;;  %s3127_s19 = sshll.u32 %s5039_s26, 1  ;;  %s3297_s26 = smov 20  }
  0x20   : > { %582 = vst.msk [vmem:[#allocation2 + $0xb1] sm:$0xff] %vm549_vm0, %v565_v13  ;;  %v3447_v25 = vld [vmem:[#allocation2 + $0x69] sm:$0xff]  ;;  %p487_p11 = scmp.lt.s32.totalorder %s3127_s19, 15 }
  0x21   : > { %v3439_v19 = vld [vmem:[#allocation2 + $0x31] sm:$0xff]  ;;  %578 = vst.msk [vmem:[#allocation2 + $0x81] sm:$0xff] %vm549_vm0, %v561_v14  ;;  %v3624_v62 = vld [vmem:[#allocation2 + $0x48] sm:$0xff] }
  0x22   : > { %689 = vrot.lane.b32.xlu2 %v3439_v19, %s3292_s20  ;;  %552 = vst.msk [vmem:[#allocation2 + $0x19] sm:$0xff] %vm549_vm0, %v547_v17  ;;  %v3458_v28 = vld [vmem:[#allocation2 + $0x39] sm:$0xff]  ;;  %v3600_v56 = vld [vmem:[#allocation2 + $0x30] sm:$0xff]  ;;  %s5041_s19 = smov (!%p487_p11, %s3127_s19), 15 }
  0x23   : > { %550 = vst.msk [vmem:[#allocation2 + $0x1] sm:$0xff] %vm549_vm0, %v545_v18  ;;  %v3508_v37 = vld [vmem:[#allocation2 + $0x99] sm:$0xff]  ;;  %v3622_v61 = vld [vmem:[#allocation2 + $0x50] sm:$0xff]  ;;  %s3128_s27 = sshll.u32 %s5041_s19, 1  ;;  %s3298_s19 = smov 24  }
  0x24   : > { %553 = vst.msk [vmem:[#allocation2 + $0x21] sm:$0xff] %vm549_vm0, %v548_v22  ;;  %v3512_v38 = vld [vmem:[#allocation2 + $0x91] sm:$0xff]  ;;  %s491_s28 = sadd.s32 %s3128_s27, %s3392_s18  ;;  %s3299_s27 = smov 28  }
  0x25   : > { %551 = vst.msk [vmem:[#allocation2 + $0x9] sm:$0xff] %vm549_vm0, %v546_v23  ;;  %v3471_v32 = vld [vmem:[#allocation2 + $0x61] sm:$0xff]  ;;  %v3574_v50 = vld [vmem:[#allocation2 + $0x32] sm:$0xff]  ;;  %s3130_s17 = sshll.u32 %s491_s28, 3  ;;  %s3300_s28 = smov 32  }
  0x26   : > { %701 = vrot.lane.b32.xlu1 %v3444_v24, %s3292_s20  ;;  %586 = vst.msk [vmem:[#allocation2 + $0xe1] sm:$0xff] %vm549_vm0, %v569_v26  ;;  %v3536_v40 = vld [vmem:[#allocation2 + $0xc1] sm:$0xff]  ;;  %v3604_v57 = vld [vmem:[#allocation2 + $0x38] sm:$0xff]  ;;  %s3698_s23 = scalar_lea.vmem %s4994_s2, %s3130_s17  ;;  %s3156_s17 = sadd.s32 4294967295, %s3388_s16 }
  0x27   : > { %699 = vrot.lane.b32.xlu0 %v3447_v25, %s3292_s20  ;;  %585 = vst.msk [vmem:[#allocation2 + $0xd9] sm:$0xff] %vm549_vm0, %v568_v27  ;;  %v3540_v41 = vld [vmem:[#allocation2 + $0xb1] sm:$0xff]  ;;  %v3588_v53 = vld [vmem:[#allocation2 + $0x62] sm:$0xff] }
  0x28   : > { %581 = vst.msk [vmem:[#allocation2 + $0xa9] sm:$0xff] %vm549_vm0, %v564_v29  ;;  %v3496_v36 = vld [vmem:[#allocation2 + $0x81] sm:$0xff]  ;;  %v3638_v2 = vld [vmem:[#allocation2 + $0x92] sm:$0xff] }
  0x29   : > { %v3466_v30 = vld [vmem:[#allocation2 + $0x19] sm:$0xff]  ;;  %515 = vst.msk [vmem:[#allocation2 + $0x78] sm:$0x1] %vm509_vm1, %v3293_v33  ;;  %v3651_v5 = vld [vmem:[#allocation2 + $0x68] sm:$0xff] }
  0x2a   : > { %691 = vrot.lane.b32.xlu2 %v3458_v28, %s3292_s20  ;;  %v641_v31 = vld [vmem:[#allocation2 + $0x1] sm:$0xff]  ;;  %516 = vst.msk [vmem:[#allocation2 + $0x90] sm:$0x1] %vm509_vm1, %v3293_v33  ;;  %v3584_v52 = vld [vmem:[#allocation2 + $0x18] sm:$0xff] }
  0x2b   : > { %v3483_v34 = vld [vmem:[#allocation2 + $0x21] sm:$0xff]  ;;  %517 = vst.msk [vmem:[#allocation2 + $0xa8] sm:$0x1] %vm509_vm1, %v3293_v33  ;;  %v3686_v18 = vld [vmem:[#allocation2 + $0x98] sm:$0xff] }
  0x2c   : > { %v642_v35 = vld [vmem:[#allocation2 + $0x9] sm:$0xff]  ;;  %518 = vst.msk [vmem:[#allocation2 + $0xc0] sm:$0x1] %vm509_vm1, %v3293_v33  ;;  %v3566_v46 = vld [vmem:[#allocation2 + $0x1a] sm:$0xff] }
  0x2d   : > { %519 = vst.msk [vmem:[#allocation2 + $0xd8] sm:$0x1] %vm509_vm1, %v3293_v33  ;;  %v3554_v43 = vld [vmem:[#allocation2 + $0xe1] sm:$0xff]  ;;  %v763_v47 = vld [vmem:[#allocation2 + $0xa] sm:$0xff] }
  0x2e   : > { %685 = vrot.lane.b32.xlu1 %v3466_v30, %s3292_s20  ;;  %520 = vst.msk [vmem:[#allocation2 + $0xf0] sm:$0x1] %vm509_vm1, %v3293_v33  ;;  %v3556_v44 = vld [vmem:[#allocation2 + $0xd9] sm:$0xff]  ;;  %v762_v48 = vld [vmem:[#allocation2 + $0x2] sm:$0xff] }
  0x2f   : > { %681 = vrot.lane.b32.xlu0 %v641_v31, %s3292_s20  ;;  %521 = vst.msk [vmem:[#allocation2 + $0x108] sm:$0x1] %vm509_vm1, %v3293_v33  ;;  %v3524_v39 = vld [vmem:[#allocation2 + $0xa9] sm:$0xff]  ;;  %v3612_v59 = vld [vmem:[#allocation2 + $0x7a] sm:$0xff] }
  0x30   : > { %523 = vst.msk [vmem:[#allocation2 + $0x29] sm:$0x1] %vm509_vm1, %v3293_v33  ;;  %v3630_v63 = vld [vmem:[#allocation2 + $0x60] sm:$0xff]  ;;  %v3632_v0 = vld [vmem:[#allocation2 + $0xaa] sm:$0xff]  ;;  %v3646_v4 = vld [vmem:[#allocation2 + $0x78] sm:$0xff] }
  0x31   : > { %524 = vst.msk [vmem:[#allocation2 + $0x41] sm:$0x1] %vm509_vm1, %v3293_v33  ;;  %v885_v3 = vld [vmem:[#allocation2 + $0x20] sm:$0xff]  ;;  %v602_v20 = vld [vmem:[#allocation2 + $0x8] sm:$0xff]  ;;  %v3711_v29 = vld [vmem:[#allocation2 + $0x90] sm:$0xff] }
  0x32   : > { %697 = vrot.lane.b32.xlu2 %v3471_v32, %s3292_s20  ;;  %525 = vst.msk [vmem:[#allocation2 + $0x59] sm:$0x1] %vm509_vm1, %v3293_v33  ;;  %v3655_v6 = vld [vmem:[#allocation2 + $0x80] sm:$0xff]  ;;  %v3674_v14 = vld [vmem:[#allocation2 + $0xa8] sm:$0xff] }
  0x33   : > { %526 = vst.msk [vmem:[#allocation2 + $0x71] sm:$0x1] %vm509_vm1, %v3293_v33  ;;  %v601_v13 = vld [vmem:[#allocation2] sm:$0xff] }
  0x34   : > { %527 = vst.msk [vmem:[#allocation2 + $0x89] sm:$0x1] %vm509_vm1, %v3293_v33  ;;  %v3681_v16 = vld [vmem:[#allocation2 + $0xda] sm:$0xff] }
  0x35   : > { %528 = vst.msk [vmem:[#allocation2 + $0xa1] sm:$0x1] %vm509_vm1, %v3293_v33  ;;  %v587_v23 = vld [vmem:[%s3698_s23] sm:$0xff] }
  0x36   : > { %687 = vrot.lane.b32.xlu1 %v3483_v34, %s3292_s20  ;;  %529 = vst.msk [vmem:[#allocation2 + $0xb9] sm:$0x1] %vm509_vm1, %v3293_v33 }
  0x37   : > { %683 = vrot.lane.b32.xlu0 %v642_v35, %s3292_s20  ;;  %530 = vst.msk [vmem:[#allocation2 + $0xd1] sm:$0x1] %vm509_vm1, %v3293_v33  ;;  %v3576_v51 = vld [vmem:[#allocation2 + $0x22] sm:$0xff] }
  0x38   : > { %531 = vst.msk [vmem:[#allocation2 + $0xe9] sm:$0x1] %vm509_vm1, %v3293_v33  ;;  %v3572_v49 = vld [vmem:[#allocation2 + $0x3a] sm:$0xff] }
  0x39   : > { %532 = vst.msk [vmem:[#allocation2 + $0x101] sm:$0x1] %vm509_vm1, %v3293_v33  ;;  %v3590_v54 = vld [vmem:[#allocation2 + $0x52] sm:$0xff] }
  0x3a   : > { %703 = vrot.lane.b32.xlu2 %v3496_v36, %s3292_s20  ;;  %533 = vst.msk [vmem:[#allocation2 + $0x119] sm:$0x1] %vm509_vm1, %v3293_v33  ;;  %v3614_v60 = vld [vmem:[#allocation2 + $0x6a] sm:$0xff] }
  0x3b   : > { %584 = vst.msk [vmem:[#allocation2 + $0xc9] sm:$0xff] %vm549_vm0, %v567_v42  ;;  %v3610_v58 = vld [vmem:[#allocation2 + $0x82] sm:$0xff] }
  0x3c   : > { %623 = vst.msk [vmem:[#allocation4 + $0x10] sm:$0xff] %vm549_vm0, %v3584_v52  ;;  %v3636_v1 = vld [vmem:[#allocation2 + $0x9a] sm:$0xff] }
  0x3d   : > { %625 = vst.msk [vmem:[#allocation4 + $0x20] sm:$0xff] %vm549_vm0, %v3600_v56  ;;  %v3663_v11 = vld [vmem:[#allocation2 + $0xb2] sm:$0xff]  ;;  %v3721_v42 = vld [vmem:[#allocation2 + $0xc0] sm:$0xff] }
  0x3e   : > { %707 = vrot.lane.b32.xlu1 %v3508_v37, %s3292_s20  ;;  %626 = vst.msk [vmem:[#allocation4 + $0x28] sm:$0xff] %vm549_vm0, %v3604_v57 }
  0x3f   : > { %705 = vrot.lane.b32.xlu0 %v3512_v38, %s3292_s20  ;;  %628 = vst.msk [vmem:[#allocation4 + $0x38] sm:$0xff] %vm549_vm0, %v3622_v61  ;;  %v3679_v15 = vld [vmem:[#allocation2 + $0xe2] sm:$0xff] }
  0x40   : > { %627 = vst.msk [vmem:[#allocation4 + $0x30] sm:$0xff] %vm549_vm0, %v3624_v62 }
  0x41   : > { %629 = vst.msk [vmem:[#allocation4 + $0x40] sm:$0xff] %vm549_vm0, %v3630_v63 }
  0x42   : > { %709 = vrot.lane.b32.xlu2 %v3524_v39, %s3292_s20  ;;  %v3560_v45 = vld [vmem:[#allocation2 + $0xc9] sm:$0xff]  ;;  %624 = vst.msk [vmem:[#allocation4 + $0x18] sm:$0xff] %vm549_vm0, %v885_v3 }
  0x43   : > { %631 = vst.msk [vmem:[#allocation4 + $0x50] sm:$0xff] %vm549_vm0, %v3646_v4  ;;  %v3657_v7 = vld [vmem:[#allocation2 + $0xca] sm:$0xff]  ;;  %v3661_v8 = vld [vmem:[#allocation2 + $0xc2] sm:$0xff] }
  0x44   : > { %630 = vst.msk [vmem:[#allocation4 + $0x48] sm:$0xff] %vm549_vm0, %v3651_v5  ;;  %v3700_v21 = vld [vmem:[#allocation2 + $0xc8] sm:$0xff] }
  0x45   : > { %632 = vst.msk [vmem:[#allocation4 + $0x58] sm:$0xff] %vm549_vm0, %v3655_v6 }
  0x46   : > { %713 = vrot.lane.b32.xlu1 %v3536_v40, %s3292_s20  ;;  %621 = vst.msk [vmem:[#allocation4] sm:$0xff] %vm549_vm0, %v601_v13 }
  0x47   : > { %711 = vrot.lane.b32.xlu0 %v3540_v41, %s3292_s20  ;;  %635 = vst.msk [vmem:[#allocation4 + $0x70] sm:$0xff] %vm549_vm0, %v3674_v14 }
  0x48   : > { %634 = vst.msk [vmem:[#allocation4 + $0x68] sm:$0xff] %vm549_vm0, %v3686_v18 }
  0x49   : > { %622 = vst.msk [vmem:[#allocation4 + $0x8] sm:$0xff] %vm549_vm0, %v602_v20 }
  0x4a   : > { %715 = vrot.lane.b32.xlu2 %v3560_v45, %s3292_s20  ;;  %638 = vst.msk [vmem:[#allocation4 + $0x88] sm:$0xff] %vm549_vm0, %v3700_v21 }
  0x4b   : > { %633 = vst.msk [vmem:[#allocation4 + $0x60] sm:$0xff] %vm549_vm0, %v3711_v29 }
  0x4c   : > { %637 = vst.msk [vmem:[#allocation4 + $0x80] sm:$0xff] %vm549_vm0, %v3721_v42 }
  0x4d   : > { %1920 = vst.msk [vmem:[#allocation3 + $0x41] sm:$0x1] %vm1907_vm12, %v3293_v33 }
  0x4e   : > { %719 = vrot.lane.b32.xlu1 %v3554_v43, %s3292_s20  ;;  %1908 = vst.msk [vmem:[#allocation3] sm:$0x1] %vm1907_vm12, %v3293_v33 }
  0x4f   : > { %717 = vrot.lane.b32.xlu0 %v3556_v44, %s3292_s20  ;;  %s539_s20 = scvt.s32.f32 %s538_s29  ;;  %1909 = vst.msk [vmem:[#allocation3 + $0x18] sm:$0x1] %vm1907_vm12, %v3293_v33 }
  0x50   : > { %1910 = vst.msk [vmem:[#allocation3 + $0x30] sm:$0x1] %vm1907_vm12, %v3293_v33 }
  0x51   : > { %v3705_v26 = vstv %s539_s20  ;;  %1911 = vst.msk [vmem:[#allocation3 + $0x48] sm:$0x1] %vm1907_vm12, %v3293_v33 }
  0x52   : > { %802 = vrot.lane.b32.xlu2 %v762_v48, %s3294_s25  ;;  %v592_v27 = vmul.f32 %v3705_v26, %v587_v23  ;;  %v3728_v48 = vld [vmem:[#allocation2 + $0xb0] sm:$0xff]  ;;  %1912 = vst.msk [vmem:[#allocation3 + $0x60] sm:$0x1] %vm1907_vm12, %v3293_v33 }
  0x53   : > { %636 = vst.msk [vmem:[#allocation4 + $0x78] sm:$0xff] %vm549_vm0, %v3728_v48 }
  0x54   : > { %597 = vst.msk [vmem:[#allocation2 + $0xf1] sm:$0xff] %vm549_vm0, %v592_v27 }
  0x55   : > { %1913 = vst.msk [vmem:[#allocation3 + $0x78] sm:$0x1] %vm1907_vm12, %v3293_v33 }
  0x56   : > { %806 = vrot.lane.b32.xlu1 %v3566_v46, %s3294_s25  ;;  %1914 = vst.msk [vmem:[#allocation3 + $0x90] sm:$0x1] %vm1907_vm12, %v3293_v33 }
  0x57   : > { %804 = vrot.lane.b32.xlu0 %v763_v47, %s3294_s25  ;;  %1915 = vst.msk [vmem:[#allocation3 + $0xa8] sm:$0x1] %vm1907_vm12, %v3293_v33 }
  0x58   : > { %1916 = vst.msk [vmem:[#allocation3 + $0xc0] sm:$0x1] %vm1907_vm12, %v3293_v33 }
  0x59   : > { %1917 = vst.msk [vmem:[#allocation3 + $0xd8] sm:$0x1] %vm1907_vm12, %v3293_v33 }
  0x5a   : > { %808 = vrot.lane.b32.xlu2 %v3576_v51, %s3294_s25  ;;  %1918 = vst.msk [vmem:[#allocation3 + $0x11] sm:$0x1] %vm1907_vm12, %v3293_v33 }
  0x5b   : > { %1919 = vst.msk [vmem:[#allocation3 + $0x29] sm:$0x1] %vm1907_vm12, %v3293_v33 }
  0x5c   : > { %1921 = vst.msk [vmem:[#allocation3 + $0x59] sm:$0x1] %vm1907_vm12, %v3293_v33 }
  0x5d   : > { %1922 = vst.msk [vmem:[#allocation3 + $0x71] sm:$0x1] %vm1907_vm12, %v3293_v33 }
  0x5e   : > { %812 = vrot.lane.b32.xlu1 %v3572_v49, %s3294_s25  ;;  %1923 = vst.msk [vmem:[#allocation3 + $0x89] sm:$0x1] %vm1907_vm12, %v3293_v33 }
  0x5f   : > { %810 = vrot.lane.b32.xlu0 %v3574_v50, %s3294_s25  ;;  %1924 = vst.msk [vmem:[#allocation3 + $0xa1] sm:$0x1] %vm1907_vm12, %v3293_v33 }
  0x60   : > { %1925 = vst.msk [vmem:[#allocation3 + $0xb9] sm:$0x1] %vm1907_vm12, %v3293_v33 }
  0x61   : > { %1926 = vst.msk [vmem:[#allocation3 + $0xd1] sm:$0x1] %vm1907_vm12, %v3293_v33 }
  0x62   : > { %814 = vrot.lane.b32.xlu2 %v3592_v55, %s3294_s25  ;;  %1927 = vst.msk [vmem:[#allocation3 + $0xe9] sm:$0x1] %vm1907_vm12, %v3293_v33 }
  0x66   : > { %818 = vrot.lane.b32.xlu1 %v3588_v53, %s3294_s25 }
  0x67   : > { %816 = vrot.lane.b32.xlu0 %v3590_v54, %s3294_s25 }
  0x6a   : > { %820 = vrot.lane.b32.xlu2 %v3614_v60, %s3294_s25 }
  0x6e   : > { %824 = vrot.lane.b32.xlu1 %v3610_v58, %s3294_s25 }
  0x6f   : > { %822 = vrot.lane.b32.xlu0 %v3612_v59, %s3294_s25 }
  0x72   : > { %826 = vrot.lane.b32.xlu2 %v3638_v2, %s3294_s25 }
  0x76   : > { %830 = vrot.lane.b32.xlu1 %v3632_v0, %s3294_s25 }
  0x77   : > { %828 = vrot.lane.b32.xlu0 %v3636_v1, %s3294_s25 }
  0x7a   : > { %832 = vrot.lane.b32.xlu2 %v3663_v11, %s3294_s25 }
  0x7c   : > { %v690_v12 = vpop.permute.xlu2 %689 }
  0x7d   : > { %746 = vst.msk [vmem:[#allocation4 + $0x20] sm:$0xff] %vm741_vm2, %v690_v12 }
  0x7e   : > { %836 = vrot.lane.b32.xlu1 %v3657_v7, %s3294_s25 }
  0x7f   : > { %834 = vrot.lane.b32.xlu0 %v3661_v8, %s3294_s25 }
  0x82   : > { %838 = vrot.lane.b32.xlu2 %v3681_v16, %s3294_s25 }
  0x84   : > { %v692_v17 = vpop.permute.xlu2 %691 }
  0x85   : > { %747 = vst.msk [vmem:[#allocation4 + $0x28] sm:$0xff] %vm741_vm2, %v692_v17  ;;  %v588_v17 = vld [vmem:[%s3698_s23 + $0x8] sm:$0xff] }
  0x86   : > { %924 = vrot.lane.b32.xlu1 %v3584_v52, %s3295_s10  ;;  %v3734_v52 = vld [vmem:[#allocation2 + $0xe0] sm:$0xff]  ;;  %v593_v20 = vmul.f32 %v3705_v26, %v588_v17  ;;  %v3775_v17 = vld [vmem:[#allocation2 + $0xf0] sm:$0xff] }
  0x87   : > { %840 = vrot.lane.b32.xlu0 %v3679_v15, %s3294_s25  ;;  %640 = vst.msk [vmem:[#allocation4 + $0x98] sm:$0xff] %vm549_vm0, %v3734_v52 }
  0x88   : > { %598 = vst.msk [vmem:[#allocation2 + $0xf9] sm:$0xff] %vm549_vm0, %v593_v20 }
  0x8a   : > { %926 = vrot.lane.b32.xlu2 %v885_v3, %s3295_s10 }
  0x8c   : > { %v698_v22 = vpop.permute.xlu2 %697 }
  0x8d   : > { %750 = vst.msk [vmem:[#allocation4 + $0x40] sm:$0xff] %vm741_vm2, %v698_v22  ;;  %v3747_v22 = vld [vmem:[#allocation2 + $0xd8] sm:$0xff] }
  0x8e   : > { %930 = vrot.lane.b32.xlu1 %v3604_v57, %s3295_s10  ;;  %639 = vst.msk [vmem:[#allocation4 + $0x90] sm:$0xff] %vm549_vm0, %v3747_v22 }
  0x8f   : > { %928 = vrot.lane.b32.xlu0 %v3600_v56, %s3295_s10 }
  0x90   : > { %v696_v31 = vpop.permute.xlu1 %695 }
  0x91   : > { %749 = vst.msk [vmem:[#allocation4 + $0x38] sm:$0xff] %vm741_vm2, %v696_v31  ;;  %v694_v35 = vpop.permute.xlu0 %693 }
  0x92   : > { %748 = vst.msk [vmem:[#allocation4 + $0x30] sm:$0xff] %vm741_vm2, %v694_v35  ;;  %932 = vrot.lane.b32.xlu2 %v3624_v62, %s3295_s10 }
  0x94   : > { %v704_v47 = vpop.permute.xlu2 %703 }
  0x95   : > { %753 = vst.msk [vmem:[#allocation4 + $0x58] sm:$0xff] %vm741_vm2, %v704_v47 }
  0x96   : > { %936 = vrot.lane.b32.xlu1 %v3630_v63, %s3295_s10 }
  0x97   : > { %934 = vrot.lane.b32.xlu0 %v3622_v61, %s3295_s10 }
  0x98   : > { %v702_v3 = vpop.permute.xlu1 %701 }
  0x99   : > { %752 = vst.msk [vmem:[#allocation4 + $0x50] sm:$0xff] %vm741_vm2, %v702_v3  ;;  %v700_v12 = vpop.permute.xlu0 %699 }
  0x9a   : > { %751 = vst.msk [vmem:[#allocation4 + $0x48] sm:$0xff] %vm741_vm2, %v700_v12  ;;  %938 = vrot.lane.b32.xlu2 %v3651_v5, %s3295_s10 }
  0x9c   : > { %v710_v13 = vpop.permute.xlu2 %709 }
  0x9d   : > { %756 = vst.msk [vmem:[#allocation4 + $0x70] sm:$0xff] %vm741_vm2, %v710_v13 }
  0x9e   : > { %942 = vrot.lane.b32.xlu1 %v3655_v6, %s3295_s10 }
  0x9f   : > { %940 = vrot.lane.b32.xlu0 %v3646_v4, %s3295_s10 }
  0xa0   : > { %v686_v23 = vpop.permute.xlu1 %685 }
  0xa1   : > { %744 = vst.msk [vmem:[#allocation4 + $0x10] sm:$0xff] %vm741_vm2, %v686_v23  ;;  %v682_v27 = vpop.permute.xlu0 %681 }
  0xa2   : > { %742 = vst.msk [vmem:[#allocation4] sm:$0xff] %vm741_vm2, %v682_v27  ;;  %944 = vrot.lane.b32.xlu2 %v3711_v29, %s3295_s10 }
  0xa4   : > { %v716_v47 = vpop.permute.xlu2 %715 }
  0xa5   : > { %759 = vst.msk [vmem:[#allocation4 + $0x88] sm:$0xff] %vm741_vm2, %v716_v47 }
  0xa6   : > { %948 = vrot.lane.b32.xlu1 %v3674_v14, %s3295_s10 }
  0xa7   : > { %946 = vrot.lane.b32.xlu0 %v3686_v18, %s3295_s10 }
  0xa8   : > { %v688_v31 = vpop.permute.xlu1 %687 }
  0xa9   : > { %745 = vst.msk [vmem:[#allocation4 + $0x18] sm:$0xff] %vm741_vm2, %v688_v31  ;;  %v684_v35 = vpop.permute.xlu0 %683  ;;  %v3787_v31 = vld [vmem:[#allocation2 + $0xf8] sm:$0xff] }
  0xaa   : > { %743 = vst.msk [vmem:[#allocation4 + $0x8] sm:$0xff] %vm741_vm2, %v684_v35  ;;  %950 = vrot.lane.b32.xlu2 %v3728_v48, %s3295_s10 }
  0xac   : > { %v803_v13 = vpop.permute.xlu2 %802 }
  0xad   : > { %863 = vst.msk [vmem:[#allocation4] sm:$0xff] %vm862_vm3, %v803_v13 }
  0xae   : > { %954 = vrot.lane.b32.xlu1 %v3700_v21, %s3295_s10 }
  0xaf   : > { %952 = vrot.lane.b32.xlu0 %v3721_v42, %s3295_s10 }
  0xb0   : > { %v708_v3 = vpop.permute.xlu1 %707 }
  0xb1   : > { %755 = vst.msk [vmem:[#allocation4 + $0x68] sm:$0xff] %vm741_vm2, %v708_v3  ;;  %v706_v12 = vpop.permute.xlu0 %705 }
  0xb2   : > { %754 = vst.msk [vmem:[#allocation4 + $0x60] sm:$0xff] %vm741_vm2, %v706_v12  ;;  %956 = vrot.lane.b32.xlu2 %v3747_v22, %s3295_s10 }
  0xb4   : > { %v809_v27 = vpop.permute.xlu2 %808 }
  0xb5   : > { %866 = vst.msk [vmem:[#allocation4 + $0x18] sm:$0xff] %vm862_vm3, %v809_v27 }
  0xb6   : > { %960 = vrot.lane.b32.xlu1 %v3775_v17, %s3295_s10 }
  0xb7   : > { %958 = vrot.lane.b32.xlu0 %v3734_v52, %s3295_s10 }
  0xb8   : > { %v714_v20 = vpop.permute.xlu1 %713 }
  0xb9   : > { %758 = vst.msk [vmem:[#allocation4 + $0x80] sm:$0xff] %vm741_vm2, %v714_v20  ;;  %v712_v23 = vpop.permute.xlu0 %711 }
  0xba   : > { %757 = vst.msk [vmem:[#allocation4 + $0x78] sm:$0xff] %vm741_vm2, %v712_v23  ;;  %962 = vrot.lane.b32.xlu2 %v3787_v31, %s3295_s10 }
  0xbc   : > { %v815_v3 = vpop.permute.xlu2 %814 }
  0xbd   : > { %869 = vst.msk [vmem:[#allocation4 + $0x30] sm:$0xff] %vm862_vm3, %v815_v3  ;;  %v3845_v3 = vld [vmem:[#allocation2 + $0xf1] sm:$0xff] }
  0xbe   : > { %1047 = vrot.lane.b32.xlu1 %v3483_v34, %s3296_s24 }
  0xbf   : > { %1045 = vrot.lane.b32.xlu0 %v3466_v30, %s3296_s24 }
  0xc0   : > { %v720_v35 = vpop.permute.xlu1 %719 }
  0xc1   : > { %761 = vst.msk [vmem:[#allocation4 + $0x98] sm:$0xff] %vm741_vm2, %v720_v35  ;;  %v718_v47 = vpop.permute.xlu0 %717 }
  0xc2   : > { %760 = vst.msk [vmem:[#allocation4 + $0x90] sm:$0xff] %vm741_vm2, %v718_v47  ;;  %1049 = vrot.lane.b32.xlu2 %v3439_v19, %s3296_s24  ;;  %v3842_v47 = vld [vmem:[#allocation2 + $0xf9] sm:$0xff] }
  0xc4   : > { %v821_v12 = vpop.permute.xlu2 %820 }
  0xc5   : > { %872 = vst.msk [vmem:[#allocation4 + $0x48] sm:$0xff] %vm862_vm3, %v821_v12 }
  0xc6   : > { %1053 = vrot.lane.b32.xlu1 %v3426_v10, %s3296_s24 }
  0xc7   : > { %1051 = vrot.lane.b32.xlu0 %v3458_v28, %s3296_s24 }
  0xc8   : > { %v807_v30 = vpop.permute.xlu1 %806 }
  0xc9   : > { %865 = vst.msk [vmem:[#allocation4 + $0x10] sm:$0xff] %vm862_vm3, %v807_v30  ;;  %v805_v34 = vpop.permute.xlu0 %804 }
  0xca   : > { %864 = vst.msk [vmem:[#allocation4 + $0x8] sm:$0xff] %vm862_vm3, %v805_v34  ;;  %1055 = vrot.lane.b32.xlu2 %v3420_v9, %s3296_s24 }
  0xcc   : > { %v827_v20 = vpop.permute.xlu2 %826 }
  0xcd   : > { %875 = vst.msk [vmem:[#allocation4 + $0x60] sm:$0xff] %vm862_vm3, %v827_v20 }
  0xce   : > { %1059 = vrot.lane.b32.xlu1 %v3447_v25, %s3296_s24 }
  0xcf   : > { %1057 = vrot.lane.b32.xlu0 %v3471_v32, %s3296_s24 }
  0xd0   : > { %v813_v10 = vpop.permute.xlu1 %812 }
  0xd1   : > { %868 = vst.msk [vmem:[#allocation4 + $0x28] sm:$0xff] %vm862_vm3, %v813_v10  ;;  %v811_v13 = vpop.permute.xlu0 %810 }
  0xd2   : > { %867 = vst.msk [vmem:[#allocation4 + $0x20] sm:$0xff] %vm862_vm3, %v811_v13  ;;  %1061 = vrot.lane.b32.xlu2 %v3444_v24, %s3296_s24 }
  0xd4   : > { %v833_v23 = vpop.permute.xlu2 %832 }
  0xd5   : > { %878 = vst.msk [vmem:[#allocation4 + $0x78] sm:$0xff] %vm862_vm3, %v833_v23 }
  0xd6   : > { %1065 = vrot.lane.b32.xlu1 %v3512_v38, %s3296_s24 }
  0xd7   : > { %1063 = vrot.lane.b32.xlu0 %v3496_v36, %s3296_s24 }
  0xd8   : > { %v819_v25 = vpop.permute.xlu1 %818 }
  0xd9   : > { %871 = vst.msk [vmem:[#allocation4 + $0x40] sm:$0xff] %vm862_vm3, %v819_v25  ;;  %v817_v9 = vpop.permute.xlu0 %816 }
  0xda   : > { %870 = vst.msk [vmem:[#allocation4 + $0x38] sm:$0xff] %vm862_vm3, %v817_v9  ;;  %1067 = vrot.lane.b32.xlu2 %v3508_v37, %s3296_s24 }
  0xdc   : > { %v839_v27 = vpop.permute.xlu2 %838 }
  0xdd   : > { %881 = vst.msk [vmem:[#allocation4 + $0x90] sm:$0xff] %vm862_vm3, %v839_v27 }
  0xde   : > { %1071 = vrot.lane.b32.xlu1 %v3540_v41, %s3296_s24 }
  0xdf   : > { %1069 = vrot.lane.b32.xlu0 %v3524_v39, %s3296_s24 }
  0xe0   : > { %v825_v38 = vpop.permute.xlu1 %824 }
  0xe1   : > { %874 = vst.msk [vmem:[#allocation4 + $0x58] sm:$0xff] %vm862_vm3, %v825_v38  ;;  %v823_v24 = vpop.permute.xlu0 %822 }
  0xe2   : > { %873 = vst.msk [vmem:[#allocation4 + $0x50] sm:$0xff] %vm862_vm3, %v823_v24  ;;  %1073 = vrot.lane.b32.xlu2 %v3536_v40, %s3296_s24 }
  0xe4   : > { %v927_v35 = vpop.permute.xlu2 %926 }
  0xe5   : > { %986 = vst.msk [vmem:[#allocation4 + $0x8] sm:$0xff] %vm984_vm4, %v927_v35 }
  0xe6   : > { %1077 = vrot.lane.b32.xlu1 %v3556_v44, %s3296_s24 }
  0xe7   : > { %1075 = vrot.lane.b32.xlu0 %v3560_v45, %s3296_s24 }
  0xe8   : > { %v831_v41 = vpop.permute.xlu1 %830 }
  0xe9   : > { %877 = vst.msk [vmem:[#allocation4 + $0x70] sm:$0xff] %vm862_vm3, %v831_v41  ;;  %v829_v37 = vpop.permute.xlu0 %828  ;;  %v3910_v41 = vld [vmem:[#allocation2 + $0xfa] sm:$0xff] }
  0xea   : > { %876 = vst.msk [vmem:[#allocation4 + $0x68] sm:$0xff] %vm862_vm3, %v829_v37  ;;  %1079 = vrot.lane.b32.xlu2 %v3554_v43, %s3296_s24 }
  0xec   : > { %v933_v45 = vpop.permute.xlu2 %932 }
  0xed   : > { %989 = vst.msk [vmem:[#allocation4 + $0x20] sm:$0xff] %vm984_vm4, %v933_v45 }
  0xee   : > { %1083 = vrot.lane.b32.xlu1 %v3842_v47, %s3296_s24 }
  0xef   : > { %1081 = vrot.lane.b32.xlu0 %v3845_v3, %s3296_s24 }
  0xf0   : > { %v837_v40 = vpop.permute.xlu1 %836 }
  0xf1   : > { %880 = vst.msk [vmem:[#allocation4 + $0x88] sm:$0xff] %vm862_vm3, %v837_v40  ;;  %v835_v44 = vpop.permute.xlu0 %834  ;;  %v589_v40 = vld [vmem:[%s3698_s23 + $0x10] sm:$0xff] }
  0xf2   : > { %879 = vst.msk [vmem:[#allocation4 + $0x80] sm:$0xff] %vm862_vm3, %v835_v44  ;;  %1166 = vrot.lane.b32.xlu2 %v3566_v46, %s3297_s26  ;;  %v594_v44 = vmul.f32 %v3705_v26, %v589_v40 }
  0xf4   : > { %v939_v34 = vpop.permute.xlu2 %938  ;;  %599 = vst.msk [vmem:[#allocation2 + $0x109] sm:$0xff] %vm549_vm0, %v594_v44  ;;  %v1381_v44 = vld [vmem:[#allocation2 + $0xc9] sm:$0xff] }
  0xf5   : > { %992 = vst.msk [vmem:[#allocation4 + $0x38] sm:$0xff] %vm984_vm4, %v939_v34 }
  0xf6   : > { %1170 = vrot.lane.b32.xlu1 %v3574_v50, %s3297_s26 }
  0xf7   : > { %1168 = vrot.lane.b32.xlu0 %v3576_v51, %s3297_s26 }
  0xf8   : > { %v925_v43 = vpop.permute.xlu1 %924 }
  0xf9   : > { %985 = vst.msk [vmem:[#allocation4] sm:$0xff] %vm984_vm4, %v925_v43  ;;  %v841_v30 = vpop.permute.xlu0 %840 }
  0xfa   : > { %882 = vst.msk [vmem:[#allocation4 + $0x98] sm:$0xff] %vm862_vm3, %v841_v30  ;;  %1172 = vrot.lane.b32.xlu2 %v3572_v49, %s3297_s26  ;;  %v590_v30 = vld [vmem:[%s3698_s23 + $0x18] sm:$0xff]  ;;  %s3304_s23 = smov 64  }
  0xfb   : > { %v595_v34 = vmul.f32 %v3705_v26, %v590_v30 }
  0xfc   : > { %v945_v12 = vpop.permute.xlu2 %944 }
  0xfd   : > { %995 = vst.msk [vmem:[#allocation4 + $0x50] sm:$0xff] %vm984_vm4, %v945_v12  ;;  %v1371_v12 = vld [vmem:[#allocation2 + $0x51] sm:$0xff] }
  0xfe   : > { %1176 = vrot.lane.b32.xlu1 %v3590_v54, %s3297_s26  ;;  %600 = vst.msk [vmem:[#allocation2 + $0x111] sm:$0xff] %vm549_vm0, %v595_v34  ;;  %v1496_v34 = vld [vmem:[#allocation2 + $0x82] sm:$0xff]  ;;  %vm1928_vm0 = vcmask 64512  }
  0xff   : > { %1174 = vrot.lane.b32.xlu0 %v3592_v55, %s3297_s26 }
 0x100   : > { %v931_v51 = vpop.permute.xlu1 %930 }
 0x101   : > { %988 = vst.msk [vmem:[#allocation4 + $0x18] sm:$0xff] %vm984_vm4, %v931_v51  ;;  %v929_v46 = vpop.permute.xlu0 %928 }
 0x102   : > { %987 = vst.msk [vmem:[#allocation4 + $0x10] sm:$0xff] %vm984_vm4, %v929_v46  ;;  %1178 = vrot.lane.b32.xlu2 %v3588_v53, %s3297_s26 }
 0x104   : > { %v951_v20 = vpop.permute.xlu2 %950 }
 0x105   : > { %998 = vst.msk [vmem:[#allocation4 + $0x68] sm:$0xff] %vm984_vm4, %v951_v20  ;;  %v1266_v51 = vld [vmem:[#allocation2 + $0x110] sm:$0xff]  ;;  %v1374_v20 = vld [vmem:[#allocation2 + $0x79] sm:$0xff] }
 0x106   : > { %1182 = vrot.lane.b32.xlu1 %v3612_v59, %s3297_s26 }
 0x107   : > { %1180 = vrot.lane.b32.xlu0 %v3614_v60, %s3297_s26 }
 0x108   : > { %v937_v10 = vpop.permute.xlu1 %936 }
 0x109   : > { %991 = vst.msk [vmem:[#allocation4 + $0x30] sm:$0xff] %vm984_vm4, %v937_v10  ;;  %v935_v13 = vpop.permute.xlu0 %934  ;;  %v1370_v10 = vld [vmem:[#allocation2 + $0x49] sm:$0xff] }
 0x10a   : > { %990 = vst.msk [vmem:[#allocation4 + $0x28] sm:$0xff] %vm984_vm4, %v935_v13  ;;  %1184 = vrot.lane.b32.xlu2 %v3610_v58, %s3297_s26 }
 0x10c   : > { %v957_v9 = vpop.permute.xlu2 %956 }
 0x10d   : > { %1001 = vst.msk [vmem:[#allocation4 + $0x80] sm:$0xff] %vm984_vm4, %v957_v9 }
 0x10e   : > { %1188 = vrot.lane.b32.xlu1 %v3636_v1, %s3297_s26 }
 0x10f   : > { %1186 = vrot.lane.b32.xlu0 %v3638_v2, %s3297_s26 }
 0x110   : > { %v943_v59 = vpop.permute.xlu1 %942 }
 0x111   : > { %994 = vst.msk [vmem:[#allocation4 + $0x48] sm:$0xff] %vm984_vm4, %v943_v59  ;;  %v941_v25 = vpop.permute.xlu0 %940  ;;  %v1373_v59 = vld [vmem:[#allocation2 + $0x69] sm:$0xff] }
 0x112   : > { %993 = vst.msk [vmem:[#allocation4 + $0x40] sm:$0xff] %vm984_vm4, %v941_v25  ;;  %1190 = vrot.lane.b32.xlu2 %v3632_v0, %s3297_s26 }
 0x114   : > { %v963_v23 = vpop.permute.xlu2 %962 }
 0x115   : > { %1004 = vst.msk [vmem:[#allocation4 + $0x98] sm:$0xff] %vm984_vm4, %v963_v23 }
 0x116   : > { %1194 = vrot.lane.b32.xlu1 %v3661_v8, %s3297_s26 }
 0x117   : > { %1192 = vrot.lane.b32.xlu0 %v3663_v11, %s3297_s26 }
 0x118   : > { %v949_v2 = vpop.permute.xlu1 %948 }
 0x119   : > { %997 = vst.msk [vmem:[#allocation4 + $0x60] sm:$0xff] %vm984_vm4, %v949_v2  ;;  %v947_v58 = vpop.permute.xlu0 %946  ;;  %v1377_v2 = vld [vmem:[#allocation2 + $0x99] sm:$0xff] }
 0x11a   : > { %996 = vst.msk [vmem:[#allocation4 + $0x58] sm:$0xff] %vm984_vm4, %v947_v58  ;;  %1196 = vrot.lane.b32.xlu2 %v3657_v7, %s3297_s26  ;;  %v1376_v58 = vld [vmem:[#allocation2 + $0x91] sm:$0xff] }
 0x11c   : > { %v1050_v27 = vpop.permute.xlu2 %1049 }
 0x11d   : > { %1108 = vst.msk [vmem:[#allocation4 + $0x10] sm:$0xff] %vm1105_vm5, %v1050_v27 }
 0x11e   : > { %1200 = vrot.lane.b32.xlu1 %v3679_v15, %s3297_s26  ;;  %v3912_v15 = vld [vmem:[#allocation2 + $0xf2] sm:$0xff] }
 0x11f   : > { %1198 = vrot.lane.b32.xlu0 %v3681_v16, %s3297_s26 }
 0x120   : > { %v955_v38 = vpop.permute.xlu1 %954 }
 0x121   : > { %1000 = vst.msk [vmem:[#allocation4 + $0x78] sm:$0xff] %vm984_vm4, %v955_v38  ;;  %v953_v24 = vpop.permute.xlu0 %952 }
 0x122   : > { %999 = vst.msk [vmem:[#allocation4 + $0x70] sm:$0xff] %vm984_vm4, %v953_v24  ;;  %1202 = vrot.lane.b32.xlu2 %v3912_v15, %s3297_s26  ;;  %v1379_v24 = vld [vmem:[#allocation2 + $0xb1] sm:$0xff] }
 0x124   : > { %v1056_v35 = vpop.permute.xlu2 %1055 }
 0x125   : > { %1111 = vst.msk [vmem:[#allocation4 + $0x28] sm:$0xff] %vm1105_vm5, %v1056_v35 }
 0x126   : > { %1287 = vrot.lane.b32.xlu1 %v3600_v56, %s3298_s19 }
 0x127   : > { %1204 = vrot.lane.b32.xlu0 %v3910_v41, %s3297_s26 }
 0x128   : > { %v961_v7 = vpop.permute.xlu1 %960 }
 0x129   : > { %1003 = vst.msk [vmem:[#allocation4 + $0x90] sm:$0xff] %vm984_vm4, %v961_v7  ;;  %v959_v37 = vpop.permute.xlu0 %958 }
 0x12a   : > { %1002 = vst.msk [vmem:[#allocation4 + $0x88] sm:$0xff] %vm984_vm4, %v959_v37  ;;  %1289 = vrot.lane.b32.xlu2 %v3604_v57, %s3298_s19  ;;  %v1380_v37 = vld [vmem:[#allocation2 + $0xc1] sm:$0xff] }
 0x12c   : > { %v1062_v43 = vpop.permute.xlu2 %1061 }
 0x12d   : > { %1114 = vst.msk [vmem:[#allocation4 + $0x40] sm:$0xff] %vm1105_vm5, %v1062_v43 }
 0x12e   : > { %1293 = vrot.lane.b32.xlu1 %v3622_v61, %s3298_s19 }
 0x12f   : > { %1291 = vrot.lane.b32.xlu0 %v3624_v62, %s3298_s19 }
 0x130   : > { %v1048_v56 = vpop.permute.xlu1 %1047 }
 0x131   : > { %1107 = vst.msk [vmem:[#allocation4 + $0x8] sm:$0xff] %vm1105_vm5, %v1048_v56  ;;  %v1046_v45 = vpop.permute.xlu0 %1045  ;;  %v1382_v56 = vld [vmem:[#allocation2 + $0xd9] sm:$0xff] }
 0x132   : > { %1106 = vst.msk [vmem:[#allocation4] sm:$0xff] %vm1105_vm5, %v1046_v45  ;;  %1295 = vrot.lane.b32.xlu2 %v3630_v63, %s3298_s19  ;;  %v1502_v45 = vld [vmem:[#allocation2 + $0xca] sm:$0xff] }
 0x134   : > { %v1068_v62 = vpop.permute.xlu2 %1067 }
 0x135   : > { %1117 = vst.msk [vmem:[#allocation4 + $0x58] sm:$0xff] %vm1105_vm5, %v1068_v62 }
 0x136   : > { %1299 = vrot.lane.b32.xlu1 %v3646_v4, %s3298_s19 }
 0x137   : > { %1297 = vrot.lane.b32.xlu0 %v3651_v5, %s3298_s19 }
 0x138   : > { %v1054_v57 = vpop.permute.xlu1 %1053 }
 0x139   : > { %1110 = vst.msk [vmem:[#allocation4 + $0x20] sm:$0xff] %vm1105_vm5, %v1054_v57  ;;  %v1052_v61 = vpop.permute.xlu0 %1051  ;;  %v1383_v57 = vld [vmem:[#allocation2 + $0xe1] sm:$0xff] }
 0x13a   : > { %1109 = vst.msk [vmem:[#allocation4 + $0x18] sm:$0xff] %vm1105_vm5, %v1052_v61  ;;  %1301 = vrot.lane.b32.xlu2 %v3655_v6, %s3298_s19  ;;  %v1495_v61 = vld [vmem:[#allocation2 + $0x7a] sm:$0xff] }
 0x13c   : > { %v1074_v5 = vpop.permute.xlu2 %1073 }
 0x13d   : > { %1120 = vst.msk [vmem:[#allocation4 + $0x70] sm:$0xff] %vm1105_vm5, %v1074_v5 }
 0x13e   : > { %1305 = vrot.lane.b32.xlu1 %v3686_v18, %s3298_s19 }
 0x13f   : > { %1303 = vrot.lane.b32.xlu0 %v3711_v29, %s3298_s19 }
 0x140   : > { %v1060_v63 = vpop.permute.xlu1 %1059 }
 0x141   : > { %1113 = vst.msk [vmem:[#allocation4 + $0x38] sm:$0xff] %vm1105_vm5, %v1060_v63  ;;  %v1058_v4 = vpop.permute.xlu0 %1057  ;;  %v1504_v63 = vld [vmem:[#allocation2 + $0xe2] sm:$0xff] }
 0x142   : > { %1112 = vst.msk [vmem:[#allocation4 + $0x30] sm:$0xff] %vm1105_vm5, %v1058_v4  ;;  %1307 = vrot.lane.b32.xlu2 %v3674_v14, %s3298_s19 }
 0x144   : > { %v1080_v26 = vpop.permute.xlu2 %1079 }
 0x145   : > { %1123 = vst.msk [vmem:[#allocation4 + $0x88] sm:$0xff] %vm1105_vm5, %v1080_v26  ;;  %v1634_v26 = vld [vmem:[%s4995_s3 + $0x20] sm:$0xf] }
 0x146   : > { %1311 = vrot.lane.b32.xlu1 %v3721_v42, %s3298_s19  ;;  %3134 = vmatpush.msk.msra.mxu0 %vm1696_vm8, %v1634_v26 }
 0x147   : > { %1309 = vrot.lane.b32.xlu0 %v3728_v48, %s3298_s19  ;;  %v1265_v48 = vld [vmem:[#allocation2 + $0x108] sm:$0xff]  ;;  %3181 = vmatpush.msk.msra.mxu2 %vm1696_vm8, %v1634_v26 }
 0x148   : > { %v1066_v6 = vpop.permute.xlu1 %1065 }
 0x149   : > { %1116 = vst.msk [vmem:[#allocation4 + $0x50] sm:$0xff] %vm1105_vm5, %v1066_v6  ;;  %v1064_v18 = vpop.permute.xlu0 %1063 }
 0x14a   : > { %1115 = vst.msk [vmem:[#allocation4 + $0x48] sm:$0xff] %vm1105_vm5, %v1064_v18  ;;  %1313 = vrot.lane.b32.xlu2 %v3700_v21, %s3298_s19 }
 0x14c   : > { %v1167_v42 = vpop.permute.xlu2 %1166 }
 0x14d   : > { %1227 = vst.msk [vmem:[#allocation4] sm:$0xff] %vm1226_vm6, %v1167_v42  ;;  %v1632_v42 = vld [vmem:[%s4995_s3 + $0x10] sm:$0xff] }
 0x14e   : > { %1317 = vrot.lane.b32.xlu1 %v3734_v52, %s3298_s19 }
 0x14f   : > { %1315 = vrot.lane.b32.xlu0 %v3747_v22, %s3298_s19 }
 0x150   : > { %v1072_v29 = vpop.permute.xlu1 %1071 }
 0x151   : > { %1119 = vst.msk [vmem:[#allocation4 + $0x68] sm:$0xff] %vm1105_vm5, %v1072_v29  ;;  %v1070_v14 = vpop.permute.xlu0 %1069 }
 0x152   : > { %1118 = vst.msk [vmem:[#allocation4 + $0x60] sm:$0xff] %vm1105_vm5, %v1070_v14  ;;  %1319 = vrot.lane.b32.xlu2 %v3775_v17, %s3298_s19  ;;  %v1633_v14 = vld [vmem:[%s4995_s3 + $0x18] sm:$0xff] }
 0x153   : > { %1712 = vmatpush.msra.mxu0 %v1633_v14  ;;  %3182 = vmatpush.msra.mxu2 %v1633_v14  ;;  %v1387_v14 = vld [vmem:[#allocation2 + $0x111] sm:$0xff] }
 0x154   : > { %v1173_v22 = vpop.permute.xlu2 %1172 }
 0x155   : > { %1230 = vst.msk [vmem:[#allocation4 + $0x18] sm:$0xff] %vm1226_vm6, %v1173_v22  ;;  %1713 = vmatpush.msra.mxu0 %v1632_v42  ;;  %3183 = vmatpush.msra.mxu2 %v1632_v42  ;;  %v4174_v42 = vld [vmem:[%s4997_s5] ss:$0 sm:$0xff] }
 0x156   : > { %1323 = vrot.lane.b32.xlu1 %v1265_v48, %s3298_s19  ;;  %v1631_v48 = vld [vmem:[%s4995_s3 + $0x8] sm:$0xff] }
 0x157   : > { %1321 = vrot.lane.b32.xlu0 %v3787_v31, %s3298_s19  ;;  %1714 = vmatpush.msra.mxu0 %v1631_v48 }
 0x158   : > { %v1078_v21 = vpop.permute.xlu1 %1077  ;;  %3184 = vmatpush.msra.mxu2 %v1631_v48 }
 0x159   : > { %1122 = vst.msk [vmem:[#allocation4 + $0x80] sm:$0xff] %vm1105_vm5, %v1078_v21  ;;  %v1076_v52 = vpop.permute.xlu0 %1075  ;;  %v1630_v21 = vld [vmem:[%s4995_s3] sm:$0xff] }
 0x15a   : > { %1121 = vst.msk [vmem:[#allocation4 + $0x78] sm:$0xff] %vm1105_vm5, %v1076_v52  ;;  %1325 = vrot.lane.b32.xlu2 %v1266_v51, %s3298_s19  ;;  %1715 = vmatpush.msra.mxu0 %v1630_v21 }
 0x15b   : > { %3185 = vmatpush.msra.mxu2 %v1630_v21 }
 0x15c   : > { %v1179_v46 = vpop.permute.xlu2 %1178 }
 0x15d   : > { %1233 = vst.msk [vmem:[#allocation4 + $0x30] sm:$0xff] %vm1226_vm6, %v1179_v46 }
 0x15e   : > { %1410 = vrot.lane.b32.xlu1 %v3458_v28, %s3299_s27 }
 0x15f   : > { %1408 = vrot.lane.b32.xlu0 %v3439_v19, %s3299_s27 }
 0x160   : > { %v1084_v17 = vpop.permute.xlu1 %1083 }
 0x161   : > { %1125 = vst.msk [vmem:[#allocation4 + $0x98] sm:$0xff] %vm1105_vm5, %v1084_v17  ;;  %v1082_v31 = vpop.permute.xlu0 %1081 }
 0x162   : > { %1124 = vst.msk [vmem:[#allocation4 + $0x90] sm:$0xff] %vm1105_vm5, %v1082_v31  ;;  %1412 = vrot.lane.b32.xlu2 %v1370_v10, %s3299_s27 }
 0x164   : > { %v1185_v13 = vpop.permute.xlu2 %1184 }
 0x165   : > { %1236 = vst.msk [vmem:[#allocation4 + $0x48] sm:$0xff] %vm1226_vm6, %v1185_v13 }
 0x166   : > { %1416 = vrot.lane.b32.xlu1 %v3471_v32, %s3299_s27 }
 0x167   : > { %1414 = vrot.lane.b32.xlu0 %v1371_v12, %s3299_s27 }
 0x168   : > { %v1171_v19 = vpop.permute.xlu1 %1170 }
 0x169   : > { %1229 = vst.msk [vmem:[#allocation4 + $0x10] sm:$0xff] %vm1226_vm6, %v1171_v19  ;;  %v1169_v28 = vpop.permute.xlu0 %1168 }
 0x16a   : > { %1228 = vst.msk [vmem:[#allocation4 + $0x8] sm:$0xff] %vm1226_vm6, %v1169_v28  ;;  %1418 = vrot.lane.b32.xlu2 %v1373_v59, %s3299_s27 }
 0x16c   : > { %v1191_v9 = vpop.permute.xlu2 %1190 }
 0x16d   : > { %1239 = vst.msk [vmem:[#allocation4 + $0x60] sm:$0xff] %vm1226_vm6, %v1191_v9 }
 0x16e   : > { %1422 = vrot.lane.b32.xlu1 %v3496_v36, %s3299_s27 }
 0x16f   : > { %1420 = vrot.lane.b32.xlu0 %v1374_v20, %s3299_s27 }
 0x170   : > { %v1177_v32 = vpop.permute.xlu1 %1176 }
 0x171   : > { %1232 = vst.msk [vmem:[#allocation4 + $0x28] sm:$0xff] %vm1226_vm6, %v1177_v32  ;;  %v1175_v25 = vpop.permute.xlu0 %1174 }
 0x172   : > { %1231 = vst.msk [vmem:[#allocation4 + $0x20] sm:$0xff] %vm1226_vm6, %v1175_v25  ;;  %1424 = vrot.lane.b32.xlu2 %v1376_v58, %s3299_s27 }
 0x174   : > { %v1197_v38 = vpop.permute.xlu2 %1196 }
 0x175   : > { %1242 = vst.msk [vmem:[#allocation4 + $0x78] sm:$0xff] %vm1226_vm6, %v1197_v38 }
 0x176   : > { %1428 = vrot.lane.b32.xlu1 %v3524_v39, %s3299_s27 }
 0x177   : > { %1426 = vrot.lane.b32.xlu0 %v1377_v2, %s3299_s27 }
 0x178   : > { %v1183_v36 = vpop.permute.xlu1 %1182 }
 0x179   : > { %1235 = vst.msk [vmem:[#allocation4 + $0x40] sm:$0xff] %vm1226_vm6, %v1183_v36  ;;  %v1181_v23 = vpop.permute.xlu0 %1180 }
 0x17a   : > { %1234 = vst.msk [vmem:[#allocation4 + $0x38] sm:$0xff] %vm1226_vm6, %v1181_v23  ;;  %1529 = vrot.lane.b32.xlu2 %v3574_v50, %s3300_s28 }
 0x17c   : > { %v1203_v7 = vpop.permute.xlu2 %1202 }
 0x17d   : > { %1245 = vst.msk [vmem:[#allocation4 + $0x90] sm:$0xff] %vm1226_vm6, %v1203_v7 }
 0x17e   : > { %1547 = vrot.lane.b32.xlu1 %v3636_v1, %s3300_s28 }
 0x17f   : > { %1430 = vrot.lane.b32.xlu0 %v1379_v24, %s3299_s27 }
 0x180   : > { %v1189_v39 = vpop.permute.xlu1 %1188 }
 0x181   : > { %1238 = vst.msk [vmem:[#allocation4 + $0x58] sm:$0xff] %vm1226_vm6, %v1189_v39  ;;  %v1187_v27 = vpop.permute.xlu0 %1186 }
 0x182   : > { %1237 = vst.msk [vmem:[#allocation4 + $0x50] sm:$0xff] %vm1226_vm6, %v1187_v27  ;;  %1531 = vrot.lane.b32.xlu2 %v3572_v49, %s3300_s28 }
 0x184   : > { %v1290_v35 = vpop.permute.xlu2 %1289 }
 0x185   : > { %1349 = vst.msk [vmem:[#allocation4 + $0x8] sm:$0xff] %vm1347_vm7, %v1290_v35 }
 0x186   : > { %1432 = vrot.lane.b32.xlu1 %v1380_v37, %s3299_s27 }
 0x187   : > { %1549 = vrot.lane.b32.xlu0 %v3632_v0, %s3300_s28 }
 0x188   : > { %v1195_v1 = vpop.permute.xlu1 %1194 }
 0x189   : > { %1241 = vst.msk [vmem:[#allocation4 + $0x70] sm:$0xff] %vm1226_vm6, %v1195_v1  ;;  %v1193_v50 = vpop.permute.xlu0 %1192 }
 0x18a   : > { %1240 = vst.msk [vmem:[#allocation4 + $0x68] sm:$0xff] %vm1226_vm6, %v1193_v50  ;;  %1533 = vrot.lane.b32.xlu2 %v3592_v55, %s3300_s28 }
 0x18c   : > { %v1296_v40 = vpop.permute.xlu2 %1295 }
 0x18d   : > { %1352 = vst.msk [vmem:[#allocation4 + $0x20] sm:$0xff] %vm1347_vm7, %v1296_v40 }
 0x18e   : > { %1535 = vrot.lane.b32.xlu1 %v3590_v54, %s3300_s28 }
 0x18f   : > { %1551 = vrot.lane.b32.xlu0 %v3663_v11, %s3300_s28 }
 0x190   : > { %v1201_v49 = vpop.permute.xlu1 %1200 }
 0x191   : > { %1244 = vst.msk [vmem:[#allocation4 + $0x88] sm:$0xff] %vm1226_vm6, %v1201_v49  ;;  %v1199_v0 = vpop.permute.xlu0 %1198 }
 0x192   : > { %1243 = vst.msk [vmem:[#allocation4 + $0x80] sm:$0xff] %vm1226_vm6, %v1199_v0  ;;  %1434 = vrot.lane.b32.xlu2 %v1381_v44, %s3299_s27 }
 0x194   : > { %v1302_v11 = vpop.permute.xlu2 %1301 }
 0x195   : > { %1355 = vst.msk [vmem:[#allocation4 + $0x38] sm:$0xff] %vm1347_vm7, %v1302_v11 }
 0x196   : > { %1537 = vrot.lane.b32.xlu1 %v3588_v53, %s3300_s28 }
 0x197   : > { %1553 = vrot.lane.b32.xlu0 %v3661_v8, %s3300_s28 }
 0x198   : > { %v1288_v54 = vpop.permute.xlu1 %1287 }
 0x199   : > { %1348 = vst.msk [vmem:[#allocation4] sm:$0xff] %vm1347_vm7, %v1288_v54  ;;  %v1205_v55 = vpop.permute.xlu0 %1204 }
 0x19a   : > { %1246 = vst.msk [vmem:[#allocation4 + $0x98] sm:$0xff] %vm1226_vm6, %v1205_v55  ;;  %1555 = vrot.lane.b32.xlu2 %v1502_v45, %s3300_s28 }
 0x19c   : > { %v1308_v43 = vpop.permute.xlu2 %1307 }
 0x19d   : > { %1358 = vst.msk [vmem:[#allocation4 + $0x50] sm:$0xff] %vm1347_vm7, %v1308_v43 }
 0x19e   : > { %1539 = vrot.lane.b32.xlu1 %v3614_v60, %s3300_s28 }
 0x19f   : > { %1436 = vrot.lane.b32.xlu0 %v1382_v56, %s3299_s27 }
 0x1a0   : > { %v1294_v53 = vpop.permute.xlu1 %1293 }
 0x1a1   : > { %1351 = vst.msk [vmem:[#allocation4 + $0x18] sm:$0xff] %vm1347_vm7, %v1294_v53  ;;  %v1292_v8 = vpop.permute.xlu0 %1291 }
 0x1a2   : > { %1350 = vst.msk [vmem:[#allocation4 + $0x10] sm:$0xff] %vm1347_vm7, %v1292_v8  ;;  %1557 = vrot.lane.b32.xlu2 %v3681_v16, %s3300_s28 }
 0x1a4   : > { %v1314_v30 = vpop.permute.xlu2 %1313 }
 0x1a5   : > { %1361 = vst.msk [vmem:[#allocation4 + $0x68] sm:$0xff] %vm1347_vm7, %v1314_v30 }
 0x1a6   : > { %1438 = vrot.lane.b32.xlu1 %v1383_v57, %s3299_s27 }
 0x1a7   : > { %1541 = vrot.lane.b32.xlu0 %v1495_v61, %s3300_s28 }
 0x1a8   : > { %v1300_v60 = vpop.permute.xlu1 %1299 }
 0x1a9   : > { %1354 = vst.msk [vmem:[#allocation4 + $0x30] sm:$0xff] %vm1347_vm7, %v1300_v60  ;;  %v1298_v62 = vpop.permute.xlu0 %1297 }
 0x1aa   : > { %1353 = vst.msk [vmem:[#allocation4 + $0x28] sm:$0xff] %vm1347_vm7, %v1298_v62  ;;  %1559 = vrot.lane.b32.xlu2 %v1504_v63, %s3300_s28 }
 0x1ac   : > { %v1320_v5 = vpop.permute.xlu2 %1319 }
 0x1ad   : > { %1364 = vst.msk [vmem:[#allocation4 + $0x80] sm:$0xff] %vm1347_vm7, %v1320_v5 }
 0x1ae   : > { %1440 = vrot.lane.b32.xlu1 %v3845_v3, %s3299_s27 }
 0x1af   : > { %1543 = vrot.lane.b32.xlu0 %v1496_v34, %s3300_s28 }
 0x1b0   : > { %v1306_v4 = vpop.permute.xlu1 %1305 }
 0x1b1   : > { %1357 = vst.msk [vmem:[#allocation4 + $0x48] sm:$0xff] %vm1347_vm7, %v1306_v4  ;;  %v1304_v16 = vpop.permute.xlu0 %1303 }
 0x1b2   : > { %1356 = vst.msk [vmem:[#allocation4 + $0x40] sm:$0xff] %vm1347_vm7, %v1304_v16  ;;  %1561 = vrot.lane.b32.xlu2 %v3912_v15, %s3300_s28 }
 0x1b4   : > { %v1326_v18 = vpop.permute.xlu2 %1325 }
 0x1b5   : > { %1367 = vst.msk [vmem:[#allocation4 + $0x98] sm:$0xff] %vm1347_vm7, %v1326_v18 }
 0x1b6   : > { %1563 = vrot.lane.b32.xlu1 %v3910_v41, %s3300_s28 }
 0x1b7   : > { %1442 = vrot.lane.b32.xlu0 %v3842_v47, %s3299_s27  ;;  %v1497_v47 = vld [vmem:[#allocation2 + $0x92] sm:$0xff] }
 0x1b8   : > { %v1312_v3 = vpop.permute.xlu1 %1311 }
 0x1b9   : > { %1360 = vst.msk [vmem:[#allocation4 + $0x60] sm:$0xff] %vm1347_vm7, %v1312_v3  ;;  %v1310_v6 = vpop.permute.xlu0 %1309 }
 0x1ba   : > { %1359 = vst.msk [vmem:[#allocation4 + $0x58] sm:$0xff] %vm1347_vm7, %v1310_v6  ;;  %1545 = vrot.lane.b32.xlu2 %v1497_v47, %s3300_s28  ;;  %v1507_v47 = vld [vmem:[#allocation2 + $0x10a] sm:$0xff] }
 0x1bc   : > { %v1413_v29 = vpop.permute.xlu2 %1412 }
 0x1bd   : > { %1471 = vst.msk [vmem:[#allocation4 + $0x10] sm:$0xff] %vm1468_vm9, %v1413_v29  ;;  %v1386_v29 = vld [vmem:[#allocation2 + $0x109] sm:$0xff] }
 0x1be   : > { %1565 = vrot.lane.b32.xlu1 %v1507_v47, %s3300_s28 }
 0x1bf   : > { %1444 = vrot.lane.b32.xlu0 %v1386_v29, %s3299_s27 }
 0x1c0   : > { %v1318_v41 = vpop.permute.xlu1 %1317 }
 0x1c1   : > { %1363 = vst.msk [vmem:[#allocation4 + $0x78] sm:$0xff] %vm1347_vm7, %v1318_v41  ;;  %v1316_v15 = vpop.permute.xlu0 %1315  ;;  %v4163_v41 = vld [vmem:[%s4996_s4] ss:$0 sm:$0xff] }
 0x1c2   : > { %1362 = vst.msk [vmem:[#allocation4 + $0x70] sm:$0xff] %vm1347_vm7, %v1316_v15  ;;  %v4167_v15 = vstv %s3156_s17  ;;  %1446 = vrot.lane.b32.xlu2 %v1387_v14, %s3299_s27  ;;  %s3303_s27 = smov 40  }
 0x1c3   : > { %vm1857_vm13 = vcmp.ge.s32.totalorder %v4167_v15, 0  ;;  %vm1867_vm14 = vcmp.lt.s32.totalorder %v4167_v15, 16 }
 0x1c4   : > { %v1419_v51 = vpop.permute.xlu2 %1418  ;;  %vm4192_vm15 = vmand %vm1857_vm13, %vm1867_vm14 }
 0x1c5   : > { %1474 = vst.msk [vmem:[#allocation4 + $0x28] sm:$0xff] %vm1468_vm9, %v1419_v51 }
 0x1c8   : > { %v1324_v52 = vpop.permute.xlu1 %1323 }
 0x1c9   : > { %1366 = vst.msk [vmem:[#allocation4 + $0x90] sm:$0xff] %vm1347_vm7, %v1324_v52  ;;  %v1322_v22 = vpop.permute.xlu0 %1321 }
 0x1ca   : > { %1365 = vst.msk [vmem:[#allocation4 + $0x88] sm:$0xff] %vm1347_vm7, %v1322_v22 }
 0x1cc   : > { %v1425_v46 = vpop.permute.xlu2 %1424 }
 0x1cd   : > { %1477 = vst.msk [vmem:[#allocation4 + $0x40] sm:$0xff] %vm1468_vm9, %v1425_v46 }
 0x1d0   : > { %v1411_v17 = vpop.permute.xlu1 %1410 }
 0x1d1   : > { %1470 = vst.msk [vmem:[#allocation4 + $0x8] sm:$0xff] %vm1468_vm9, %v1411_v17  ;;  %v1409_v31 = vpop.permute.xlu0 %1408  ;;  %v1508_v17 = vld [vmem:[#allocation2 + $0x112] sm:$0xff] }
 0x1d2   : > { %1469 = vst.msk [vmem:[#allocation4] sm:$0xff] %vm1468_vm9, %v1409_v31  ;;  %1567 = vrot.lane.b32.xlu0 %v1508_v17, %s3300_s28 }
 0x1d4   : > { %v1530_v19 = vpop.permute.xlu2 %1529 }
 0x1d5   : > { %1590 = vst.msk [vmem:[#allocation4] sm:$0xff] %vm1589_vm10, %v1530_v19 }
 0x1d8   : > { %v1417_v12 = vpop.permute.xlu1 %1416 }
 0x1d9   : > { %1473 = vst.msk [vmem:[#allocation4 + $0x20] sm:$0xff] %vm1468_vm9, %v1417_v12  ;;  %v1415_v10 = vpop.permute.xlu0 %1414 }
 0x1da   : > { %1472 = vst.msk [vmem:[#allocation4 + $0x18] sm:$0xff] %vm1468_vm9, %v1415_v10 }
 0x1dc   : > { %v1532_v20 = vpop.permute.xlu2 %1531  ;;  %v1610_v59 = vld [vmem:[#allocation4] sm:$0xff] }
 0x1dd   : > { %1591 = vst.msk [vmem:[#allocation4 + $0x8] sm:$0xff] %vm1589_vm10, %v1532_v20  ;;  %3135 = vmatmul.msk.f32.vlgmr.msra.gmra.mxu0 %vm1635_vm11, %v1610_v59 }
 0x1e0   : > { %v1423_v28 = vpop.permute.xlu1 %1422 }
 0x1e1   : > { %1476 = vst.msk [vmem:[#allocation4 + $0x38] sm:$0xff] %vm1468_vm9, %v1423_v28  ;;  %v1421_v13 = vpop.permute.xlu0 %1420  ;;  %v1848_v28 = vadd.s32 1, %v4167_v15 }
 0x1e2   : > { %1475 = vst.msk [vmem:[#allocation4 + $0x30] sm:$0xff] %vm1468_vm9, %v1421_v13 }
 0x1e3   : > { %vm1858_vm1 = vcmp.ge.s32.totalorder %v1848_v28, 0  ;;  %vm1868_vm2 = vcmp.lt.s32.totalorder %v1848_v28, 16 }
 0x1e4   : > { %v1534_v9 = vpop.permute.xlu2 %1533  ;;  %v1611_v2 = vld [vmem:[#allocation4 + $0x8] sm:$0xff]  ;;  %vm4226_vm3 = vmand %vm1858_vm1, %vm1868_vm2 }
 0x1e5   : > { %3136 = vmatmul.msk.f32.gmra.mxu0 %vm1635_vm11, %v1611_v2  ;;  %1592 = vst.msk [vmem:[#allocation4 + $0x10] sm:$0xff] %vm1589_vm10, %v1534_v9 }
 0x1e8   : > { %v1429_v32 = vpop.permute.xlu1 %1428 }
 0x1e9   : > { %1479 = vst.msk [vmem:[#allocation4 + $0x50] sm:$0xff] %vm1468_vm9, %v1429_v32  ;;  %v1427_v25 = vpop.permute.xlu0 %1426 }
 0x1ea   : > { %1478 = vst.msk [vmem:[#allocation4 + $0x48] sm:$0xff] %vm1468_vm9, %v1427_v25 }
 0x1ec   : > { %v1435_v23 = vpop.permute.xlu2 %1434  ;;  %v1612_v38 = vld [vmem:[#allocation4 + $0x10] sm:$0xff] }
 0x1ed   : > { %1482 = vst.msk [vmem:[#allocation4 + $0x68] sm:$0xff] %vm1468_vm9, %v1435_v23  ;;  %3137 = vmatmul.msk.f32.gmra.mxu0 %vm1635_vm11, %v1612_v38  ;;  %v1851_v38 = vadd.s32 4, %v4167_v15 }
 0x1ef   : > { %vm1861_vm4 = vcmp.ge.s32.totalorder %v1851_v38, 0  ;;  %vm1871_vm5 = vcmp.lt.s32.totalorder %v1851_v38, 16 }
 0x1f0   : > { %v1548_v58 = vpop.permute.xlu1 %1547  ;;  %vm4242_vm6 = vmand %vm1861_vm4, %vm1871_vm5 }
 0x1f1   : > { %1599 = vst.msk [vmem:[#allocation4 + $0x48] sm:$0xff] %vm1589_vm10, %v1548_v58  ;;  %v1431_v36 = vpop.permute.xlu0 %1430 }
 0x1f2   : > { %1480 = vst.msk [vmem:[#allocation4 + $0x58] sm:$0xff] %vm1468_vm9, %v1431_v36 }
 0x1f4   : > { %v1556_v7 = vpop.permute.xlu2 %1555 }
 0x1f5   : > { %1603 = vst.msk [vmem:[#allocation4 + $0x68] sm:$0xff] %vm1589_vm10, %v1556_v7 }
 0x1f8   : > { %v1433_v24 = vpop.permute.xlu1 %1432  ;;  %v1619_v39 = vld [vmem:[#allocation4 + $0x48] sm:$0xff] }
 0x1f9   : > { %1481 = vst.msk [vmem:[#allocation4 + $0x60] sm:$0xff] %vm1468_vm9, %v1433_v24  ;;  %v1550_v27 = vpop.permute.xlu0 %1549  ;;  %3144 = vmatmul.msk.f32.vlgmr.msra.gmra.mxu2 %vm1635_vm11, %v1619_v39 }
 0x1fa   : > { %1600 = vst.msk [vmem:[#allocation4 + $0x50] sm:$0xff] %vm1589_vm10, %v1550_v27 }
 0x1fc   : > { %v1558_v35 = vpop.permute.xlu2 %1557  ;;  %v1623_v61 = vld [vmem:[#allocation4 + $0x68] sm:$0xff] }
 0x200   : > { %v1536_v37 = vpop.permute.xlu1 %1535 }
 0x201   : > { %1593 = vst.msk [vmem:[#allocation4 + $0x18] sm:$0xff] %vm1589_vm10, %v1536_v37  ;;  %v1552_v1 = vpop.permute.xlu0 %1551  ;;  %v1620_v50 = vld [vmem:[#allocation4 + $0x50] sm:$0xff] }
 0x202   : > { %1601 = vst.msk [vmem:[#allocation4 + $0x58] sm:$0xff] %vm1589_vm10, %v1552_v1  ;;  %3145 = vmatmul.msk.f32.gmra.mxu2 %vm1635_vm11, %v1620_v50 }
 0x204   : > { %v1560_v54 = vpop.permute.xlu2 %1559 }
 0x208   : > { %v1538_v49 = vpop.permute.xlu1 %1537  ;;  %v1613_v0 = vld [vmem:[#allocation4 + $0x18] sm:$0xff] }
 0x209   : > { %1594 = vst.msk [vmem:[#allocation4 + $0x20] sm:$0xff] %vm1589_vm10, %v1538_v49  ;;  %v1554_v40 = vpop.permute.xlu0 %1553  ;;  %3138 = vmatmul.msk.f32.gmra.mxu0 %vm1635_vm11, %v1613_v0  ;;  %v1621_v44 = vld [vmem:[#allocation4 + $0x58] sm:$0xff] }
 0x20a   : > { %1602 = vst.msk [vmem:[#allocation4 + $0x60] sm:$0xff] %vm1589_vm10, %v1554_v40  ;;  %3146 = vmatmul.msk.f32.gmra.mxu2 %vm1635_vm11, %v1621_v44 }
 0x20c   : > { %v1562_v53 = vpop.permute.xlu2 %1561 }
 0x210   : > { %v1540_v55 = vpop.permute.xlu1 %1539  ;;  %v1614_v11 = vld [vmem:[#allocation4 + $0x20] sm:$0xff] }
 0x211   : > { %1595 = vst.msk [vmem:[#allocation4 + $0x28] sm:$0xff] %vm1589_vm10, %v1540_v55  ;;  %v1437_v56 = vpop.permute.xlu0 %1436  ;;  %3139 = vmatmul.msk.f32.gmra.mxu0 %vm1635_vm11, %v1614_v11  ;;  %v1622_v45 = vld [vmem:[#allocation4 + $0x60] sm:$0xff] }
 0x212   : > { %1483 = vst.msk [vmem:[#allocation4 + $0x70] sm:$0xff] %vm1468_vm9, %v1437_v56  ;;  %3147 = vmatmul.msk.f32.gmra.mxu2 %vm1635_vm11, %v1622_v45 }
 0x213   : > { %1604 = vst.msk [vmem:[#allocation4 + $0x70] sm:$0xff] %vm1589_vm10, %v1558_v35  ;;  %v1852_v35 = vadd.s32 5, %v4167_v15 }
 0x214   : > { %v1546_v60 = vpop.permute.xlu2 %1545 }
 0x215   : > { %1598 = vst.msk [vmem:[#allocation4 + $0x40] sm:$0xff] %vm1589_vm10, %v1546_v60  ;;  %vm1862_vm7 = vcmp.ge.s32.totalorder %v1852_v35, 0  ;;  %vm1872_vm8 = vcmp.lt.s32.totalorder %v1852_v35, 16 }
 0x216   : > { %vm4257_vm12 = vmand %vm1862_vm7, %vm1872_vm8 }
 0x218   : > { %v1439_v8 = vpop.permute.xlu1 %1438  ;;  %v1615_v43 = vld [vmem:[#allocation4 + $0x28] sm:$0xff] }
 0x219   : > { %1484 = vst.msk [vmem:[#allocation4 + $0x78] sm:$0xff] %vm1468_vm9, %v1439_v8  ;;  %v1542_v57 = vpop.permute.xlu0 %1541  ;;  %3140 = vmatmul.msk.f32.gmra.mxu0 %vm1635_vm11, %v1615_v43  ;;  %v1849_v8 = vadd.s32 2, %v4167_v15 }
 0x21a   : > { %1596 = vst.msk [vmem:[#allocation4 + $0x30] sm:$0xff] %vm1589_vm10, %v1542_v57  ;;  %3148 = vmatmul.msk.f32.gmra.mxu2 %vm1635_vm11, %v1623_v61  ;;  %v1624_v63 = vld [vmem:[#allocation4 + $0x70] sm:$0xff] }
 0x21b   : > { %1605 = vst.msk [vmem:[#allocation4 + $0x78] sm:$0xff] %vm1589_vm10, %v1560_v54  ;;  %vm1859_vm13 = vcmp.ge.s32.totalorder %v1849_v8, 0  ;;  %vm1869_vm14 = vcmp.lt.s32.totalorder %v1849_v8, 16 }
 0x21c   : > { %v1618_v6 = vld [vmem:[#allocation4 + $0x40] sm:$0xff] }
 0x220   : > { %v1441_v62 = vpop.permute.xlu1 %1440 }
 0x221   : > { %1485 = vst.msk [vmem:[#allocation4 + $0x80] sm:$0xff] %vm1468_vm9, %v1441_v62  ;;  %v1544_v30 = vpop.permute.xlu0 %1543  ;;  %v1616_v34 = vld [vmem:[#allocation4 + $0x30] sm:$0xff] }
 0x222   : > { %1597 = vst.msk [vmem:[#allocation4 + $0x38] sm:$0xff] %vm1589_vm10, %v1544_v30  ;;  %3141 = vmatmul.msk.f32.gmra.mxu0 %vm1635_vm11, %v1616_v34  ;;  %3149 = vmatmul.msk.f32.gmra.mxu2 %vm1635_vm11, %v1624_v63  ;;  %v1625_v5 = vld [vmem:[#allocation4 + $0x78] sm:$0xff] }
 0x223   : > { %1606 = vst.msk [vmem:[#allocation4 + $0x80] sm:$0xff] %vm1589_vm10, %v1562_v53 }
 0x228   : > { %v1564_v4 = vpop.permute.xlu1 %1563 }
 0x229   : > { %v1617_v16 = vld [vmem:[#allocation4 + $0x38] sm:$0xff]  ;;  %v1443_v3 = vpop.permute.xlu0 %1442 }
 0x22a   : > { %3142 = vmatmul.msk.f32.gmra.mxu0 %vm1635_vm11, %v1617_v16  ;;  %3150 = vmatmul.msk.f32.gmra.mxu2 %vm1635_vm11, %v1625_v5  ;;  %1486 = vst.msk [vmem:[#allocation4 + $0x88] sm:$0xff] %vm1468_vm9, %v1443_v3  ;;  %v1626_v18 = vld [vmem:[#allocation4 + $0x80] sm:$0xff]  ;;  %v1853_v5 = vadd.s32 6, %v4167_v15 }
 0x22b   : > { %1607 = vst.msk [vmem:[#allocation4 + $0x88] sm:$0xff] %vm1589_vm10, %v1564_v4 }
 0x22c   : > { %vm1863_vm1 = vcmp.ge.s32.totalorder %v1853_v5, 0  ;;  %vm1873_vm2 = vcmp.lt.s32.totalorder %v1853_v5, 16  ;;  %v1855_v5 = vadd.s32 8, %v4167_v15 }
 0x232   : > { %3143 = vmatmul.msk.f32.gmra.mxu0 %vm1635_vm11, %v1618_v6  ;;  %3151 = vmatmul.msk.f32.gmra.mxu2 %vm1635_vm11, %v1626_v18  ;;  %v1627_v26 = vld [vmem:[#allocation4 + $0x88] sm:$0xff] }
 0x23a   : > { %3152 = vmatmul.msk.f32.gmra.mxu2 %vm1635_vm11, %v1627_v26 }
 0x25a   : > { %v1717_v48 = vpop.f32.mrf.mxu0 }
 0x25b   : > { %v1781_v21 = vmul.f32 %v4163_v41, %v1717_v48 }
 0x25d   : > { %v1805_v52 = vadd.f32 %v4174_v42, %v1781_v21 }
 0x25f   : > { %v1825_v51 = vmax.f32 %v1805_v52, 0.0 }
 0x261   : > { %v1887_v31 = vsel %vm4192_vm15, %v1825_v51, 0.0 }
 0x262   : > { %1929 = vst.msk [vmem:[#allocation3 + $0x1] sm:$0xff] %vm1928_vm0, %v1887_v31  ;;  %v1720_v46 = vpop.f32.mrf.mxu0 }
 0x263   : > { %v1782_v12 = vmul.f32 %v4163_v41, %v1720_v46 }
 0x265   : > { %v1806_v10 = vadd.f32 %v4174_v42, %v1782_v12 }
 0x267   : > { %v1826_v19 = vmax.f32 %v1806_v10, 0.0  ;;  %v1850_v10 = vadd.s32 3, %v4167_v15 }
 0x269   : > { %v1888_v13 = vsel %vm4192_vm15, %v1826_v19, 0.0  ;;  %v1981_v20 = vld [vmem:[#allocation3 + $0x1] sm:$0xff]  ;;  %vm4273_vm15 = vmand %vm1859_vm13, %vm1869_vm14  ;;  %vm1860_vm4 = vcmp.ge.s32.totalorder %v1850_v10, 0  ;;  %vm1870_vm5 = vcmp.lt.s32.totalorder %v1850_v10, 16  ;;  %vm1865_vm14 = vcmp.ge.s32.totalorder %v1855_v5, 0 }
 0x26a   : > { %v1949_v59 = vld [vmem:[#allocation3] sm:$0xff]  ;;  %1930 = vst.msk [vmem:[#allocation3 + $0x9] sm:$0xff] %vm1928_vm0, %v1888_v13  ;;  %2013 = vrot.lane.b32.xlu1 %v1981_v20, %s3294_s25  ;;  %v1723_v32 = vpop.f32.mrf.mxu0  ;;  %vm4328_vm7 = vmand %vm1860_vm4, %vm1870_vm5  ;;  %vm2450_vm5 = vcmask 392512  }
 0x26b   : > { %v1783_v25 = vmul.f32 %v4163_v41, %v1723_v32  ;;  %1965 = vst.msk [vmem:[#allocation5] sm:$0xff] %vm1928_vm0, %v1949_v59 }
 0x26d   : > { %v1807_v33 = vadd.f32 %v4174_v42, %v1783_v25 }
 0x26f   : > { %v1827_v2 = vmax.f32 %v1807_v33, 0.0 }
 0x271   : > { %v1889_v58 = vsel %vm4226_vm3, %v1827_v2, 0.0  ;;  %v1982_v36 = vld [vmem:[#allocation3 + $0x9] sm:$0xff] }
 0x272   : > { %1931 = vst.msk [vmem:[#allocation3 + $0x19] sm:$0xff] %vm1928_vm0, %v1889_v58  ;;  %2015 = vrot.lane.b32.xlu2 %v1982_v36, %s3294_s25  ;;  %v1950_v23 = vld [vmem:[#allocation3 + $0x8] sm:$0xff]  ;;  %v1854_v36 = vadd.s32 7, %v4167_v15 }
 0x273   : > { %1966 = vst.msk [vmem:[#allocation5 + $0x8] sm:$0xff] %vm1928_vm0, %v1950_v23 }
 0x274   : > { %vm1864_vm8 = vcmp.ge.s32.totalorder %v1854_v36, 0 }
 0x279   : > { %v4238_v7 = vld [vmem:[#allocation3 + $0x19] sm:$0xff] }
 0x27a   : > { %v4240_v37 = vld [vmem:[#allocation3 + $0x18] sm:$0xff]  ;;  %2017 = vrot.lane.b32.xlu0 %v4238_v7, %s3294_s25 }
 0x27b   : > { %1967 = vst.msk [vmem:[#allocation5 + $0x10] sm:$0xff] %vm1928_vm0, %v4240_v37 }
 0x27c   : > { %v1744_v24 = vpop.f32.mrf.mxu2 }
 0x27d   : > { %v1790_v39 = vmul.f32 %v4163_v41, %v1744_v24 }
 0x27f   : > { %v1814_v27 = vadd.f32 %v4174_v42, %v1790_v39 }
 0x281   : > { %v1834_v50 = vmax.f32 %v1814_v27, 0.0 }
 0x283   : > { %v1896_v49 = vsel %vm4242_vm6, %v1834_v50, 0.0 }
 0x284   : > { %1938 = vst.msk [vmem:[#allocation3 + $0x69] sm:$0xff] %vm1928_vm0, %v1896_v49 }
 0x285   : > { %v1747_v0 = vpop.f32.mrf.mxu2 }
 0x286   : > { %v1791_v40 = vmul.f32 %v4163_v41, %v1747_v0  ;;  %v1726_v44 = vpop.f32.mrf.mxu0 }
 0x287   : > { %v1784_v54 = vmul.f32 %v4163_v41, %v1726_v44 }
 0x288   : > { %v1815_v55 = vadd.f32 %v4174_v42, %v1791_v40 }
 0x289   : > { %v1808_v56 = vadd.f32 %v4174_v42, %v1784_v54 }
 0x28a   : > { %v1835_v45 = vmax.f32 %v1815_v55, 0.0  ;;  %v1566_v55 = vpop.permute.xlu1 %1565 }
 0x28b   : > { %v1828_v53 = vmax.f32 %v1808_v56, 0.0 }
 0x28c   : > { %v1897_v43 = vsel %vm4257_vm12, %v1835_v45, 0.0 }
 0x28d   : > { %1939 = vst.msk [vmem:[#allocation3 + $0x79] sm:$0xff] %vm1928_vm0, %v1897_v43  ;;  %v1890_v57 = vsel %vm4226_vm3, %v1828_v53, 0.0  ;;  %v1750_v61 = vpop.f32.mrf.mxu2  ;;  %vm4299_vm3 = vmand %vm1863_vm1, %vm1873_vm2  ;;  %vm2061_vm1 = vcmask 130112  }
 0x28e   : > { %1932 = vst.msk [vmem:[#allocation3 + $0x21] sm:$0xff] %vm1928_vm0, %v1890_v57  ;;  %v1792_v60 = vmul.f32 %v4163_v41, %v1750_v61  ;;  %v1729_v62 = vpop.f32.mrf.mxu0 }
 0x28f   : > { %v1785_v30 = vmul.f32 %v4163_v41, %v1729_v62 }
 0x290   : > { %v1816_v34 = vadd.f32 %v4174_v42, %v1792_v60 }
 0x291   : > { %v1809_v63 = vadd.f32 %v4174_v42, %v1785_v30 }
 0x292   : > { %v1836_v4 = vmax.f32 %v1816_v34, 0.0 }
 0x293   : > { %v1829_v3 = vmax.f32 %v1809_v63, 0.0 }
 0x294   : > { %v1898_v6 = vsel %vm4257_vm12, %v1836_v4, 0.0  ;;  %v4285_v29 = vld [vmem:[#allocation3 + $0x78] sm:$0xff]  ;;  %vm1874_vm12 = vcmp.lt.s32.totalorder %v1854_v36, 16 }
 0x295   : > { %1940 = vst.msk [vmem:[#allocation3 + $0x81] sm:$0xff] %vm1928_vm0, %v1898_v6  ;;  %v1891_v18 = vsel %vm4273_vm15, %v1829_v3, 0.0  ;;  %v1753_v26 = vpop.f32.mrf.mxu2  ;;  %v4283_v47 = vld [vmem:[#allocation3 + $0x21] sm:$0xff]  ;;  %vm4353_vm13 = vmand %vm1864_vm8, %vm1874_vm12  ;;  %vm2645_vm8 = vcmask 523712   ;;  %vm2742_vm12 = vcmask 589312  }
 0x296   : > { %1933 = vst.msk [vmem:[#allocation3 + $0x31] sm:$0xff] %vm1928_vm0, %v1891_v18  ;;  %v1793_v14 = vmul.f32 %v4163_v41, %v1753_v26  ;;  %2019 = vrot.lane.b32.xlu1 %v4283_v47, %s3294_s25  ;;  %v1732_v48 = vpop.f32.mrf.mxu0  ;;  %v4291_v21 = vld [vmem:[#allocation3 + $0x20] sm:$0xff] }
 0x297   : > { %v1786_v52 = vmul.f32 %v4163_v41, %v1732_v48  ;;  %1968 = vst.msk [vmem:[#allocation5 + $0x18] sm:$0xff] %vm1928_vm0, %v4291_v21 }
 0x298   : > { %v1817_v22 = vadd.f32 %v4174_v42, %v1793_v14  ;;  %1975 = vst.msk [vmem:[#allocation5 + $0x50] sm:$0xff] %vm1928_vm0, %v4285_v29 }
 0x299   : > { %v1810_v17 = vadd.f32 %v4174_v42, %v1786_v52  ;;  %v4389_v52 = vld [vmem:[#allocation3 + $0x69] sm:$0xff] }
 0x29a   : > { %v1837_v31 = vmax.f32 %v1817_v22, 0.0 }
 0x29b   : > { %v1830_v46 = vmax.f32 %v1810_v17, 0.0 }
 0x29c   : > { %v1899_v12 = vsel %vm4299_vm3, %v1837_v31, 0.0  ;;  %v4314_v59 = vld [vmem:[#allocation3 + $0x80] sm:$0xff]  ;;  %v1447_v31 = vpop.permute.xlu2 %1446 }
 0x29d   : > { %1941 = vst.msk [vmem:[#allocation3 + $0x91] sm:$0xff] %vm1928_vm0, %v1899_v12  ;;  %v1892_v19 = vsel %vm4273_vm15, %v1830_v46, 0.0  ;;  %v1756_v28 = vpop.f32.mrf.mxu2  ;;  %v4310_v13 = vld [vmem:[#allocation3 + $0x31] sm:$0xff]  ;;  %vm1875_vm15 = vcmp.lt.s32.totalorder %v1855_v5, 16 }
 0x29e   : > { %v4312_v20 = vld [vmem:[#allocation3 + $0x30] sm:$0xff]  ;;  %1934 = vst.msk [vmem:[#allocation3 + $0x39] sm:$0xff] %vm1928_vm0, %v1892_v19  ;;  %v1794_v32 = vmul.f32 %v4163_v41, %v1756_v28  ;;  %2021 = vrot.lane.b32.xlu2 %v4310_v13, %s3294_s25  ;;  %v4413_v19 = vld [vmem:[#allocation3 + $0x79] sm:$0xff] }
 0x29f   : > { %v1735_v25 = vpop.f32.mrf.mxu0  ;;  %1969 = vst.msk [vmem:[#allocation5 + $0x20] sm:$0xff] %vm1928_vm0, %v4312_v20 }
 0x2a0   : > { %v1818_v33 = vadd.f32 %v4174_v42, %v1794_v32  ;;  %v1787_v9 = vmul.f32 %v4163_v41, %v1735_v25  ;;  %1976 = vst.msk [vmem:[#allocation5 + $0x58] sm:$0xff] %vm1928_vm0, %v4314_v59 }
 0x2a1   : > { %1488 = vst.msk [vmem:[#allocation4 + $0x98] sm:$0xff] %vm1468_vm9, %v1447_v31 }
 0x2a2   : > { %v1838_v2 = vmax.f32 %v1818_v33, 0.0  ;;  %v1811_v58 = vadd.f32 %v4174_v42, %v1787_v9 }
 0x2a4   : > { %v1900_v38 = vsel %vm4299_vm3, %v1838_v2, 0.0  ;;  %v1831_v24 = vmax.f32 %v1811_v58, 0.0  ;;  %v4334_v39 = vld [vmem:[#allocation3 + $0x90] sm:$0xff] }
 0x2a5   : > { %1942 = vst.msk [vmem:[#allocation3 + $0x99] sm:$0xff] %vm1928_vm0, %v1900_v38  ;;  %v1759_v27 = vpop.f32.mrf.mxu2  ;;  %v4337_v50 = vld [vmem:[#allocation3 + $0x39] sm:$0xff]  ;;  %v4418_v25 = vld [vmem:[#allocation3 + $0x91] sm:$0xff] }
 0x2a6   : > { %v1893_v35 = vsel %vm4328_vm7, %v1831_v24, 0.0  ;;  %v1795_v49 = vmul.f32 %v4163_v41, %v1759_v27  ;;  %2023 = vrot.lane.b32.xlu0 %v4337_v50, %s3294_s25  ;;  %v4344_v0 = vld [vmem:[#allocation3 + $0x38] sm:$0xff]  ;;  %1977 = vst.msk [vmem:[#allocation5 + $0x60] sm:$0xff] %vm1928_vm0, %v4334_v39  ;;  %v4450_v27 = vld [vmem:[#allocation3 + $0x81] sm:$0xff] }
 0x2a7   : > { %1935 = vst.msk [vmem:[#allocation3 + $0x49] sm:$0xff] %vm1928_vm0, %v1893_v35  ;;  %v1738_v40 = vpop.f32.mrf.mxu0  ;;  %v4454_v35 = vld [vmem:[#allocation3 + $0x1a] sm:$0xff] }
 0x2a8   : > { %v1819_v44 = vadd.f32 %v4174_v42, %v1795_v49  ;;  %v1788_v54 = vmul.f32 %v4163_v41, %v1738_v40  ;;  %1970 = vst.msk [vmem:[#allocation5 + $0x28] sm:$0xff] %vm1928_vm0, %v4344_v0  ;;  %v2078_v49 = vld [vmem:[#allocation3 + $0x2] sm:$0xff] }
 0x2aa   : > { %v1839_v11 = vmax.f32 %v1819_v44, 0.0  ;;  %v1812_v56 = vadd.f32 %v4174_v42, %v1788_v54  ;;  %v1445_v44 = vpop.permute.xlu0 %1444 }
 0x2ab   : > { %1487 = vst.msk [vmem:[#allocation4 + $0x90] sm:$0xff] %vm1468_vm9, %v1445_v44  ;;  %vm2158_vm9 = vcmask 195712  }
 0x2ac   : > { %v1901_v45 = vsel %vm4353_vm13, %v1839_v11, 0.0  ;;  %v1832_v53 = vmax.f32 %v1812_v56, 0.0  ;;  %v4361_v43 = vld [vmem:[#allocation3 + $0x98] sm:$0xff]  ;;  %1608 = vst.msk [vmem:[#allocation4 + $0x90] sm:$0xff] %vm1589_vm10, %v1566_v55  ;;  %v4468_v56 = vld [vmem:[#allocation3 + $0x22] sm:$0xff] }
 0x2ad   : > { %1943 = vst.msk [vmem:[#allocation3 + $0xa9] sm:$0xff] %vm1928_vm0, %v1901_v45  ;;  %v1762_v8 = vpop.f32.mrf.mxu2  ;;  %v4444_v24 = vld [vmem:[#allocation3 + $0x99] sm:$0xff]  ;;  %v2079_v45 = vld [vmem:[#allocation3 + $0xa] sm:$0xff] }
 0x2ae   : > { %v1894_v57 = vsel %vm4328_vm7, %v1832_v53, 0.0  ;;  %v1796_v61 = vmul.f32 %v4163_v41, %v1762_v8  ;;  %v4366_v60 = vld [vmem:[#allocation3 + $0x49] sm:$0xff]  ;;  %1978 = vst.msk [vmem:[#allocation5 + $0x68] sm:$0xff] %vm1928_vm0, %v4361_v43  ;;  %v4466_v11 = vld [vmem:[#allocation3 + $0x3a] sm:$0xff]  ;;  %vm2548_vm7 = vcmask 458112  }
 0x2af   : > { %v4368_v62 = vld [vmem:[#allocation3 + $0x48] sm:$0xff]  ;;  %1936 = vst.msk [vmem:[#allocation3 + $0x51] sm:$0xff] %vm1928_vm0, %v1894_v57  ;;  %2025 = vrot.lane.b32.xlu1 %v4366_v60, %s3294_s25  ;;  %v1741_v30 = vpop.f32.mrf.mxu0 }
 0x2b0   : > { %v1820_v34 = vadd.f32 %v4174_v42, %v1796_v61  ;;  %v1789_v63 = vmul.f32 %v4163_v41, %v1741_v30  ;;  %1971 = vst.msk [vmem:[#allocation5 + $0x30] sm:$0xff] %vm1928_vm0, %v4368_v62  ;;  %v4484_v61 = vld [vmem:[#allocation3 + $0x32] sm:$0xff] }
 0x2b2   : > { %v1840_v4 = vmax.f32 %v1820_v34, 0.0  ;;  %v1813_v16 = vadd.f32 %v4174_v42, %v1789_v63  ;;  %v1568_v53 = vpop.permute.xlu0 %1567  ;;  %v4489_v34 = vld [vmem:[#allocation3 + $0x6a] sm:$0xff]  ;;  %v4491_v63 = vld [vmem:[#allocation3 + $0x82] sm:$0xff] }
 0x2b3   : > { %1609 = vst.msk [vmem:[#allocation4 + $0x98] sm:$0xff] %vm1589_vm10, %v1568_v53  ;;  %vm2256_vm10 = vcmask 261312  }
 0x2b4   : > { %v1902_v3 = vsel %vm4353_vm13, %v1840_v4, 0.0  ;;  %v1833_v6 = vmax.f32 %v1813_v16, 0.0  ;;  %v4383_v18 = vld [vmem:[#allocation3 + $0xa8] sm:$0xff]  ;;  %v4501_v16 = vld [vmem:[#allocation3 + $0x92] sm:$0xff]  ;;  %vm2784_vm13 = vcmask 588800  }
 0x2b5   : > { %1944 = vst.msk [vmem:[#allocation3 + $0xb1] sm:$0xff] %vm1928_vm0, %v1902_v3  ;;  %v1765_v26 = vpop.f32.mrf.mxu2  ;;  %v4459_v40 = vld [vmem:[#allocation3 + $0xa9] sm:$0xff]  ;;  %v4509_v3 = vld [vmem:[#allocation3 + $0x7a] sm:$0xff] }
 0x2b6   : > { %v1895_v14 = vsel %vm4242_vm6, %v1833_v6, 0.0  ;;  %v1797_v48 = vmul.f32 %v4163_v41, %v1765_v26  ;;  %v4391_v22 = vld [vmem:[#allocation3 + $0x51] sm:$0xff]  ;;  %1979 = vst.msk [vmem:[#allocation5 + $0x70] sm:$0xff] %vm1928_vm0, %v4383_v18  ;;  %vm4405_vm6 = vmand %vm1865_vm14, %vm1875_vm15  ;;  %v1628_v26 = vld [vmem:[#allocation4 + $0x90] sm:$0xff] }
 0x2b7   : > { %1937 = vst.msk [vmem:[#allocation3 + $0x61] sm:$0xff] %vm1928_vm0, %v1895_v14  ;;  %2031 = vrot.lane.b32.xlu1 %v4389_v52, %s3294_s25  ;;  %2027 = vrot.lane.b32.xlu2 %v4391_v22, %s3294_s25  ;;  %v4400_v1 = vld [vmem:[#allocation3 + $0x50] sm:$0xff] }
 0x2b8   : > { %v1821_v51 = vadd.f32 %v4174_v42, %v1797_v48  ;;  %1972 = vst.msk [vmem:[#allocation5 + $0x38] sm:$0xff] %vm1928_vm0, %v4400_v1  ;;  %v4476_v8 = vld [vmem:[#allocation3 + $0x4a] sm:$0xff]  ;;  %v4497_v4 = vld [vmem:[#allocation3 + $0x52] sm:$0xff]  ;;  %3153 = vmatmul.msk.f32.gmra.mxu2 %vm1635_vm11, %v1628_v26  ;;  %v4521_v48 = vld [vmem:[#allocation3 + $0x9a] sm:$0xff] }
 0x2ba   : > { %v1841_v46 = vmax.f32 %v1821_v51, 0.0  ;;  %v1629_v17 = vld [vmem:[#allocation4 + $0x98] sm:$0xff] }
 0x2bc   : > { %v1903_v12 = vsel %vm4405_vm6, %v1841_v46, 0.0  ;;  %v4415_v28 = vld [vmem:[#allocation3 + $0xb0] sm:$0xff] }
 0x2bd   : > { %1945 = vst.msk [vmem:[#allocation3 + $0xc1] sm:$0xff] %vm1928_vm0, %v1903_v12  ;;  %v1768_v10 = vpop.f32.mrf.mxu2  ;;  %v4442_v38 = vld [vmem:[#allocation3 + $0xb1] sm:$0xff] }
 0x2be   : > { %v1798_v32 = vmul.f32 %v4163_v41, %v1768_v10  ;;  %v4420_v33 = vld [vmem:[#allocation3 + $0x61] sm:$0xff]  ;;  %1980 = vst.msk [vmem:[#allocation5 + $0x78] sm:$0xff] %vm1928_vm0, %v4415_v28  ;;  %v4503_v5 = vld [vmem:[#allocation3 + $0xaa] sm:$0xff]  ;;  %v4515_v14 = vld [vmem:[#allocation3 + $0xb2] sm:$0xff] }
 0x2bf   : > { %v4422_v9 = vld [vmem:[#allocation3 + $0x68] sm:$0xff]  ;;  %2037 = vrot.lane.b32.xlu1 %v4418_v25, %s3294_s25  ;;  %2033 = vrot.lane.b32.xlu2 %v4413_v19, %s3294_s25  ;;  %v4430_v2 = vld [vmem:[#allocation3 + $0x60] sm:$0xff] }
 0x2c0   : > { %1974 = vst.msk [vmem:[#allocation5 + $0x48] sm:$0xff] %vm1928_vm0, %v4422_v9  ;;  %v1822_v58 = vadd.f32 %v4174_v42, %v1798_v32  ;;  %2029 = vrot.lane.b32.xlu0 %v4420_v33, %s3294_s25  ;;  %v4478_v57 = vld [vmem:[#allocation3 + $0x62] sm:$0xff]  ;;  %3154 = vmatmul.msk.f32.gmra.mxu2 %vm1635_vm11, %v1629_v17  ;;  %vm2353_vm11 = vcmask 326912  }
 0x2c1   : > { %1973 = vst.msk [vmem:[#allocation5 + $0x40] sm:$0xff] %vm1928_vm0, %v4430_v2 }
 0x2c2   : > { %v1842_v36 = vmax.f32 %v1822_v58, 0.0 }
 0x2c4   : > { %v1904_v23 = vsel %vm4405_vm6, %v1842_v36, 0.0 }
 0x2c5   : > { %1946 = vst.msk [vmem:[#allocation3 + $0xc9] sm:$0xff] %vm1928_vm0, %v1904_v23 }
 0x2c7   : > { %2043 = vrot.lane.b32.xlu1 %v4442_v38, %s3294_s25  ;;  %2039 = vrot.lane.b32.xlu2 %v4444_v24, %s3294_s25 }
 0x2c8   : > { %2035 = vrot.lane.b32.xlu0 %v4450_v27, %s3294_s25 }
 0x2cc   : > { %v2016_v54 = vpop.permute.xlu2 %2015 }
 0x2cd   : > { %2063 = vst.msk [vmem:[#allocation5 + $0x8] sm:$0xff] %vm2061_vm1, %v2016_v54 }
 0x2cf   : > { %2114 = vrot.lane.b32.xlu1 %v4454_v35, %s3296_s24  ;;  %2110 = vrot.lane.b32.xlu2 %v2078_v49, %s3296_s24 }
 0x2d0   : > { %2041 = vrot.lane.b32.xlu0 %v4459_v40, %s3294_s25  ;;  %s3301_s25 = smov 48  }
 0x2d7   : > { %2120 = vrot.lane.b32.xlu1 %v4466_v11, %s3296_s24  ;;  %2116 = vrot.lane.b32.xlu2 %v4468_v56, %s3296_s24 }
 0x2d8   : > { %2112 = vrot.lane.b32.xlu0 %v2079_v45, %s3296_s24 }
 0x2dc   : > { %v2014_v30 = vpop.permute.xlu1 %2013 }
 0x2dd   : > { %2062 = vst.msk [vmem:[#allocation5] sm:$0xff] %vm2061_vm1, %v2014_v30 }
 0x2df   : > { %2122 = vrot.lane.b32.xlu2 %v4476_v8, %s3296_s24  ;;  %2126 = vrot.lane.b32.xlu1 %v4478_v57, %s3296_s24 }
 0x2e0   : > { %2118 = vrot.lane.b32.xlu0 %v4484_v61, %s3296_s24 }
 0x2e7   : > { %2128 = vrot.lane.b32.xlu2 %v4489_v34, %s3296_s24  ;;  %2132 = vrot.lane.b32.xlu1 %v4491_v63, %s3296_s24 }
 0x2e8   : > { %2124 = vrot.lane.b32.xlu0 %v4497_v4, %s3296_s24 }
 0x2ec   : > { %v2018_v6 = vpop.permute.xlu0 %2017 }
 0x2ed   : > { %2064 = vst.msk [vmem:[#allocation5 + $0x10] sm:$0xff] %vm2061_vm1, %v2018_v6 }
 0x2ef   : > { %2134 = vrot.lane.b32.xlu2 %v4501_v16, %s3296_s24  ;;  %2138 = vrot.lane.b32.xlu1 %v4503_v5, %s3296_s24 }
 0x2f0   : > { %2130 = vrot.lane.b32.xlu0 %v4509_v3, %s3296_s24 }
 0x2f7   : > { %2140 = vrot.lane.b32.xlu2 %v4515_v14, %s3296_s24  ;;  %2210 = vrot.lane.b32.xlu1 %v4291_v21, %s3298_s19 }
 0x2f8   : > { %2136 = vrot.lane.b32.xlu0 %v4521_v48, %s3296_s24  ;;  %v2022_v51 = vpop.permute.xlu2 %2021  ;;  %s3302_s24 = smov 56  }
 0x2f9   : > { %2066 = vst.msk [vmem:[#allocation5 + $0x20] sm:$0xff] %vm2061_vm1, %v2022_v51  ;;  %v1856_v51 = vadd.s32 9, %v4167_v15  ;;  %v2783_v15 = vld [vmem:[%s4998_s6 + $0x40] sm:$0xff] }
 0x2fa   : > { %2840 = vmatpush.msra.mxu1 %v2783_v15  ;;  %3186 = vmatpush.msra.mxu3 %v2783_v15 }
 0x2fb   : > { %vm1866_vm2 = vcmp.ge.s32.totalorder %v1856_v51, 0  ;;  %vm1876_vm3 = vcmp.lt.s32.totalorder %v1856_v51, 16 }
 0x2fc   : > { %vm4665_vm4 = vmand %vm1866_vm2, %vm1876_vm3 }
 0x2ff   : > { %2212 = vrot.lane.b32.xlu2 %v4312_v20, %s3298_s19  ;;  %2216 = vrot.lane.b32.xlu1 %v4368_v62, %s3298_s19 }
 0x300   : > { %2208 = vrot.lane.b32.xlu0 %v4240_v37, %s3298_s19 }
 0x307   : > { %2218 = vrot.lane.b32.xlu2 %v4400_v1, %s3298_s19  ;;  %2222 = vrot.lane.b32.xlu1 %v4422_v9, %s3298_s19 }
 0x308   : > { %2214 = vrot.lane.b32.xlu0 %v4344_v0, %s3298_s19  ;;  %v2020_v21 = vpop.permute.xlu1 %2019 }
 0x309   : > { %2065 = vst.msk [vmem:[#allocation5 + $0x18] sm:$0xff] %vm2061_vm1, %v2020_v21 }
 0x30f   : > { %2224 = vrot.lane.b32.xlu2 %v4285_v29, %s3298_s19  ;;  %2228 = vrot.lane.b32.xlu1 %v4334_v39, %s3298_s19 }
 0x310   : > { %2220 = vrot.lane.b32.xlu0 %v4430_v2, %s3298_s19 }
 0x311   : > { %v2028_v37 = vpop.permute.xlu2 %2027 }
 0x312   : > { %2069 = vst.msk [vmem:[#allocation5 + $0x38] sm:$0xff] %vm2061_vm1, %v2028_v37 }
 0x317   : > { %2230 = vrot.lane.b32.xlu2 %v4361_v43, %s3298_s19  ;;  %2234 = vrot.lane.b32.xlu1 %v4415_v28, %s3298_s19 }
 0x318   : > { %2226 = vrot.lane.b32.xlu0 %v4314_v59, %s3298_s19  ;;  %v2024_v31 = vpop.permute.xlu0 %2023 }
 0x319   : > { %2067 = vst.msk [vmem:[#allocation5 + $0x28] sm:$0xff] %vm2061_vm1, %v2024_v31  ;;  %v2034_v46 = vpop.permute.xlu2 %2033 }
 0x31a   : > { %2072 = vst.msk [vmem:[#allocation5 + $0x50] sm:$0xff] %vm2061_vm1, %v2034_v46 }
 0x31f   : > { %2305 = vrot.lane.b32.xlu2 %v4238_v7, %s3300_s28  ;;  %2500 = vrot.lane.b32.xlu1 %v4312_v20, %s3301_s25 }
 0x320   : > { %2232 = vrot.lane.b32.xlu0 %v4383_v18, %s3298_s19 }
 0x321   : > { %v2026_v12 = vpop.permute.xlu1 %2025  ;;  %v2040_v10 = vpop.permute.xlu2 %2039 }
 0x322   : > { %2068 = vst.msk [vmem:[#allocation5 + $0x30] sm:$0xff] %vm2061_vm1, %v2026_v12 }
 0x323   : > { %2075 = vst.msk [vmem:[#allocation5 + $0x68] sm:$0xff] %vm2061_vm1, %v2040_v10  ;;  %v2782_v10 = vld [vmem:[%s4998_s6 + $0x38] sm:$0xff] }
 0x324   : > { %2841 = vmatpush.msra.mxu1 %v2782_v10  ;;  %3187 = vmatpush.msra.mxu3 %v2782_v10 }
 0x327   : > { %2597 = vrot.lane.b32.xlu2 %v4310_v13, %s3302_s24  ;;  %2307 = vrot.lane.b32.xlu1 %v4283_v47, %s3300_s28 }
 0x328   : > { %2402 = vrot.lane.b32.xlu0 %v4454_v35, %s3303_s27 }
 0x329   : > { %v2032_v7 = vpop.permute.xlu1 %2031  ;;  %v2111_v20 = vpop.permute.xlu2 %2110 }
 0x32a   : > { %2071 = vst.msk [vmem:[#allocation5 + $0x48] sm:$0xff] %vm2061_vm1, %v2032_v7  ;;  %v2781_v7 = vld [vmem:[%s4998_s6 + $0x30] sm:$0xff] }
 0x32b   : > { %2159 = vst.msk [vmem:[#allocation5] sm:$0xff] %vm2158_vm9, %v2111_v20  ;;  %2842 = vmatpush.msra.mxu1 %v2781_v7  ;;  %3188 = vmatpush.msra.mxu3 %v2781_v7 }
 0x32f   : > { %2404 = vrot.lane.b32.xlu2 %v4468_v56, %s3303_s27  ;;  %2502 = vrot.lane.b32.xlu1 %v4344_v0, %s3301_s25 }
 0x330   : > { %2694 = vrot.lane.b32.xlu0 %v4484_v61, %s3304_s23 }
 0x331   : > { %v2038_v47 = vpop.permute.xlu1 %2037  ;;  %v2117_v32 = vpop.permute.xlu2 %2116 }
 0x332   : > { %2074 = vst.msk [vmem:[#allocation5 + $0x60] sm:$0xff] %vm2061_vm1, %v2038_v47  ;;  %v2030_v58 = vpop.permute.xlu0 %2029 }
 0x333   : > { %2162 = vst.msk [vmem:[#allocation5 + $0x18] sm:$0xff] %vm2158_vm9, %v2117_v32  ;;  %v2780_v32 = vld [vmem:[%s4998_s6 + $0x28] sm:$0xff] }
 0x334   : > { %2070 = vst.msk [vmem:[#allocation5 + $0x40] sm:$0xff] %vm2061_vm1, %v2030_v58  ;;  %2843 = vmatpush.msra.mxu1 %v2780_v32  ;;  %3189 = vmatpush.msra.mxu3 %v2780_v32 }
 0x337   : > { %2420 = vrot.lane.b32.xlu2 %v4491_v63, %s3303_s27  ;;  %2518 = vrot.lane.b32.xlu1 %v4361_v43, %s3301_s25 }
 0x338   : > { %2323 = vrot.lane.b32.xlu0 %v4450_v27, %s3300_s28 }
 0x339   : > { %v2044_v0 = vpop.permute.xlu1 %2043  ;;  %v2123_v36 = vpop.permute.xlu2 %2122 }
 0x33a   : > { %2077 = vst.msk [vmem:[#allocation5 + $0x78] sm:$0xff] %vm2061_vm1, %v2044_v0  ;;  %v2036_v23 = vpop.permute.xlu0 %2035 }
 0x33b   : > { %2165 = vst.msk [vmem:[#allocation5 + $0x30] sm:$0xff] %vm2158_vm9, %v2123_v36  ;;  %v1771_v17 = vpop.f32.mrf.mxu2 }
 0x33c   : > { %2073 = vst.msk [vmem:[#allocation5 + $0x58] sm:$0xff] %vm2061_vm1, %v2036_v23  ;;  %v2778_v23 = vld [vmem:[%s4998_s6 + $0x18] sm:$0xff] }
 0x33f   : > { %2696 = vrot.lane.b32.xlu2 %v4466_v11, %s3304_s23  ;;  %2712 = vrot.lane.b32.xlu1 %v4521_v48, %s3304_s23 }
 0x340   : > { %2599 = vrot.lane.b32.xlu0 %v4337_v50, %s3302_s24 }
 0x341   : > { %v2115_v43 = vpop.permute.xlu1 %2114  ;;  %v2129_v35 = vpop.permute.xlu2 %2128 }
 0x342   : > { %2161 = vst.msk [vmem:[#allocation5 + $0x10] sm:$0xff] %vm2158_vm9, %v2115_v43  ;;  %v2042_v49 = vpop.permute.xlu0 %2041  ;;  %v2777_v43 = vld [vmem:[%s4998_s6 + $0x10] sm:$0xff] }
 0x343   : > { %2168 = vst.msk [vmem:[#allocation5 + $0x48] sm:$0xff] %vm2158_vm9, %v2129_v35  ;;  %v1774_v20 = vpop.f32.mrf.mxu2  ;;  %v4704_v35 = vld [vmem:[#allocation3 + $0xc0] sm:$0xff] }
 0x344   : > { %2076 = vst.msk [vmem:[#allocation5 + $0x70] sm:$0xff] %vm2061_vm1, %v2042_v49  ;;  %v1800_v47 = vmul.f32 %v4163_v41, %v1774_v20  ;;  %v2776_v49 = vld [vmem:[%s4998_s6 + $0x8] sm:$0xff] }
 0x346   : > { %v1824_v36 = vadd.f32 %v4174_v42, %v1800_v47 }
 0x347   : > { %2309 = vrot.lane.b32.xlu2 %v4310_v13, %s3300_s28  ;;  %2325 = vrot.lane.b32.xlu1 %v4418_v25, %s3300_s28 }
 0x348   : > { %2615 = vrot.lane.b32.xlu0 %v4444_v24, %s3302_s24 }
 0x349   : > { %v2121_v44 = vpop.permute.xlu1 %2120  ;;  %v2135_v54 = vpop.permute.xlu2 %2134 }
 0x34a   : > { %2164 = vst.msk [vmem:[#allocation5 + $0x28] sm:$0xff] %vm2158_vm9, %v2121_v44  ;;  %v2113_v55 = vpop.permute.xlu0 %2112 }
 0x34b   : > { %2171 = vst.msk [vmem:[#allocation5 + $0x60] sm:$0xff] %vm2158_vm9, %v2135_v54 }
 0x34c   : > { %2160 = vst.msk [vmem:[#allocation5 + $0x8] sm:$0xff] %vm2158_vm9, %v2113_v55  ;;  %v2775_v55 = vld [vmem:[%s4998_s6] sm:$0xff] }
 0x34f   : > { %2504 = vrot.lane.b32.xlu2 %v4368_v62, %s3301_s25  ;;  %2601 = vrot.lane.b32.xlu1 %v4366_v60, %s3302_s24 }
 0x350   : > { %2406 = vrot.lane.b32.xlu0 %v4484_v61, %s3303_s27 }
 0x351   : > { %v2141_v13 = vpop.permute.xlu2 %2140  ;;  %v2127_v25 = vpop.permute.xlu1 %2126 }
 0x352   : > { %2174 = vst.msk [vmem:[#allocation5 + $0x78] sm:$0xff] %vm2158_vm9, %v2141_v13  ;;  %v2119_v56 = vpop.permute.xlu0 %2118  ;;  %v4721_v13 = vld [vmem:[#allocation3 + $0xc2] sm:$0xff] }
 0x353   : > { %2167 = vst.msk [vmem:[#allocation5 + $0x40] sm:$0xff] %vm2158_vm9, %v2127_v25 }
 0x354   : > { %2163 = vst.msk [vmem:[#allocation5 + $0x20] sm:$0xff] %vm2158_vm9, %v2119_v56 }
 0x357   : > { %2520 = vrot.lane.b32.xlu2 %v4383_v18, %s3301_s25  ;;  %2617 = vrot.lane.b32.xlu1 %v4459_v40, %s3302_s24 }
 0x358   : > { %2422 = vrot.lane.b32.xlu0 %v4501_v16, %s3303_s27 }
 0x359   : > { %v2213_v62 = vpop.permute.xlu2 %2212  ;;  %v2133_v45 = vpop.permute.xlu1 %2132 }
 0x35a   : > { %2259 = vst.msk [vmem:[#allocation5 + $0x10] sm:$0xff] %vm2256_vm10, %v2213_v62  ;;  %v2125_v53 = vpop.permute.xlu0 %2124  ;;  %v2577_v62 = vld [vmem:[#allocation3 + $0xc1] sm:$0xff] }
 0x35b   : > { %2170 = vst.msk [vmem:[#allocation5 + $0x58] sm:$0xff] %vm2158_vm9, %v2133_v45 }
 0x35c   : > { %2166 = vst.msk [vmem:[#allocation5 + $0x38] sm:$0xff] %vm2158_vm9, %v2125_v53 }
 0x35f   : > { %2714 = vrot.lane.b32.xlu2 %v4503_v5, %s3304_s23  ;;  %2408 = vrot.lane.b32.xlu1 %v4466_v11, %s3303_s27 }
 0x360   : > { %2698 = vrot.lane.b32.xlu0 %v4476_v8, %s3304_s23 }
 0x361   : > { %v2219_v18 = vpop.permute.xlu2 %2218  ;;  %v2139_v61 = vpop.permute.xlu1 %2138 }
 0x362   : > { %2262 = vst.msk [vmem:[#allocation5 + $0x28] sm:$0xff] %vm2256_vm10, %v2219_v18  ;;  %v2131_v30 = vpop.permute.xlu0 %2130 }
 0x363   : > { %2173 = vst.msk [vmem:[#allocation5 + $0x70] sm:$0xff] %vm2158_vm9, %v2139_v61 }
 0x364   : > { %2169 = vst.msk [vmem:[#allocation5 + $0x50] sm:$0xff] %vm2158_vm9, %v2131_v30  ;;  %v4749_v30 = vld [vmem:[#allocation3 + $0xc8] sm:$0xff] }
 0x367   : > { %2327 = vrot.lane.b32.xlu2 %v4444_v24, %s3300_s28  ;;  %2424 = vrot.lane.b32.xlu1 %v4521_v48, %s3303_s27 }
 0x368   : > { %2311 = vrot.lane.b32.xlu0 %v4337_v50, %s3300_s28 }
 0x369   : > { %v2225_v11 = vpop.permute.xlu2 %2224  ;;  %v2211_v6 = vpop.permute.xlu1 %2210 }
 0x36a   : > { %2265 = vst.msk [vmem:[#allocation5 + $0x40] sm:$0xff] %vm2256_vm10, %v2225_v11  ;;  %v2137_v26 = vpop.permute.xlu0 %2136  ;;  %v4751_v11 = vld [vmem:[#allocation3 + $0xc9] sm:$0xff] }
 0x36b   : > { %2258 = vst.msk [vmem:[#allocation5 + $0x8] sm:$0xff] %vm2256_vm10, %v2211_v6 }
 0x36c   : > { %2172 = vst.msk [vmem:[#allocation5 + $0x68] sm:$0xff] %vm2158_vm9, %v2137_v26 }
 0x36f   : > { %2603 = vrot.lane.b32.xlu2 %v4391_v22, %s3302_s24  ;;  %2700 = vrot.lane.b32.xlu1 %v4497_v4, %s3304_s23 }
 0x370   : > { %2506 = vrot.lane.b32.xlu0 %v4400_v1, %s3301_s25  ;;  %v1799_v1 = vmul.f32 %v4163_v41, %v1771_v17 }
 0x371   : > { %v2231_v24 = vpop.permute.xlu2 %2230  ;;  %v2217_v50 = vpop.permute.xlu1 %2216 }
 0x372   : > { %2268 = vst.msk [vmem:[#allocation5 + $0x58] sm:$0xff] %vm2256_vm10, %v2231_v24  ;;  %v2209_v48 = vpop.permute.xlu0 %2208  ;;  %v1823_v31 = vadd.f32 %v4174_v42, %v1799_v1  ;;  %v2675_v24 = vld [vmem:[#allocation3 + $0xca] sm:$0xff] }
 0x373   : > { %2261 = vst.msk [vmem:[#allocation5 + $0x20] sm:$0xff] %vm2256_vm10, %v2217_v50 }
 0x374   : > { %2257 = vst.msk [vmem:[#allocation5] sm:$0xff] %vm2256_vm10, %v2209_v48 }
 0x377   : > { %2619 = vrot.lane.b32.xlu2 %v4442_v38, %s3302_s24  ;;  %2313 = vrot.lane.b32.xlu1 %v4366_v60, %s3300_s28 }
 0x378   : > { %2522 = vrot.lane.b32.xlu0 %v4415_v28, %s3301_s25  ;;  %v1843_v28 = vmax.f32 %v1823_v31, 0.0 }
 0x379   : > { %v2306_v21 = vpop.permute.xlu2 %2305  ;;  %v2223_v37 = vpop.permute.xlu1 %2222 }
 0x37a   : > { %2354 = vst.msk [vmem:[#allocation5] sm:$0xff] %vm2353_vm11, %v2306_v21  ;;  %v2215_v60 = vpop.permute.xlu0 %2214  ;;  %v1905_v12 = vsel %vm4665_vm4, %v1843_v28, 0.0 }
 0x37b   : > { %2264 = vst.msk [vmem:[#allocation5 + $0x38] sm:$0xff] %vm2256_vm10, %v2223_v37 }
 0x37c   : > { %2260 = vst.msk [vmem:[#allocation5 + $0x18] sm:$0xff] %vm2256_vm10, %v2215_v60 }
 0x37d   : > { %1947 = vst.msk [vmem:[#allocation3 + $0xd9] sm:$0xff] %vm1928_vm0, %v1905_v12 }
 0x37f   : > { %2410 = vrot.lane.b32.xlu2 %v4476_v8, %s3303_s27  ;;  %2508 = vrot.lane.b32.xlu1 %v4430_v2, %s3301_s25  ;;  %v2779_v8 = vld [vmem:[%s4998_s6 + $0x20] sm:$0xff]  ;;  %v1844_v2 = vmax.f32 %v1824_v36, 0.0 }
 0x380   : > { %2716 = vrot.lane.b32.xlu0 %v4515_v14, %s3304_s23  ;;  %2844 = vmatpush.msra.mxu1 %v2779_v8 }
 0x381   : > { %v2598_v58 = vpop.permute.xlu2 %2597  ;;  %v2229_v0 = vpop.permute.xlu1 %2228  ;;  %v1906_v42 = vsel %vm4665_vm4, %v1844_v2, 0.0  ;;  %3190 = vmatpush.msra.mxu3 %v2779_v8 }
 0x382   : > { %2267 = vst.msk [vmem:[#allocation5 + $0x50] sm:$0xff] %vm2256_vm10, %v2229_v0  ;;  %v2221_v41 = vpop.permute.xlu0 %2220  ;;  %2845 = vmatpush.msra.mxu1 %v2778_v23 }
 0x383   : > { %2263 = vst.msk [vmem:[#allocation5 + $0x30] sm:$0xff] %vm2256_vm10, %v2221_v41  ;;  %3191 = vmatpush.msra.mxu3 %v2778_v23 }
 0x384   : > { %1948 = vst.msk [vmem:[#allocation3 + $0xe1] sm:$0xff] %vm1928_vm0, %v1906_v42  ;;  %2846 = vmatpush.msra.mxu1 %v2777_v43  ;;  %v2482_v21 = vld [vmem:[#allocation3 + $0xd8] sm:$0xff] }
 0x385   : > { %3192 = vmatpush.msra.mxu3 %v2777_v43  ;;  %v2579_v12 = vld [vmem:[#allocation3 + $0xd9] sm:$0xff]  ;;  %v2573_v42 = vld [vmem:[#allocation3 + $0x91] sm:$0xff] }
 0x386   : > { %2847 = vmatpush.msra.mxu1 %v2776_v49 }
 0x387   : > { %2426 = vrot.lane.b32.xlu2 %v4503_v5, %s3303_s27  ;;  %2524 = vrot.lane.b32.xlu1 %v4704_v35, %s3301_s25 }
 0x388   : > { %2329 = vrot.lane.b32.xlu0 %v4459_v40, %s3300_s28  ;;  %2848 = vmatpush.msra.mxu1 %v2775_v55 }
 0x389   : > { %v2405_v44 = vpop.permute.xlu2 %2404  ;;  %v2235_v54 = vpop.permute.xlu1 %2234  ;;  %3193 = vmatpush.msra.mxu3 %v2776_v49 }
 0x38a   : > { %2270 = vst.msk [vmem:[#allocation5 + $0x68] sm:$0xff] %vm2256_vm10, %v2235_v54  ;;  %v2227_v5 = vpop.permute.xlu0 %2226 }
 0x38b   : > { %2266 = vst.msk [vmem:[#allocation5 + $0x48] sm:$0xff] %vm2256_vm10, %v2227_v5  ;;  %3194 = vmatpush.msra.mxu3 %v2775_v55  ;;  %v2676_v31 = vld [vmem:[#allocation3 + $0xda] sm:$0xff] }
 0x38c   : > { %v2580_v41 = vld [vmem:[#allocation3 + $0xe1] sm:$0xff] }
 0x38f   : > { %2702 = vrot.lane.b32.xlu2 %v4478_v57, %s3304_s23  ;;  %2718 = vrot.lane.b32.xlu1 %v4721_v13, %s3304_s23 }
 0x390   : > { %2605 = vrot.lane.b32.xlu0 %v4420_v33, %s3302_s24 }
 0x391   : > { %v2421_v40 = vpop.permute.xlu2 %2420  ;;  %v2501_v25 = vpop.permute.xlu1 %2500 }
 0x392   : > { %v2233_v56 = vpop.permute.xlu0 %2232 }
 0x393   : > { %2269 = vst.msk [vmem:[#allocation5 + $0x60] sm:$0xff] %vm2256_vm10, %v2233_v56 }
 0x397   : > { %2315 = vrot.lane.b32.xlu2 %v4391_v22, %s3300_s28  ;;  %2331 = vrot.lane.b32.xlu1 %v4442_v38, %s3300_s28 }
 0x398   : > { %2621 = vrot.lane.b32.xlu0 %v2577_v62, %s3302_s24 }
 0x399   : > { %v2697_v45 = vpop.permute.xlu2 %2696  ;;  %v2308_v53 = vpop.permute.xlu1 %2307 }
 0x39a   : > { %2355 = vst.msk [vmem:[#allocation5 + $0x8] sm:$0xff] %vm2353_vm11, %v2308_v53  ;;  %v2403_v18 = vpop.permute.xlu0 %2402 }
 0x39b   : > { %2451 = vst.msk [vmem:[#allocation5] sm:$0xff] %vm2450_vm5, %v2403_v18 }
 0x39c   : > { %2549 = vst.msk [vmem:[#allocation5] sm:$0xff] %vm2548_vm7, %v2501_v25 }
 0x39d   : > { %2452 = vst.msk [vmem:[#allocation5 + $0x8] sm:$0xff] %vm2450_vm5, %v2405_v44 }
 0x39e   : > { %2646 = vst.msk [vmem:[#allocation5] sm:$0xff] %vm2645_vm8, %v2598_v58 }
 0x39f   : > { %2510 = vrot.lane.b32.xlu2 %v4422_v9, %s3301_s25  ;;  %2607 = vrot.lane.b32.xlu1 %v4389_v52, %s3302_s24 }
 0x3a0   : > { %2412 = vrot.lane.b32.xlu0 %v4497_v4, %s3303_s27 }
 0x3a1   : > { %v2310_v22 = vpop.permute.xlu2 %2309  ;;  %v2503_v38 = vpop.permute.xlu1 %2502 }
 0x3a2   : > { %2356 = vst.msk [vmem:[#allocation5 + $0x10] sm:$0xff] %vm2353_vm11, %v2310_v22  ;;  %v2695_v61 = vpop.permute.xlu0 %2694 }
 0x3a3   : > { %2550 = vst.msk [vmem:[#allocation5 + $0x8] sm:$0xff] %vm2548_vm7, %v2503_v38 }
 0x3a4   : > { %2743 = vst.msk [vmem:[#allocation5] sm:$0xff] %vm2742_vm12, %v2695_v61 }
 0x3a7   : > { %2526 = vrot.lane.b32.xlu2 %v4749_v30, %s3301_s25  ;;  %2623 = vrot.lane.b32.xlu1 %v4751_v11, %s3302_s24 }
 0x3a8   : > { %2428 = vrot.lane.b32.xlu0 %v4515_v14, %s3303_s27 }
 0x3a9   : > { %v2505_v9 = vpop.permute.xlu2 %2504  ;;  %v2519_v4 = vpop.permute.xlu1 %2518 }
 0x3aa   : > { %v2324_v6 = vpop.permute.xlu0 %2323 }
 0x3ab   : > { %2363 = vst.msk [vmem:[#allocation5 + $0x48] sm:$0xff] %vm2353_vm11, %v2324_v6  ;;  %v2759_v26 = vld [vmem:[#allocation5] sm:$0xff]  ;;  %v4868_v6 = vld [vmem:[%s4999_s7] ss:$0 sm:$0xff] }
 0x3ac   : > { %2460 = vst.msk [vmem:[#allocation5 + $0x48] sm:$0xff] %vm2450_vm5, %v2421_v40  ;;  %3157 = vmatmul.msk.f32.vlgmr.msra.gmra.mxu1 %vm2784_vm13, %v2759_v26  ;;  %v4874_v26 = vld [vmem:[%s5000_s8] ss:$0 sm:$0xff] }
 0x3ad   : > { %2558 = vst.msk [vmem:[#allocation5 + $0x48] sm:$0xff] %vm2548_vm7, %v2519_v4 }
 0x3af   : > { %2720 = vrot.lane.b32.xlu2 %v2675_v24, %s3304_s23  ;;  %2236 = vrot.lane.b32.xlu1 %v4704_v35, %s3298_s19 }
 0x3b0   : > { %2704 = vrot.lane.b32.xlu0 %v4489_v34, %s3304_s23 }
 0x3b1   : > { %v2521_v14 = vpop.permute.xlu2 %2520  ;;  %v2713_v50 = vpop.permute.xlu1 %2712 }
 0x3b2   : > { %v2600_v48 = vpop.permute.xlu0 %2599 }
 0x3b3   : > { %2647 = vst.msk [vmem:[#allocation5 + $0x8] sm:$0xff] %vm2645_vm8, %v2600_v48 }
 0x3b4   : > { %2744 = vst.msk [vmem:[#allocation5 + $0x8] sm:$0xff] %vm2742_vm12, %v2697_v45 }
 0x3b7   : > { %2414 = vrot.lane.b32.xlu2 %v4478_v57, %s3303_s27  ;;  %2512 = vrot.lane.b32.xlu1 %v4285_v29, %s3301_s25 }
 0x3b8   : > { %2317 = vrot.lane.b32.xlu0 %v4420_v33, %s3300_s28 }
 0x3b9   : > { %v2715_v51 = vpop.permute.xlu2 %2714  ;;  %v2326_v17 = vpop.permute.xlu1 %2325 }
 0x3ba   : > { %2364 = vst.msk [vmem:[#allocation5 + $0x50] sm:$0xff] %vm2353_vm11, %v2326_v17  ;;  %v2616_v1 = vpop.permute.xlu0 %2615 }
 0x3bb   : > { %2655 = vst.msk [vmem:[#allocation5 + $0x48] sm:$0xff] %vm2645_vm8, %v2616_v1  ;;  %v2760_v15 = vld [vmem:[#allocation5 + $0x8] sm:$0xff] }
 0x3bc   : > { %2752 = vst.msk [vmem:[#allocation5 + $0x48] sm:$0xff] %vm2742_vm12, %v2713_v50  ;;  %3158 = vmatmul.msk.f32.gmra.mxu1 %vm2784_vm13, %v2760_v15 }
 0x3bf   : > { %2430 = vrot.lane.b32.xlu2 %v4721_v13, %s3303_s27  ;;  %2528 = vrot.lane.b32.xlu1 %v2482_v21, %s3301_s25 }
 0x3c0   : > { %2333 = vrot.lane.b32.xlu0 %v2577_v62, %s3300_s28 }
 0x3c1   : > { %v2328_v29 = vpop.permute.xlu2 %2327  ;;  %v2602_v33 = vpop.permute.xlu1 %2601 }
 0x3c2   : > { %2365 = vst.msk [vmem:[#allocation5 + $0x58] sm:$0xff] %vm2353_vm11, %v2328_v29  ;;  %v2407_v57 = vpop.permute.xlu0 %2406 }
 0x3c3   : > { %2453 = vst.msk [vmem:[#allocation5 + $0x10] sm:$0xff] %vm2450_vm5, %v2407_v57  ;;  %v2768_v37 = vld [vmem:[#allocation5 + $0x48] sm:$0xff] }
 0x3c4   : > { %2551 = vst.msk [vmem:[#allocation5 + $0x10] sm:$0xff] %vm2548_vm7, %v2505_v9  ;;  %3166 = vmatmul.msk.f32.vlgmr.msra.gmra.mxu3 %vm2784_vm13, %v2768_v37 }
 0x3c5   : > { %2648 = vst.msk [vmem:[#allocation5 + $0x10] sm:$0xff] %vm2645_vm8, %v2602_v33 }
 0x3c7   : > { %2706 = vrot.lane.b32.xlu2 %v4509_v3, %s3304_s23  ;;  %2722 = vrot.lane.b32.xlu1 %v2676_v31, %s3304_s23 }
 0x3c8   : > { %2609 = vrot.lane.b32.xlu0 %v4413_v19, %s3302_s24 }
 0x3c9   : > { %v2604_v60 = vpop.permute.xlu2 %2603  ;;  %v2618_v46 = vpop.permute.xlu1 %2617 }
 0x3ca   : > { %v2423_v28 = vpop.permute.xlu0 %2422 }
 0x3cb   : > { %2461 = vst.msk [vmem:[#allocation5 + $0x50] sm:$0xff] %vm2450_vm5, %v2423_v28 }
 0x3cc   : > { %2559 = vst.msk [vmem:[#allocation5 + $0x50] sm:$0xff] %vm2548_vm7, %v2521_v14 }
 0x3cd   : > { %2656 = vst.msk [vmem:[#allocation5 + $0x50] sm:$0xff] %vm2645_vm8, %v2618_v46 }
 0x3ce   : > { %2753 = vst.msk [vmem:[#allocation5 + $0x50] sm:$0xff] %vm2742_vm12, %v2715_v51 }
 0x3cf   : > { %2319 = vrot.lane.b32.xlu2 %v4389_v52, %s3300_s28  ;;  %2416 = vrot.lane.b32.xlu1 %v4489_v34, %s3303_s27 }
 0x3d0   : > { %2625 = vrot.lane.b32.xlu0 %v2579_v12, %s3302_s24 }
 0x3d1   : > { %v2620_v10 = vpop.permute.xlu2 %2619  ;;  %v2409_v7 = vpop.permute.xlu1 %2408 }
 0x3d2   : > { %v2699_v20 = vpop.permute.xlu0 %2698 }
 0x3d3   : > { %2745 = vst.msk [vmem:[#allocation5 + $0x10] sm:$0xff] %vm2742_vm12, %v2699_v20 }
 0x3d5   : > { %v2769_v47 = vld [vmem:[#allocation5 + $0x50] sm:$0xff] }
 0x3d6   : > { %3167 = vmatmul.msk.f32.gmra.mxu3 %vm2784_vm13, %v2769_v47 }
 0x3d7   : > { %2335 = vrot.lane.b32.xlu2 %v4751_v11, %s3300_s28  ;;  %2432 = vrot.lane.b32.xlu1 %v2675_v24, %s3303_s27 }
 0x3d8   : > { %2238 = vrot.lane.b32.xlu0 %v4749_v30, %s3298_s19  ;;  %s3131_s19 = sshll.u32 %s3274_s30, 4 }
 0x3d9   : > { %v2411_v52 = vpop.permute.xlu2 %2410  ;;  %v2425_v34 = vpop.permute.xlu1 %2424  ;;  %p502_p13 = scmp.lt.s32.totalorder %s3131_s19, 31 }
 0x3da   : > { %2462 = vst.msk [vmem:[#allocation5 + $0x58] sm:$0xff] %vm2450_vm5, %v2425_v34  ;;  %v2312_v32 = vpop.permute.xlu0 %2311  ;;  %v2761_v58 = vld [vmem:[#allocation5 + $0x10] sm:$0xff] }
 0x3db   : > { %2357 = vst.msk [vmem:[#allocation5 + $0x18] sm:$0xff] %vm2353_vm11, %v2312_v32  ;;  %3159 = vmatmul.msk.f32.gmra.mxu1 %vm2784_vm13, %v2761_v58  ;;  %s5043_s19 = smov (!%p502_p13, %s3131_s19), 31 }
 0x3dc   : > { %2454 = vst.msk [vmem:[#allocation5 + $0x18] sm:$0xff] %vm2450_vm5, %v2409_v7  ;;  %s505_s30 = sadd.s32 %s3392_s18, %s5043_s19 }
 0x3df   : > { %2611 = vrot.lane.b32.xlu2 %v4450_v27, %s3302_s24  ;;  %2708 = vrot.lane.b32.xlu1 %v4491_v63, %s3304_s23  ;;  %v2483_v27 = vld [vmem:[#allocation3 + $0xe0] sm:$0xff] }
 0x3e0   : > { %2514 = vrot.lane.b32.xlu0 %v4314_v59, %s3301_s25 }
 0x3e1   : > { %v2427_v0 = vpop.permute.xlu2 %2426  ;;  %v2701_v36 = vpop.permute.xlu1 %2700 }
 0x3e2   : > { %v2507_v8 = vpop.permute.xlu0 %2506 }
 0x3e3   : > { %2552 = vst.msk [vmem:[#allocation5 + $0x18] sm:$0xff] %vm2548_vm7, %v2507_v8 }
 0x3e4   : > { %2649 = vst.msk [vmem:[#allocation5 + $0x18] sm:$0xff] %vm2645_vm8, %v2604_v60 }
 0x3e5   : > { %2746 = vst.msk [vmem:[#allocation5 + $0x18] sm:$0xff] %vm2742_vm12, %v2701_v36 }
 0x3e7   : > { %2627 = vrot.lane.b32.xlu2 %v2580_v41, %s3302_s24  ;;  %2321 = vrot.lane.b32.xlu1 %v4413_v19, %s3300_s28  ;;  %v2677_v19 = vld [vmem:[#allocation3 + $0xe2] sm:$0xff] }
 0x3e8   : > { %2530 = vrot.lane.b32.xlu0 %v2483_v27, %s3301_s25 }
 0x3e9   : > { %v2703_v63 = vpop.permute.xlu2 %2702  ;;  %v2314_v59 = vpop.permute.xlu1 %2313 }
 0x3ea   : > { %2358 = vst.msk [vmem:[#allocation5 + $0x20] sm:$0xff] %vm2353_vm11, %v2314_v59  ;;  %v2523_v2 = vpop.permute.xlu0 %2522 }
 0x3eb   : > { %2455 = vst.msk [vmem:[#allocation5 + $0x20] sm:$0xff] %vm2450_vm5, %v2411_v52 }
 0x3ec   : > { %2560 = vst.msk [vmem:[#allocation5 + $0x58] sm:$0xff] %vm2548_vm7, %v2523_v2  ;;  %v2762_v23 = vld [vmem:[#allocation5 + $0x18] sm:$0xff] }
 0x3ed   : > { %2657 = vst.msk [vmem:[#allocation5 + $0x58] sm:$0xff] %vm2645_vm8, %v2620_v10  ;;  %3160 = vmatmul.msk.f32.gmra.mxu1 %vm2784_vm13, %v2762_v23 }
 0x3ef   : > { %2418 = vrot.lane.b32.xlu2 %v4509_v3, %s3303_s27  ;;  %2613 = vrot.lane.b32.xlu1 %v2573_v42, %s3302_s24 }
 0x3f0   : > { %2724 = vrot.lane.b32.xlu0 %v2677_v19, %s3304_s23 }
 0x3f1   : > { %v2316_v43 = vpop.permute.xlu2 %2315  ;;  %v2509_v35 = vpop.permute.xlu1 %2508 }
 0x3f2   : > { %2359 = vst.msk [vmem:[#allocation5 + $0x28] sm:$0xff] %vm2353_vm11, %v2316_v43  ;;  %v2717_v49 = vpop.permute.xlu0 %2716 }
 0x3f3   : > { %2553 = vst.msk [vmem:[#allocation5 + $0x20] sm:$0xff] %vm2548_vm7, %v2509_v35 }
 0x3f4   : > { %2754 = vst.msk [vmem:[#allocation5 + $0x58] sm:$0xff] %vm2742_vm12, %v2717_v49 }
 0x3f7   : > { %2710 = vrot.lane.b32.xlu2 %v4501_v16, %s3304_s23  ;;  %s3133_s23 = sshll.u32 %s505_s30, 3 }
 0x3f8   : > { %2516 = vrot.lane.b32.xlu0 %v4334_v39, %s3301_s25  ;;  %s4885_s17 = scalar_lea.vmem %s5001_s9, %s3133_s23 }
 0x3f9   : > { %v2511_v3 = vpop.permute.xlu2 %2510  ;;  %v2525_v44 = vpop.permute.xlu1 %2524 }
 0x3fa   : > { %v2330_v54 = vpop.permute.xlu0 %2329 }
 0x3fb   : > { %2366 = vst.msk [vmem:[#allocation5 + $0x60] sm:$0xff] %vm2353_vm11, %v2330_v54  ;;  %v2770_v55 = vld [vmem:[#allocation5 + $0x58] sm:$0xff] }
 0x3fc   : > { %2463 = vst.msk [vmem:[#allocation5 + $0x60] sm:$0xff] %vm2450_vm5, %v2427_v0  ;;  %3168 = vmatmul.msk.f32.gmra.mxu3 %vm2784_vm13, %v2770_v55 }
 0x3fd   : > { %2561 = vst.msk [vmem:[#allocation5 + $0x60] sm:$0xff] %vm2548_vm7, %v2525_v44 }
 0x401   : > { %v2527_v5 = vpop.permute.xlu2 %2526  ;;  %v2719_v13 = vpop.permute.xlu1 %2718 }
 0x402   : > { %v2606_v40 = vpop.permute.xlu0 %2605 }
 0x403   : > { %2650 = vst.msk [vmem:[#allocation5 + $0x20] sm:$0xff] %vm2645_vm8, %v2606_v40 }
 0x404   : > { %2747 = vst.msk [vmem:[#allocation5 + $0x20] sm:$0xff] %vm2742_vm12, %v2703_v63 }
 0x409   : > { %v2721_v39 = vpop.permute.xlu2 %2720  ;;  %v2332_v16 = vpop.permute.xlu1 %2331 }
 0x40a   : > { %2367 = vst.msk [vmem:[#allocation5 + $0x68] sm:$0xff] %vm2353_vm11, %v2332_v16  ;;  %v2622_v25 = vpop.permute.xlu0 %2621 }
 0x40b   : > { %2658 = vst.msk [vmem:[#allocation5 + $0x60] sm:$0xff] %vm2645_vm8, %v2622_v25  ;;  %v2763_v56 = vld [vmem:[#allocation5 + $0x20] sm:$0xff] }
 0x40c   : > { %2755 = vst.msk [vmem:[#allocation5 + $0x60] sm:$0xff] %vm2742_vm12, %v2719_v13  ;;  %3161 = vmatmul.msk.f32.gmra.mxu1 %vm2784_vm13, %v2763_v56 }
 0x411   : > { %v2415_v62 = vpop.permute.xlu2 %2414  ;;  %v2608_v45 = vpop.permute.xlu1 %2607 }
 0x412   : > { %v2413_v53 = vpop.permute.xlu0 %2412 }
 0x413   : > { %2456 = vst.msk [vmem:[#allocation5 + $0x28] sm:$0xff] %vm2450_vm5, %v2413_v53  ;;  %v2771_v18 = vld [vmem:[#allocation5 + $0x60] sm:$0xff] }
 0x414   : > { %2554 = vst.msk [vmem:[#allocation5 + $0x28] sm:$0xff] %vm2548_vm7, %v2511_v3  ;;  %3169 = vmatmul.msk.f32.gmra.mxu3 %vm2784_vm13, %v2771_v18 }
 0x415   : > { %2651 = vst.msk [vmem:[#allocation5 + $0x28] sm:$0xff] %vm2645_vm8, %v2608_v45 }
 0x419   : > { %v2431_v22 = vpop.permute.xlu2 %2430  ;;  %v2624_v38 = vpop.permute.xlu1 %2623 }
 0x41a   : > { %v2429_v61 = vpop.permute.xlu0 %2428 }
 0x41b   : > { %2464 = vst.msk [vmem:[#allocation5 + $0x68] sm:$0xff] %vm2450_vm5, %v2429_v61 }
 0x41c   : > { %2562 = vst.msk [vmem:[#allocation5 + $0x68] sm:$0xff] %vm2548_vm7, %v2527_v5 }
 0x41d   : > { %2659 = vst.msk [vmem:[#allocation5 + $0x68] sm:$0xff] %vm2645_vm8, %v2624_v38 }
 0x41e   : > { %2756 = vst.msk [vmem:[#allocation5 + $0x68] sm:$0xff] %vm2742_vm12, %v2721_v39 }
 0x421   : > { %v2707_v30 = vpop.permute.xlu2 %2706  ;;  %v2237_v11 = vpop.permute.xlu1 %2236 }
 0x422   : > { %2271 = vst.msk [vmem:[#allocation5 + $0x70] sm:$0xff] %vm2256_vm10, %v2237_v11  ;;  %v2705_v9 = vpop.permute.xlu0 %2704 }
 0x423   : > { %2748 = vst.msk [vmem:[#allocation5 + $0x28] sm:$0xff] %vm2742_vm12, %v2705_v9 }
 0x425   : > { %v2772_v4 = vld [vmem:[#allocation5 + $0x68] sm:$0xff] }
 0x426   : > { %3170 = vmatmul.msk.f32.gmra.mxu3 %vm2784_vm13, %v2772_v4 }
 0x429   : > { %v2850_v24 = vpop.f32.mrf.mxu1  ;;  %v2320_v14 = vpop.permute.xlu2 %2319 }
 0x42a   : > { %v2902_v50 = vmul.f32 %v4868_v6, %v2850_v24  ;;  %2361 = vst.msk [vmem:[#allocation5 + $0x38] sm:$0xff] %vm2353_vm11, %v2320_v14  ;;  %v2513_v48 = vpop.permute.xlu1 %2512  ;;  %v2318_v51 = vpop.permute.xlu0 %2317  ;;  %v2764_v17 = vld [vmem:[#allocation5 + $0x28] sm:$0xff] }
 0x42b   : > { %2360 = vst.msk [vmem:[#allocation5 + $0x30] sm:$0xff] %vm2353_vm11, %v2318_v51  ;;  %3162 = vmatmul.msk.f32.gmra.mxu1 %vm2784_vm13, %v2764_v17 }
 0x42c   : > { %v2922_v1 = vadd.f32 %v4874_v26, %v2902_v50  ;;  %2457 = vst.msk [vmem:[#allocation5 + $0x30] sm:$0xff] %vm2450_vm5, %v2415_v62 }
 0x42d   : > { %2555 = vst.msk [vmem:[#allocation5 + $0x30] sm:$0xff] %vm2548_vm7, %v2513_v48 }
 0x42e   : > { %v2938_v15 = vmax.f32 %v2922_v1, 0.0 }
 0x430   : > { %2954 = vst.msk [vmem:[%s4885_s17] sm:$0xff] %vm1928_vm0, %v2938_v15 }
 0x431   : > { %v2336_v46 = vpop.permute.xlu2 %2335 }
 0x432   : > { %v2529_v21 = vpop.permute.xlu1 %2528  ;;  %v2334_v29 = vpop.permute.xlu0 %2333 }
 0x433   : > { %2368 = vst.msk [vmem:[#allocation5 + $0x70] sm:$0xff] %vm2353_vm11, %v2334_v29 }
 0x434   : > { %2465 = vst.msk [vmem:[#allocation5 + $0x70] sm:$0xff] %vm2450_vm5, %v2431_v22 }
 0x435   : > { %2563 = vst.msk [vmem:[#allocation5 + $0x70] sm:$0xff] %vm2548_vm7, %v2529_v21 }
 0x439   : > { %v2853_v33 = vpop.f32.mrf.mxu1  ;;  %v2612_v20 = vpop.permute.xlu2 %2611 }
 0x43a   : > { %v2903_v57 = vmul.f32 %v4868_v6, %v2853_v33  ;;  %v2723_v37 = vpop.permute.xlu1 %2722  ;;  %v2610_v31 = vpop.permute.xlu0 %2609 }
 0x43b   : > { %2652 = vst.msk [vmem:[#allocation5 + $0x30] sm:$0xff] %vm2645_vm8, %v2610_v31 }
 0x43c   : > { %v2923_v60 = vadd.f32 %v4874_v26, %v2903_v57  ;;  %2749 = vst.msk [vmem:[#allocation5 + $0x30] sm:$0xff] %vm2742_vm12, %v2707_v30 }
 0x43e   : > { %v2939_v28 = vmax.f32 %v2923_v60, 0.0 }
 0x440   : > { %2955 = vst.msk [vmem:[%s4885_s17 + $0x8] sm:$0xff] %vm1928_vm0, %v2939_v28 }
 0x441   : > { %v2628_v8 = vpop.permute.xlu2 %2627 }
 0x442   : > { %v2417_v12 = vpop.permute.xlu1 %2416  ;;  %v2626_v10 = vpop.permute.xlu0 %2625 }
 0x443   : > { %2458 = vst.msk [vmem:[#allocation5 + $0x38] sm:$0xff] %vm2450_vm5, %v2417_v12  ;;  %v2765_v7 = vld [vmem:[#allocation5 + $0x30] sm:$0xff] }
 0x444   : > { %2660 = vst.msk [vmem:[#allocation5 + $0x70] sm:$0xff] %vm2645_vm8, %v2626_v10  ;;  %3163 = vmatmul.msk.f32.gmra.mxu1 %vm2784_vm13, %v2765_v7 }
 0x445   : > { %2757 = vst.msk [vmem:[#allocation5 + $0x70] sm:$0xff] %vm2742_vm12, %v2723_v37 }
 0x447   : > { %v2877_v47 = vpop.f32.mrf.mxu3 }
 0x448   : > { %v2911_v52 = vmul.f32 %v4868_v6, %v2877_v47 }
 0x449   : > { %v2419_v43 = vpop.permute.xlu2 %2418 }
 0x44a   : > { %v2931_v34 = vadd.f32 %v4874_v26, %v2911_v52  ;;  %v2433_v32 = vpop.permute.xlu1 %2432  ;;  %v2239_v58 = vpop.permute.xlu0 %2238 }
 0x44b   : > { %2272 = vst.msk [vmem:[#allocation5 + $0x78] sm:$0xff] %vm2256_vm10, %v2239_v58 }
 0x44c   : > { %v2947_v0 = vmax.f32 %v2931_v34, 0.0  ;;  %2369 = vst.msk [vmem:[#allocation5 + $0x78] sm:$0xff] %vm2353_vm11, %v2336_v46  ;;  %v2773_v36 = vld [vmem:[#allocation5 + $0x70] sm:$0xff] }
 0x44d   : > { %2466 = vst.msk [vmem:[#allocation5 + $0x78] sm:$0xff] %vm2450_vm5, %v2433_v32  ;;  %3171 = vmatmul.msk.f32.gmra.mxu3 %vm2784_vm13, %v2773_v36 }
 0x44e   : > { %2963 = vst.msk [vmem:[%s4885_s17 + $0x48] sm:$0xff] %vm1928_vm0, %v2947_v0 }
 0x451   : > { %v2711_v25 = vpop.permute.xlu2 %2710 }
 0x452   : > { %v2709_v41 = vpop.permute.xlu1 %2708  ;;  %v2515_v27 = vpop.permute.xlu0 %2514 }
 0x453   : > { %2556 = vst.msk [vmem:[#allocation5 + $0x38] sm:$0xff] %vm2548_vm7, %v2515_v27 }
 0x454   : > { %2653 = vst.msk [vmem:[#allocation5 + $0x38] sm:$0xff] %vm2645_vm8, %v2612_v20 }
 0x455   : > { %2750 = vst.msk [vmem:[#allocation5 + $0x38] sm:$0xff] %vm2742_vm12, %v2709_v41 }
 0x458   : > { %v2856_v63 = vpop.f32.mrf.mxu1 }
 0x459   : > { %v2904_v59 = vmul.f32 %v4868_v6, %v2856_v63  ;;  %v2880_v2 = vpop.f32.mrf.mxu3 }
 0x45a   : > { %v2912_v23 = vmul.f32 %v4868_v6, %v2880_v2  ;;  %v2322_v42 = vpop.permute.xlu1 %2321  ;;  %v2531_v19 = vpop.permute.xlu0 %2530 }
 0x45b   : > { %v2924_v35 = vadd.f32 %v4874_v26, %v2904_v59  ;;  %2362 = vst.msk [vmem:[#allocation5 + $0x40] sm:$0xff] %vm2353_vm11, %v2322_v42 }
 0x45c   : > { %v2932_v49 = vadd.f32 %v4874_v26, %v2912_v23  ;;  %2459 = vst.msk [vmem:[#allocation5 + $0x40] sm:$0xff] %vm2450_vm5, %v2419_v43  ;;  %v2766_v3 = vld [vmem:[#allocation5 + $0x38] sm:$0xff] }
 0x45d   : > { %v2940_v44 = vmax.f32 %v2924_v35, 0.0  ;;  %2564 = vst.msk [vmem:[#allocation5 + $0x78] sm:$0xff] %vm2548_vm7, %v2531_v19  ;;  %3164 = vmatmul.msk.f32.gmra.mxu1 %vm2784_vm13, %v2766_v3 }
 0x45e   : > { %v2948_v54 = vmax.f32 %v2932_v49, 0.0  ;;  %2661 = vst.msk [vmem:[#allocation5 + $0x78] sm:$0xff] %vm2645_vm8, %v2628_v8 }
 0x45f   : > { %2956 = vst.msk [vmem:[%s4885_s17 + $0x10] sm:$0xff] %vm1928_vm0, %v2940_v44 }
 0x460   : > { %2964 = vst.msk [vmem:[%s4885_s17 + $0x50] sm:$0xff] %vm1928_vm0, %v2948_v54 }
 0x462   : > { %v2725_v55 = vpop.permute.xlu0 %2724  ;;  %v2614_v39 = vpop.permute.xlu1 %2613 }
 0x463   : > { %2758 = vst.msk [vmem:[#allocation5 + $0x78] sm:$0xff] %vm2742_vm12, %v2725_v55 }
 0x46a   : > { %v2859_v5 = vpop.f32.mrf.mxu1  ;;  %v2517_v13 = vpop.permute.xlu0 %2516  ;;  %v2774_v40 = vld [vmem:[#allocation5 + $0x78] sm:$0xff] }
 0x46b   : > { %v2905_v16 = vmul.f32 %v4868_v6, %v2859_v5  ;;  %2557 = vst.msk [vmem:[#allocation5 + $0x40] sm:$0xff] %vm2548_vm7, %v2517_v13  ;;  %3172 = vmatmul.msk.f32.gmra.mxu3 %vm2784_vm13, %v2774_v40 }
 0x46c   : > { %2654 = vst.msk [vmem:[#allocation5 + $0x40] sm:$0xff] %vm2645_vm8, %v2614_v39 }
 0x46d   : > { %v2925_v56 = vadd.f32 %v4874_v26, %v2905_v16  ;;  %2751 = vst.msk [vmem:[#allocation5 + $0x40] sm:$0xff] %vm2742_vm12, %v2711_v25 }
 0x46f   : > { %v2941_v62 = vmax.f32 %v2925_v56, 0.0 }
 0x471   : > { %2957 = vst.msk [vmem:[%s4885_s17 + $0x18] sm:$0xff] %vm1928_vm0, %v2941_v62 }
 0x474   : > { %v2767_v45 = vld [vmem:[#allocation5 + $0x40] sm:$0xff] }
 0x475   : > { %3165 = vmatmul.msk.f32.gmra.mxu1 %vm2784_vm13, %v2767_v45 }
 0x47f   : > { %v2883_v53 = vpop.f32.mrf.mxu3 }
 0x480   : > { %v2913_v18 = vmul.f32 %v4868_v6, %v2883_v53 }
 0x482   : > { %v2933_v22 = vadd.f32 %v4874_v26, %v2913_v18 }
 0x484   : > { %v2949_v38 = vmax.f32 %v2933_v22, 0.0 }
 0x486   : > { %2965 = vst.msk [vmem:[%s4885_s17 + $0x58] sm:$0xff] %vm1928_vm0, %v2949_v38 }
 0x489   : > { %v2862_v61 = vpop.f32.mrf.mxu1 }
 0x48a   : > { %v2906_v30 = vmul.f32 %v4868_v6, %v2862_v61 }
 0x48c   : > { %v2926_v11 = vadd.f32 %v4874_v26, %v2906_v30 }
 0x48e   : > { %v2942_v9 = vmax.f32 %v2926_v11, 0.0 }
 0x490   : > { %2958 = vst.msk [vmem:[%s4885_s17 + $0x20] sm:$0xff] %vm1928_vm0, %v2942_v9 }
 0x497   : > { %v2886_v4 = vpop.f32.mrf.mxu3 }
 0x498   : > { %v2914_v24 = vmul.f32 %v4868_v6, %v2886_v4 }
 0x49a   : > { %v2934_v14 = vadd.f32 %v4874_v26, %v2914_v24 }
 0x49c   : > { %v2950_v50 = vmax.f32 %v2934_v14, 0.0 }
 0x49e   : > { %2966 = vst.msk [vmem:[%s4885_s17 + $0x60] sm:$0xff] %vm1928_vm0, %v2950_v50 }
 0x4a8   : > { %v2865_v48 = vpop.f32.mrf.mxu1 }
 0x4a9   : > { %v2907_v51 = vmul.f32 %v4868_v6, %v2865_v48  ;;  %v2889_v17 = vpop.f32.mrf.mxu3 }
 0x4aa   : > { %v2915_v1 = vmul.f32 %v4868_v6, %v2889_v17 }
 0x4ab   : > { %v2927_v15 = vadd.f32 %v4874_v26, %v2907_v51 }
 0x4ac   : > { %v2935_v21 = vadd.f32 %v4874_v26, %v2915_v1 }
 0x4ad   : > { %v2943_v29 = vmax.f32 %v2927_v15, 0.0 }
 0x4ae   : > { %v2951_v33 = vmax.f32 %v2935_v21, 0.0 }
 0x4af   : > { %2959 = vst.msk [vmem:[%s4885_s17 + $0x28] sm:$0xff] %vm1928_vm0, %v2943_v29 }
 0x4b0   : > { %2967 = vst.msk [vmem:[%s4885_s17 + $0x68] sm:$0xff] %vm1928_vm0, %v2951_v33 }
 0x4c1   : > { %v2868_v57 = vpop.f32.mrf.mxu1 }
 0x4c2   : > { %v2908_v37 = vmul.f32 %v4868_v6, %v2868_v57 }
 0x4c4   : > { %v2928_v31 = vadd.f32 %v4874_v26, %v2908_v37 }
 0x4c6   : > { %v2944_v60 = vmax.f32 %v2928_v31, 0.0 }
 0x4c8   : > { %2960 = vst.msk [vmem:[%s4885_s17 + $0x30] sm:$0xff] %vm1928_vm0, %v2944_v60 }
 0x4d0   : > { %v2892_v46 = vpop.f32.mrf.mxu3 }
 0x4d1   : > { %v2916_v28 = vmul.f32 %v4868_v6, %v2892_v46 }
 0x4d3   : > { %v2936_v12 = vadd.f32 %v4874_v26, %v2916_v28 }
 0x4d5   : > { %v2952_v10 = vmax.f32 %v2936_v12, 0.0 }
 0x4d7   : > { %2968 = vst.msk [vmem:[%s4885_s17 + $0x70] sm:$0xff] %vm1928_vm0, %v2952_v10 }
 0x4da   : > { %v2871_v7 = vpop.f32.mrf.mxu1 }
 0x4db   : > { %v2909_v20 = vmul.f32 %v4868_v6, %v2871_v7 }
 0x4dd   : > { %v2929_v47 = vadd.f32 %v4874_v26, %v2909_v20 }
 0x4df   : > { %v2945_v52 = vmax.f32 %v2929_v47, 0.0 }
 0x4e1   : > { %2961 = vst.msk [vmem:[%s4885_s17 + $0x38] sm:$0xff] %vm1928_vm0, %v2945_v52 }
 0x4ee   : > { %v2895_v34 = vpop.f32.mrf.mxu3 }
 0x4ef   : > { %v2917_v32 = vmul.f32 %v4868_v6, %v2895_v34 }
 0x4f1   : > { %v2937_v58 = vadd.f32 %v4874_v26, %v2917_v32 }
 0x4f2   : > { %v2874_v0 = vpop.f32.mrf.mxu1 }
 0x4f3   : > { %v2953_v36 = vmax.f32 %v2937_v58, 0.0  ;;  %v2910_v8 = vmul.f32 %v4868_v6, %v2874_v0 }
 0x4f5   : > { %2969 = vst.msk [vmem:[%s4885_s17 + $0x78] sm:$0xff] %vm1928_vm0, %v2953_v36  ;;  %v2930_v41 = vadd.f32 %v4874_v26, %v2910_v8 }
 0x4f7   : > { %v2946_v27 = vmax.f32 %v2930_v41, 0.0 }
 0x4f9   : > { %2962 = vst.msk [vmem:[%s4885_s17 + $0x40] sm:$0xff] %vm1928_vm0, %v2946_v27 }
 0x4fa PF: > { %s19_s13 = sadd.s32 1, %s3290_s13   ;;  %s5022_s30 = smov %s3282_s11 }
 0x4fb   : > { %p16_p0 = scmp.ge.s32.totalorder %s19_s13, 6   ;;  %s5023_s10 = smov %s3286_s12 }
 0x4fc   : > { %s5024_s11 = smov %s5027_s14  ;;  %s5025_s12 = smov %s5031_s15 }
 0x4fd   :  { %18 = sbr.rel (!%p16_p0) target bundleno = 3 (0x3), region = 97 }

</bundles_post_ra>
